<compile_context>
chip_gen: v7x
topology: tpu7x:2x2x1
jax: 0.10.0
libtpu: 0.0.40
codegen_flags: <defaults>
</compile_context>

<pallas_src>
from functools import partial

import numpy as np
import jax
import jax.numpy as jnp
from jax.experimental import pallas as pl
from jax.experimental.pallas import tpu as pltpu

EPS = 1e-5  # PyTorch BatchNorm2d default eps


# ------------------------------- helpers -------------------------------------


def _round_up(n, m):
    return ((n + m - 1) // m) * m


def _fold_bn(gamma, beta, mean, var):
    scale = (gamma / jnp.sqrt(var + EPS)).astype(jnp.float32)
    bias = (beta - mean * scale).astype(jnp.float32)
    return scale, bias


def _vmem_cap_bytes():
    try:
        return int(pltpu.get_tpu_info().vmem_capacity_bytes)
    except Exception:
        return 64 * 1024 * 1024  # v7x per-core floor; v5e/v6e have 128 MiB


# ------------------------------ fused kernel ----------------------------------


def _make_resblock_kernel(stride, Ho, Wo, Wt, cin_p, cout_p, has_proj, compute_dtype):
    """conv3x3+BN1+ReLU -> conv3x3+BN2 -> (+shortcut) -> ReLU, fully in VMEM."""
    s = stride
    taps = [(kh, kw) for kh in range(3) for kw in range(3)]
    M = Ho * Wt  # flattened spatial extent used for all MXU matmuls

    def body(x_ref, w1_ref, b1_ref, w2_ref, b2_ref, ws_ref, o_ref, y1_scr):
        # y1 scratch holds zero-padded y1 (its zero border IS the conv2 halo);
        # scratch persists across grid steps, so re-zero it every step (cheap memset).
        y1_scr[...] = jnp.zeros_like(y1_scr)

        # ---- conv1 (BN1 folded into w1) + ReLU: 9 shifted dot-accumulates ----
        acc1 = None
        for t, (kh, kw) in enumerate(taps):
            tap = x_ref[kh % s, kw % s, pl.ds(kh // s, Ho), pl.ds(kw // s, Wt), :]
            d = jnp.dot(tap.reshape(M, cin_p), w1_ref[t],
                        preferred_element_type=jnp.float32)
            acc1 = d if acc1 is None else acc1 + d
        y1 = jnp.maximum(acc1 + b1_ref[...], 0.0).astype(compute_dtype)
        y1 = y1.reshape(Ho, Wt, cout_p)
        # Write only the valid Wo columns so the scratch's zero border stays exact.
        y1_scr[pl.ds(1, Ho), pl.ds(1, Wo), :] = y1[:, :Wo, :]

        # ---- conv2 (BN2 folded into w2): taps straight from the VMEM scratch ----
        acc2 = None
        for t, (kh, kw) in enumerate(taps):
            tap = y1_scr[pl.ds(kh, Ho), pl.ds(kw, Wt), :]
            d = jnp.dot(tap.reshape(M, cout_p), w2_ref[t],
                        preferred_element_type=jnp.float32)
            acc2 = d if acc2 is None else acc2 + d
        acc2 = acc2 + b2_ref[...]

        # ---- shortcut: identity = VPU add; projection = fused 1x1 matmul ----
        sc = x_ref[1 % s, 1 % s, pl.ds(1 // s, Ho), pl.ds(1 // s, Wt), :]
        sc = sc.reshape(M, cin_p)
        if has_proj:
            acc2 = acc2 + jnp.dot(sc, ws_ref[...], preferred_element_type=jnp.float32)
        else:
            acc2 = acc2 + sc.astype(jnp.float32)

        out = jnp.maximum(acc2, 0.0).astype(o_ref.dtype).reshape(Ho, Wt, cout_p)
        o_ref[...] = out[:, :Wo, :]

    if has_proj:
        def kernel(x_ref, w1_ref, b1_ref, w2_ref, b2_ref, ws_ref, o_ref, y1_scr):
            body(x_ref, w1_ref, b1_ref, w2_ref, b2_ref, ws_ref, o_ref, y1_scr)
    else:
        def kernel(x_ref, w1_ref, b1_ref, w2_ref, b2_ref, o_ref, y1_scr):
            body(x_ref, w1_ref, b1_ref, w2_ref, b2_ref, None, o_ref, y1_scr)
    return kernel


# -------------------------------- forward -------------------------------------


@partial(jax.jit, static_argnames=("stride", "compute_dtype"))
def resblock_forward(x_nchw, params, stride=1, compute_dtype=jnp.float32):
    # compute_dtype=jnp.bfloat16 is the fast path on v5e/v6e/v7x; f32 accumulation is
    # kept either way.  Default f32 preserves the 1e-4 reference tolerance.
    N, Cin, H, W = map(int, x_nchw.shape)
    s = int(stride)
    out_dtype = x_nchw.dtype

    w1 = params["w1"].astype(jnp.float32)          # (3, 3, Cin,  Cout)  HWIO
    w2 = params["w2"].astype(jnp.float32)          # (3, 3, Cout, Cout)
    Cout = int(w1.shape[-1])
    has_proj = not (s == 1 and Cin == Cout)

    Ho = (H + 2 - 3) // s + 1
    Wo = (W + 2 - 3) // s + 1
    Wt = _round_up(Wo, 8)          # in-kernel working width (sublane aligned)
    cin_p = _round_up(Cin, 8)      # channel (lane) padding
    cout_p = _round_up(Cout, 8)

    # Phase-split padded input (space-to-depth by the conv stride):
    #   x_ps[n, ph, pw, a, b, c] = x_padded[n, s*a + ph, s*b + pw, c]
    # so every 3x3 tap and the strided 1x1 shortcut become contiguous static windows.
    Hs = Ho + (-(-3 // s)) - 1     # Ho+2 for stride 1, Ho+1 for stride 2
    Ws = Wt + 8
    Hpp, Wpp = s * Hs, s * Ws
    x = jnp.transpose(x_nchw, (0, 2, 3, 1)).astype(jnp.float32)   # NCHW -> NHWC
    xp = jnp.pad(x, ((0, 0), (1, Hpp - H - 1), (1, Wpp - W - 1), (0, cin_p - Cin)))
    x_ps = xp.reshape(N, Hs, s, Ws, s, cin_p).transpose(0, 2, 4, 1, 3, 5)
    x_ps = x_ps.astype(compute_dtype)

    # Fold eval-mode BN into the conv weights; only per-channel biases survive.
    g1, b1 = _fold_bn(*params["bn1"])
    g2, b2 = _fold_bn(*params["bn2"])

    def fold_w(w, scale, ci_p, co_p):
        w = w * scale[None, None, None, :]
        w = jnp.pad(w, ((0, 0), (0, 0), (0, ci_p - w.shape[2]), (0, co_p - w.shape[3])))
        return w.reshape(9, ci_p, co_p).astype(compute_dtype)

    w1f = fold_w(w1, g1, cin_p, cout_p)
    w2f = fold_w(w2, g2, cout_p, cout_p)
    b1p = jnp.pad(b1, (0, cout_p - Cout)).reshape(1, cout_p)

    inputs = [x_ps, w1f, b1p, w2f]
    in_specs = [
        pl.BlockSpec((pl.Squeezed(), s, s, Hs, Ws, cin_p),
                     lambda n: (n, 0, 0, 0, 0, 0)),
        pl.BlockSpec((9, cin_p, cout_p), lambda n: (0, 0, 0)),
        pl.BlockSpec((1, cout_p), lambda n: (0, 0)),
        pl.BlockSpec((9, cout_p, cout_p), lambda n: (0, 0, 0)),
    ]
    if has_proj:
        gs_, bs_ = _fold_bn(*params["bns"])
        ws = params["ws"].astype(jnp.float32)[0, 0]       # (Cin, Cout)
        wsf = jnp.pad(ws * gs_[None, :],
                      ((0, cin_p - Cin), (0, cout_p - Cout))).astype(compute_dtype)
        b2tot = jnp.pad(b2 + bs_, (0, cout_p - Cout)).reshape(1, cout_p)
        inputs += [b2tot, wsf]
        in_specs += [pl.BlockSpec((1, cout_p), lambda n: (0, 0)),
                     pl.BlockSpec((cin_p, cout_p), lambda n: (0, 0))]
    else:
        b2p = jnp.pad(b2, (0, cout_p - Cout)).reshape(1, cout_p)
        inputs += [b2p]
        in_specs += [pl.BlockSpec((1, cout_p), lambda n: (0, 0))]

    out_spec = pl.BlockSpec((pl.Squeezed(), Ho, Wo, cout_p), lambda n: (n, 0, 0, 0))

    Wy = Wt + 8                    # zero-padded y1 scratch width
    scratch = [pltpu.VMEM((Ho + 2, Wy, cout_p), compute_dtype)]

    kernel = _make_resblock_kernel(s, Ho, Wo, Wt, cin_p, cout_p, has_proj,
                                   compute_dtype)

    # VMEM budget: input/output blocks are double-buffered by the pipeline; resident
    # weights currently also get the default second buffer (see module TODO).
    c_item = jnp.dtype(compute_dtype).itemsize
    o_item = jnp.dtype(out_dtype).itemsize
    repl_bytes = sum(int(a.size) * a.dtype.itemsize for a in inputs[1:])
    x_blk = s * s * Hs * Ws * cin_p * c_item
    o_blk = Ho * Wo * cout_p * o_item
    scr_bytes = (Ho + 2) * Wy * cout_p * c_item
    need = 2 * (x_blk + o_blk) + 2 * repl_bytes + scr_bytes
    vmem_limit = int(min(max(need + (2 << 20), 32 << 20), (_vmem_cap_bytes() * 3) // 4))

    flops = 2 * N * Ho * Wt * cout_p * (9 * cin_p + 9 * cout_p
                                        + (cin_p if has_proj else 0))
    bytes_accessed = (int(x_ps.size) * c_item + repl_bytes
                      + N * Ho * Wo * cout_p * o_item)

    out = pl.pallas_call(
        kernel,
        out_shape=jax.ShapeDtypeStruct((N, Ho, Wo, cout_p), out_dtype),
        grid_spec=pltpu.PrefetchScalarGridSpec(
            num_scalar_prefetch=0,
            grid=(N,),
            in_specs=in_specs,
            out_specs=out_spec,
            scratch_shapes=scratch,
        ),
        compiler_params=pltpu.CompilerParams(
            dimension_semantics=("parallel",),
            vmem_limit_bytes=vmem_limit,
        ),
        cost_estimate=pl.CostEstimate(
            flops=int(flops), transcendentals=0, bytes_accessed=int(bytes_accessed)),
    )(*inputs)

    return jnp.transpose(out[:, :, :, :Cout], (0, 3, 1, 2))   # NHWC -> NCHW


# --------------------------- reference & params -------------------------------


def resblock_ref(x_nchw, params, stride=1):
    def conv(x, w, s, pad):
        return jax.lax.conv_general_dilated(
            x, w, window_strides=(s, s), padding=((pad, pad), (pad, pad)),
            dimension_numbers=("NCHW", "HWIO", "NCHW"))

    def bn(x, p):
        g, b, m, v = p
        scale = g / jnp.sqrt(v + EPS)
        bias = b - m * scale
        return x * scale[None, :, None, None] + bias[None, :, None, None]

    cin, cout = params["w1"].shape[2], params["w1"].shape[3]
    out = jax.nn.relu(bn(conv(x_nchw, params["w1"], stride, 1), params["bn1"]))
    out = bn(conv(out, params["w2"], 1, 1), params["bn2"])
    if stride == 1 and cin == cout:
        ident = x_nchw
    else:
        ident = bn(conv(x_nchw, params["ws"], stride, 0), params["bns"])
    return jax.nn.relu(out + ident)


def make_params(key, cin, cout, stride):
    ks = jax.random.split(key, 6)

    def bn(k):
        kg, kb, km, kv = jax.random.split(k, 4)
        return (1.0 + 0.1 * jax.random.normal(kg, (cout,), jnp.float32),
                0.1 * jax.random.normal(kb, (cout,), jnp.float32),
                0.1 * jax.random.normal(km, (cout,), jnp.float32),
                jax.random.uniform(kv, (cout,), jnp.float32, minval=0.5, maxval=1.5))

    p = {
        "w1": jax.random.normal(ks[0], (3, 3, cin, cout), jnp.float32) * 0.1,
        "w2": jax.random.normal(ks[1], (3, 3, cout, cout), jnp.float32) * 0.1,
        "bn1": bn(ks[2]),
        "bn2": bn(ks[3]),
    }
    if not (stride == 1 and cin == cout):
        p["ws"] = jax.random.normal(ks[4], (1, 1, cin, cout), jnp.float32) * 0.1
        p["bns"] = bn(ks[5])
    return p


# ---------------------------------- main ---------------------------------------

if __name__ == "__main__":
    key = jax.random.PRNGKey(0)
    kx, kp1, kp2 = jax.random.split(key, 3)

    x1 = jax.random.normal(kx, (2, 4, 16, 16), jnp.float32)

    # Case 1: identity shortcut (stride=1, Cin == Cout)
    params1 = make_params(kp1, cin=4, cout=4, stride=1)
    out1 = jax.block_until_ready(resblock_forward(x1, params1, stride=1))
    ref1 = resblock_ref(x1, params1, stride=1)
    assert out1.shape == (2, 4, 16, 16)
    np.testing.assert_allclose(np.asarray(out1), np.asarray(ref1), atol=1e-4, rtol=1e-4)

    # Case 2: projection shortcut (stride=2, Cin != Cout)
    params2 = make_params(kp2, cin=4, cout=8, stride=2)
    out2 = jax.block_until_ready(resblock_forward(x1, params2, stride=2))
    ref2 = resblock_ref(x1, params2, stride=2)
    assert out2.shape == (2, 8, 8, 8)
    np.testing.assert_allclose(np.asarray(out2), np.asarray(ref2), atol=1e-4, rtol=1e-4)

    # bf16 compute fast path (v6e/v7x): verify it lowers and runs (no tight tolerance).
    out_bf = jax.block_until_ready(
        resblock_forward(x1, params1, stride=1, compute_dtype=jnp.bfloat16))
    assert out_bf.shape == (2, 4, 16, 16)
    assert bool(jnp.all(jnp.isfinite(out_bf)))

    print("KERNEL_OK")
</pallas_src>

<mosaic_0001>
module attributes {stable_mosaic.version = 11 : i64} {
  func.func @kernel(%arg0: i32, %arg1: memref<1x1x1x18x24x8xf32, #tpu.memory_space<vmem>>, %arg2: memref<9x8x8xf32, #tpu.memory_space<vmem>>, %arg3: memref<1x8xf32, #tpu.memory_space<vmem>>, %arg4: memref<9x8x8xf32, #tpu.memory_space<vmem>>, %arg5: memref<1x8xf32, #tpu.memory_space<vmem>>, %arg6: memref<1x16x16x8xf32, #tpu.memory_space<vmem>>, %arg7: memref<18x24x8xf32, #tpu.memory_space<vmem>>) attributes {dimension_semantics = [#tpu.dimension_semantics<parallel>], iteration_bounds = array<i64: 2>, scalar_prefetch = 0 : i64, scratch_operands = 1 : i64, tpu.core_type = #tpu.core_type<tc>, window_params = [{transform_indices = @transform_0, window_bounds = array<i64: 1, 1, 1, 18, 24, 8>}, {pipeline_mode = #tpu.pipeline_mode<synchronous>, transform_indices = @transform_1, window_bounds = array<i64: 9, 8, 8>}, {pipeline_mode = #tpu.pipeline_mode<synchronous>, transform_indices = @transform_2, window_bounds = array<i64: 1, 8>}, {pipeline_mode = #tpu.pipeline_mode<synchronous>, transform_indices = @transform_3, window_bounds = array<i64: 9, 8, 8>}, {pipeline_mode = #tpu.pipeline_mode<synchronous>, transform_indices = @transform_4, window_bounds = array<i64: 1, 8>}, {transform_indices = @transform_5, window_bounds = array<i64: 1, 16, 16, 8>}]} {
    %cst = arith.constant 0.000000e+00 : f32
    %0 = vector.broadcast %cst : f32 to vector<18x24x8xf32>
    %c0 = arith.constant 0 : index
    %c0_0 = arith.constant 0 : index
    %c0_1 = arith.constant 0 : index
    %1 = vector.load %arg7[%c0, %c0_0, %c0_1] : memref<18x24x8xf32, #tpu.memory_space<vmem>>, vector<18x24x8xf32>
    tpu.vector_store %arg7[%c0, %c0_0, %c0_1], %0 {strides = array<i32>} : memref<18x24x8xf32, #tpu.memory_space<vmem>>, vector<18x24x8xf32>,
    %c0_2 = arith.constant 0 : index
    %c0_3 = arith.constant 0 : index
    %c0_4 = arith.constant 0 : index
    %c0_5 = arith.constant 0 : index
    %c0_6 = arith.constant 0 : index
    %c0_7 = arith.constant 0 : index
    %2 = vector.load %arg1[%c0_2, %c0_3, %c0_4, %c0_5, %c0_6, %c0_7] : memref<1x1x1x18x24x8xf32, #tpu.memory_space<vmem>>, vector<1x1x1x16x16x8xf32>
    %3 = vector.shape_cast %2 : vector<1x1x1x16x16x8xf32> to vector<16x16x8xf32>
    %4 = vector.shape_cast %3 : vector<16x16x8xf32> to vector<256x8xf32>
    %c0_8 = arith.constant 0 : index
    %c0_9 = arith.constant 0 : index
    %c0_10 = arith.constant 0 : index
    %5 = vector.load %arg2[%c0_8, %c0_9, %c0_10] : memref<9x8x8xf32, #tpu.memory_space<vmem>>, vector<1x8x8xf32>
    %6 = vector.shape_cast %5 : vector<1x8x8xf32> to vector<8x8xf32>
    %cst_11 = arith.constant dense<0.000000e+00> : vector<256x8xf32>
    %7 = tpu.matmul %4, %6, %cst_11 {dimension_numbers = #tpu.dot_dimension_numbers<[1], [0], [0], [1], [0, 0, 1, 1], [], []>} : vector<256x8xf32>, vector<8x8xf32>, vector<256x8xf32> -> vector<256x8xf32>
    %c0_12 = arith.constant 0 : index
    %c0_13 = arith.constant 0 : index
    %c0_14 = arith.constant 0 : index
    %c0_15 = arith.constant 0 : index
    %c1 = arith.constant 1 : index
    %c0_16 = arith.constant 0 : index
    %8 = vector.load %arg1[%c0_12, %c0_13, %c0_14, %c0_15, %c1, %c0_16] : memref<1x1x1x18x24x8xf32, #tpu.memory_space<vmem>>, vector<1x1x1x16x16x8xf32>
    %9 = vector.shape_cast %8 : vector<1x1x1x16x16x8xf32> to vector<16x16x8xf32>
    %10 = vector.shape_cast %9 : vector<16x16x8xf32> to vector<256x8xf32>
    %c1_17 = arith.constant 1 : index
    %c0_18 = arith.constant 0 : index
    %c0_19 = arith.constant 0 : index
    %11 = vector.load %arg2[%c1_17, %c0_18, %c0_19] : memref<9x8x8xf32, #tpu.memory_space<vmem>>, vector<1x8x8xf32>
    %12 = vector.shape_cast %11 : vector<1x8x8xf32> to vector<8x8xf32>
    %cst_20 = arith.constant dense<0.000000e+00> : vector<256x8xf32>
    %13 = tpu.matmul %10, %12, %cst_20 {dimension_numbers = #tpu.dot_dimension_numbers<[1], [0], [0], [1], [0, 0, 1, 1], [], []>} : vector<256x8xf32>, vector<8x8xf32>, vector<256x8xf32> -> vector<256x8xf32>
    %14 = arith.addf %7, %13 : vector<256x8xf32>
    %c0_21 = arith.constant 0 : index
    %c0_22 = arith.constant 0 : index
    %c0_23 = arith.constant 0 : index
    %c0_24 = arith.constant 0 : index
    %c2 = arith.constant 2 : index
    %c0_25 = arith.constant 0 : index
    %15 = vector.load %arg1[%c0_21, %c0_22, %c0_23, %c0_24, %c2, %c0_25] : memref<1x1x1x18x24x8xf32, #tpu.memory_space<vmem>>, vector<1x1x1x16x16x8xf32>
    %16 = vector.shape_cast %15 : vector<1x1x1x16x16x8xf32> to vector<16x16x8xf32>
    %17 = vector.shape_cast %16 : vector<16x16x8xf32> to vector<256x8xf32>
    %c2_26 = arith.constant 2 : index
    %c0_27 = arith.constant 0 : index
    %c0_28 = arith.constant 0 : index
    %18 = vector.load %arg2[%c2_26, %c0_27, %c0_28] : memref<9x8x8xf32, #tpu.memory_space<vmem>>, vector<1x8x8xf32>
    %19 = vector.shape_cast %18 : vector<1x8x8xf32> to vector<8x8xf32>
    %cst_29 = arith.constant dense<0.000000e+00> : vector<256x8xf32>
    %20 = tpu.matmul %17, %19, %cst_29 {dimension_numbers = #tpu.dot_dimension_numbers<[1], [0], [0], [1], [0, 0, 1, 1], [], []>} : vector<256x8xf32>, vector<8x8xf32>, vector<256x8xf32> -> vector<256x8xf32>
    %21 = arith.addf %14, %20 : vector<256x8xf32>
    %c0_30 = arith.constant 0 : index
    %c0_31 = arith.constant 0 : index
    %c0_32 = arith.constant 0 : index
    %c1_33 = arith.constant 1 : index
    %c0_34 = arith.constant 0 : index
    %c0_35 = arith.constant 0 : index
    %22 = vector.load %arg1[%c0_30, %c0_31, %c0_32, %c1_33, %c0_34, %c0_35] : memref<1x1x1x18x24x8xf32, #tpu.memory_space<vmem>>, vector<1x1x1x16x16x8xf32>
    %23 = vector.shape_cast %22 : vector<1x1x1x16x16x8xf32> to vector<16x16x8xf32>
    %24 = vector.shape_cast %23 : vector<16x16x8xf32> to vector<256x8xf32>
    %c3 = arith.constant 3 : index
    %c0_36 = arith.constant 0 : index
    %c0_37 = arith.constant 0 : index
    %25 = vector.load %arg2[%c3, %c0_36, %c0_37] : memref<9x8x8xf32, #tpu.memory_space<vmem>>, vector<1x8x8xf32>
    %26 = vector.shape_cast %25 : vector<1x8x8xf32> to vector<8x8xf32>
    %cst_38 = arith.constant dense<0.000000e+00> : vector<256x8xf32>
    %27 = tpu.matmul %24, %26, %cst_38 {dimension_numbers = #tpu.dot_dimension_numbers<[1], [0], [0], [1], [0, 0, 1, 1], [], []>} : vector<256x8xf32>, vector<8x8xf32>, vector<256x8xf32> -> vector<256x8xf32>
    %28 = arith.addf %21, %27 : vector<256x8xf32>
    %c0_39 = arith.constant 0 : index
    %c0_40 = arith.constant 0 : index
    %c0_41 = arith.constant 0 : index
    %c1_42 = arith.constant 1 : index
    %c1_43 = arith.constant 1 : index
    %c0_44 = arith.constant 0 : index
    %29 = vector.load %arg1[%c0_39, %c0_40, %c0_41, %c1_42, %c1_43, %c0_44] : memref<1x1x1x18x24x8xf32, #tpu.memory_space<vmem>>, vector<1x1x1x16x16x8xf32>
    %30 = vector.shape_cast %29 : vector<1x1x1x16x16x8xf32> to vector<16x16x8xf32>
    %31 = vector.shape_cast %30 : vector<16x16x8xf32> to vector<256x8xf32>
    %c4 = arith.constant 4 : index
    %c0_45 = arith.constant 0 : index
    %c0_46 = arith.constant 0 : index
    %32 = vector.load %arg2[%c4, %c0_45, %c0_46] : memref<9x8x8xf32, #tpu.memory_space<vmem>>, vector<1x8x8xf32>
    %33 = vector.shape_cast %32 : vector<1x8x8xf32> to vector<8x8xf32>
    %cst_47 = arith.constant dense<0.000000e+00> : vector<256x8xf32>
    %34 = tpu.matmul %31, %33, %cst_47 {dimension_numbers = #tpu.dot_dimension_numbers<[1], [0], [0], [1], [0, 0, 1, 1], [], []>} : vector<256x8xf32>, vector<8x8xf32>, vector<256x8xf32> -> vector<256x8xf32>
    %35 = arith.addf %28, %34 : vector<256x8xf32>
    %c0_48 = arith.constant 0 : index
    %c0_49 = arith.constant 0 : index
    %c0_50 = arith.constant 0 : index
    %c1_51 = arith.constant 1 : index
    %c2_52 = arith.constant 2 : index
    %c0_53 = arith.constant 0 : index
    %36 = vector.load %arg1[%c0_48, %c0_49, %c0_50, %c1_51, %c2_52, %c0_53] : memref<1x1x1x18x24x8xf32, #tpu.memory_space<vmem>>, vector<1x1x1x16x16x8xf32>
    %37 = vector.shape_cast %36 : vector<1x1x1x16x16x8xf32> to vector<16x16x8xf32>
    %38 = vector.shape_cast %37 : vector<16x16x8xf32> to vector<256x8xf32>
    %c5 = arith.constant 5 : index
    %c0_54 = arith.constant 0 : index
    %c0_55 = arith.constant 0 : index
    %39 = vector.load %arg2[%c5, %c0_54, %c0_55] : memref<9x8x8xf32, #tpu.memory_space<vmem>>, vector<1x8x8xf32>
    %40 = vector.shape_cast %39 : vector<1x8x8xf32> to vector<8x8xf32>
    %cst_56 = arith.constant dense<0.000000e+00> : vector<256x8xf32>
    %41 = tpu.matmul %38, %40, %cst_56 {dimension_numbers = #tpu.dot_dimension_numbers<[1], [0], [0], [1], [0, 0, 1, 1], [], []>} : vector<256x8xf32>, vector<8x8xf32>, vector<256x8xf32> -> vector<256x8xf32>
    %42 = arith.addf %35, %41 : vector<256x8xf32>
    %c0_57 = arith.constant 0 : index
    %c0_58 = arith.constant 0 : index
    %c0_59 = arith.constant 0 : index
    %c2_60 = arith.constant 2 : index
    %c0_61 = arith.constant 0 : index
    %c0_62 = arith.constant 0 : index
    %43 = vector.load %arg1[%c0_57, %c0_58, %c0_59, %c2_60, %c0_61, %c0_62] : memref<1x1x1x18x24x8xf32, #tpu.memory_space<vmem>>, vector<1x1x1x16x16x8xf32>
    %44 = vector.shape_cast %43 : vector<1x1x1x16x16x8xf32> to vector<16x16x8xf32>
    %45 = vector.shape_cast %44 : vector<16x16x8xf32> to vector<256x8xf32>
    %c6 = arith.constant 6 : index
    %c0_63 = arith.constant 0 : index
    %c0_64 = arith.constant 0 : index
    %46 = vector.load %arg2[%c6, %c0_63, %c0_64] : memref<9x8x8xf32, #tpu.memory_space<vmem>>, vector<1x8x8xf32>
    %47 = vector.shape_cast %46 : vector<1x8x8xf32> to vector<8x8xf32>
    %cst_65 = arith.constant dense<0.000000e+00> : vector<256x8xf32>
    %48 = tpu.matmul %45, %47, %cst_65 {dimension_numbers = #tpu.dot_dimension_numbers<[1], [0], [0], [1], [0, 0, 1, 1], [], []>} : vector<256x8xf32>, vector<8x8xf32>, vector<256x8xf32> -> vector<256x8xf32>
    %49 = arith.addf %42, %48 : vector<256x8xf32>
    %c0_66 = arith.constant 0 : index
    %c0_67 = arith.constant 0 : index
    %c0_68 = arith.constant 0 : index
    %c2_69 = arith.constant 2 : index
    %c1_70 = arith.constant 1 : index
    %c0_71 = arith.constant 0 : index
    %50 = vector.load %arg1[%c0_66, %c0_67, %c0_68, %c2_69, %c1_70, %c0_71] : memref<1x1x1x18x24x8xf32, #tpu.memory_space<vmem>>, vector<1x1x1x16x16x8xf32>
    %51 = vector.shape_cast %50 : vector<1x1x1x16x16x8xf32> to vector<16x16x8xf32>
    %52 = vector.shape_cast %51 : vector<16x16x8xf32> to vector<256x8xf32>
    %c7 = arith.constant 7 : index
    %c0_72 = arith.constant 0 : index
    %c0_73 = arith.constant 0 : index
    %53 = vector.load %arg2[%c7, %c0_72, %c0_73] : memref<9x8x8xf32, #tpu.memory_space<vmem>>, vector<1x8x8xf32>
    %54 = vector.shape_cast %53 : vector<1x8x8xf32> to vector<8x8xf32>
    %cst_74 = arith.constant dense<0.000000e+00> : vector<256x8xf32>
    %55 = tpu.matmul %52, %54, %cst_74 {dimension_numbers = #tpu.dot_dimension_numbers<[1], [0], [0], [1], [0, 0, 1, 1], [], []>} : vector<256x8xf32>, vector<8x8xf32>, vector<256x8xf32> -> vector<256x8xf32>
    %56 = arith.addf %49, %55 : vector<256x8xf32>
    %c0_75 = arith.constant 0 : index
    %c0_76 = arith.constant 0 : index
    %c0_77 = arith.constant 0 : index
    %c2_78 = arith.constant 2 : index
    %c2_79 = arith.constant 2 : index
    %c0_80 = arith.constant 0 : index
    %57 = vector.load %arg1[%c0_75, %c0_76, %c0_77, %c2_78, %c2_79, %c0_80] : memref<1x1x1x18x24x8xf32, #tpu.memory_space<vmem>>, vector<1x1x1x16x16x8xf32>
    %58 = vector.shape_cast %57 : vector<1x1x1x16x16x8xf32> to vector<16x16x8xf32>
    %59 = vector.shape_cast %58 : vector<16x16x8xf32> to vector<256x8xf32>
    %c8 = arith.constant 8 : index
    %c0_81 = arith.constant 0 : index
    %c0_82 = arith.constant 0 : index
    %60 = vector.load %arg2[%c8, %c0_81, %c0_82] : memref<9x8x8xf32, #tpu.memory_space<vmem>>, vector<1x8x8xf32>
    %61 = vector.shape_cast %60 : vector<1x8x8xf32> to vector<8x8xf32>
    %cst_83 = arith.constant dense<0.000000e+00> : vector<256x8xf32>
    %62 = tpu.matmul %59, %61, %cst_83 {dimension_numbers = #tpu.dot_dimension_numbers<[1], [0], [0], [1], [0, 0, 1, 1], [], []>} : vector<256x8xf32>, vector<8x8xf32>, vector<256x8xf32> -> vector<256x8xf32>
    %63 = arith.addf %56, %62 : vector<256x8xf32>
    %c0_84 = arith.constant 0 : index
    %c0_85 = arith.constant 0 : index
    %64 = vector.load %arg3[%c0_84, %c0_85] : memref<1x8xf32, #tpu.memory_space<vmem>>, vector<1x8xf32>
    %65 = vector.broadcast %64 : vector<1x8xf32> to vector<256x8xf32>
    %66 = arith.addf %63, %65 : vector<256x8xf32>
    %cst_86 = arith.constant 0.000000e+00 : f32
    %67 = vector.broadcast %cst_86 : f32 to vector<256x8xf32>
    %68 = arith.maximumf %66, %67 : vector<256x8xf32>
    %69 = vector.shape_cast %68 : vector<256x8xf32> to vector<16x16x8xf32>
    %c1_87 = arith.constant 1 : index
    %c1_88 = arith.constant 1 : index
    %c0_89 = arith.constant 0 : index
    %70 = vector.load %arg7[%c1_87, %c1_88, %c0_89] : memref<18x24x8xf32, #tpu.memory_space<vmem>>, vector<16x16x8xf32>
    tpu.vector_store %arg7[%c1_87, %c1_88, %c0_89], %69 {strides = array<i32>} : memref<18x24x8xf32, #tpu.memory_space<vmem>>, vector<16x16x8xf32>,
    %c0_90 = arith.constant 0 : index
    %c0_91 = arith.constant 0 : index
    %c0_92 = arith.constant 0 : index
    %71 = vector.load %arg7[%c0_90, %c0_91, %c0_92] : memref<18x24x8xf32, #tpu.memory_space<vmem>>, vector<16x16x8xf32>
    %72 = vector.shape_cast %71 : vector<16x16x8xf32> to vector<256x8xf32>
    %c0_93 = arith.constant 0 : index
    %c0_94 = arith.constant 0 : index
    %c0_95 = arith.constant 0 : index
    %73 = vector.load %arg4[%c0_93, %c0_94, %c0_95] : memref<9x8x8xf32, #tpu.memory_space<vmem>>, vector<1x8x8xf32>
    %74 = vector.shape_cast %73 : vector<1x8x8xf32> to vector<8x8xf32>
    %cst_96 = arith.constant dense<0.000000e+00> : vector<256x8xf32>
    %75 = tpu.matmul %72, %74, %cst_96 {dimension_numbers = #tpu.dot_dimension_numbers<[1], [0], [0], [1], [0, 0, 1, 1], [], []>} : vector<256x8xf32>, vector<8x8xf32>, vector<256x8xf32> -> vector<256x8xf32>
    %c0_97 = arith.constant 0 : index
    %c1_98 = arith.constant 1 : index
    %c0_99 = arith.constant 0 : index
    %76 = vector.load %arg7[%c0_97, %c1_98, %c0_99] : memref<18x24x8xf32, #tpu.memory_space<vmem>>, vector<16x16x8xf32>
    %77 = vector.shape_cast %76 : vector<16x16x8xf32> to vector<256x8xf32>
    %c1_100 = arith.constant 1 : index
    %c0_101 = arith.constant 0 : index
    %c0_102 = arith.constant 0 : index
    %78 = vector.load %arg4[%c1_100, %c0_101, %c0_102] : memref<9x8x8xf32, #tpu.memory_space<vmem>>, vector<1x8x8xf32>
    %79 = vector.shape_cast %78 : vector<1x8x8xf32> to vector<8x8xf32>
    %cst_103 = arith.constant dense<0.000000e+00> : vector<256x8xf32>
    %80 = tpu.matmul %77, %79, %cst_103 {dimension_numbers = #tpu.dot_dimension_numbers<[1], [0], [0], [1], [0, 0, 1, 1], [], []>} : vector<256x8xf32>, vector<8x8xf32>, vector<256x8xf32> -> vector<256x8xf32>
    %81 = arith.addf %75, %80 : vector<256x8xf32>
    %c0_104 = arith.constant 0 : index
    %c2_105 = arith.constant 2 : index
    %c0_106 = arith.constant 0 : index
    %82 = vector.load %arg7[%c0_104, %c2_105, %c0_106] : memref<18x24x8xf32, #tpu.memory_space<vmem>>, vector<16x16x8xf32>
    %83 = vector.shape_cast %82 : vector<16x16x8xf32> to vector<256x8xf32>
    %c2_107 = arith.constant 2 : index
    %c0_108 = arith.constant 0 : index
    %c0_109 = arith.constant 0 : index
    %84 = vector.load %arg4[%c2_107, %c0_108, %c0_109] : memref<9x8x8xf32, #tpu.memory_space<vmem>>, vector<1x8x8xf32>
    %85 = vector.shape_cast %84 : vector<1x8x8xf32> to vector<8x8xf32>
    %cst_110 = arith.constant dense<0.000000e+00> : vector<256x8xf32>
    %86 = tpu.matmul %83, %85, %cst_110 {dimension_numbers = #tpu.dot_dimension_numbers<[1], [0], [0], [1], [0, 0, 1, 1], [], []>} : vector<256x8xf32>, vector<8x8xf32>, vector<256x8xf32> -> vector<256x8xf32>
    %87 = arith.addf %81, %86 : vector<256x8xf32>
    %c1_111 = arith.constant 1 : index
    %c0_112 = arith.constant 0 : index
    %c0_113 = arith.constant 0 : index
    %88 = vector.load %arg7[%c1_111, %c0_112, %c0_113] : memref<18x24x8xf32, #tpu.memory_space<vmem>>, vector<16x16x8xf32>
    %89 = vector.shape_cast %88 : vector<16x16x8xf32> to vector<256x8xf32>
    %c3_114 = arith.constant 3 : index
    %c0_115 = arith.constant 0 : index
    %c0_116 = arith.constant 0 : index
    %90 = vector.load %arg4[%c3_114, %c0_115, %c0_116] : memref<9x8x8xf32, #tpu.memory_space<vmem>>, vector<1x8x8xf32>
    %91 = vector.shape_cast %90 : vector<1x8x8xf32> to vector<8x8xf32>
    %cst_117 = arith.constant dense<0.000000e+00> : vector<256x8xf32>
    %92 = tpu.matmul %89, %91, %cst_117 {dimension_numbers = #tpu.dot_dimension_numbers<[1], [0], [0], [1], [0, 0, 1, 1], [], []>} : vector<256x8xf32>, vector<8x8xf32>, vector<256x8xf32> -> vector<256x8xf32>
    %93 = arith.addf %87, %92 : vector<256x8xf32>
    %c1_118 = arith.constant 1 : index
    %c1_119 = arith.constant 1 : index
    %c0_120 = arith.constant 0 : index
    %94 = vector.load %arg7[%c1_118, %c1_119, %c0_120] : memref<18x24x8xf32, #tpu.memory_space<vmem>>, vector<16x16x8xf32>
    %95 = vector.shape_cast %94 : vector<16x16x8xf32> to vector<256x8xf32>
    %c4_121 = arith.constant 4 : index
    %c0_122 = arith.constant 0 : index
    %c0_123 = arith.constant 0 : index
    %96 = vector.load %arg4[%c4_121, %c0_122, %c0_123] : memref<9x8x8xf32, #tpu.memory_space<vmem>>, vector<1x8x8xf32>
    %97 = vector.shape_cast %96 : vector<1x8x8xf32> to vector<8x8xf32>
    %cst_124 = arith.constant dense<0.000000e+00> : vector<256x8xf32>
    %98 = tpu.matmul %95, %97, %cst_124 {dimension_numbers = #tpu.dot_dimension_numbers<[1], [0], [0], [1], [0, 0, 1, 1], [], []>} : vector<256x8xf32>, vector<8x8xf32>, vector<256x8xf32> -> vector<256x8xf32>
    %99 = arith.addf %93, %98 : vector<256x8xf32>
    %c1_125 = arith.constant 1 : index
    %c2_126 = arith.constant 2 : index
    %c0_127 = arith.constant 0 : index
    %100 = vector.load %arg7[%c1_125, %c2_126, %c0_127] : memref<18x24x8xf32, #tpu.memory_space<vmem>>, vector<16x16x8xf32>
    %101 = vector.shape_cast %100 : vector<16x16x8xf32> to vector<256x8xf32>
    %c5_128 = arith.constant 5 : index
    %c0_129 = arith.constant 0 : index
    %c0_130 = arith.constant 0 : index
    %102 = vector.load %arg4[%c5_128, %c0_129, %c0_130] : memref<9x8x8xf32, #tpu.memory_space<vmem>>, vector<1x8x8xf32>
    %103 = vector.shape_cast %102 : vector<1x8x8xf32> to vector<8x8xf32>
    %cst_131 = arith.constant dense<0.000000e+00> : vector<256x8xf32>
    %104 = tpu.matmul %101, %103, %cst_131 {dimension_numbers = #tpu.dot_dimension_numbers<[1], [0], [0], [1], [0, 0, 1, 1], [], []>} : vector<256x8xf32>, vector<8x8xf32>, vector<256x8xf32> -> vector<256x8xf32>
    %105 = arith.addf %99, %104 : vector<256x8xf32>
    %c2_132 = arith.constant 2 : index
    %c0_133 = arith.constant 0 : index
    %c0_134 = arith.constant 0 : index
    %106 = vector.load %arg7[%c2_132, %c0_133, %c0_134] : memref<18x24x8xf32, #tpu.memory_space<vmem>>, vector<16x16x8xf32>
    %107 = vector.shape_cast %106 : vector<16x16x8xf32> to vector<256x8xf32>
    %c6_135 = arith.constant 6 : index
    %c0_136 = arith.constant 0 : index
    %c0_137 = arith.constant 0 : index
    %108 = vector.load %arg4[%c6_135, %c0_136, %c0_137] : memref<9x8x8xf32, #tpu.memory_space<vmem>>, vector<1x8x8xf32>
    %109 = vector.shape_cast %108 : vector<1x8x8xf32> to vector<8x8xf32>
    %cst_138 = arith.constant dense<0.000000e+00> : vector<256x8xf32>
    %110 = tpu.matmul %107, %109, %cst_138 {dimension_numbers = #tpu.dot_dimension_numbers<[1], [0], [0], [1], [0, 0, 1, 1], [], []>} : vector<256x8xf32>, vector<8x8xf32>, vector<256x8xf32> -> vector<256x8xf32>
    %111 = arith.addf %105, %110 : vector<256x8xf32>
    %c2_139 = arith.constant 2 : index
    %c1_140 = arith.constant 1 : index
    %c0_141 = arith.constant 0 : index
    %112 = vector.load %arg7[%c2_139, %c1_140, %c0_141] : memref<18x24x8xf32, #tpu.memory_space<vmem>>, vector<16x16x8xf32>
    %113 = vector.shape_cast %112 : vector<16x16x8xf32> to vector<256x8xf32>
    %c7_142 = arith.constant 7 : index
    %c0_143 = arith.constant 0 : index
    %c0_144 = arith.constant 0 : index
    %114 = vector.load %arg4[%c7_142, %c0_143, %c0_144] : memref<9x8x8xf32, #tpu.memory_space<vmem>>, vector<1x8x8xf32>
    %115 = vector.shape_cast %114 : vector<1x8x8xf32> to vector<8x8xf32>
    %cst_145 = arith.constant dense<0.000000e+00> : vector<256x8xf32>
    %116 = tpu.matmul %113, %115, %cst_145 {dimension_numbers = #tpu.dot_dimension_numbers<[1], [0], [0], [1], [0, 0, 1, 1], [], []>} : vector<256x8xf32>, vector<8x8xf32>, vector<256x8xf32> -> vector<256x8xf32>
    %117 = arith.addf %111, %116 : vector<256x8xf32>
    %c2_146 = arith.constant 2 : index
    %c2_147 = arith.constant 2 : index
    %c0_148 = arith.constant 0 : index
    %118 = vector.load %arg7[%c2_146, %c2_147, %c0_148] : memref<18x24x8xf32, #tpu.memory_space<vmem>>, vector<16x16x8xf32>
    %119 = vector.shape_cast %118 : vector<16x16x8xf32> to vector<256x8xf32>
    %c8_149 = arith.constant 8 : index
    %c0_150 = arith.constant 0 : index
    %c0_151 = arith.constant 0 : index
    %120 = vector.load %arg4[%c8_149, %c0_150, %c0_151] : memref<9x8x8xf32, #tpu.memory_space<vmem>>, vector<1x8x8xf32>
    %121 = vector.shape_cast %120 : vector<1x8x8xf32> to vector<8x8xf32>
    %cst_152 = arith.constant dense<0.000000e+00> : vector<256x8xf32>
    %122 = tpu.matmul %119, %121, %cst_152 {dimension_numbers = #tpu.dot_dimension_numbers<[1], [0], [0], [1], [0, 0, 1, 1], [], []>} : vector<256x8xf32>, vector<8x8xf32>, vector<256x8xf32> -> vector<256x8xf32>
    %123 = arith.addf %117, %122 : vector<256x8xf32>
    %c0_153 = arith.constant 0 : index
    %c0_154 = arith.constant 0 : index
    %124 = vector.load %arg5[%c0_153, %c0_154] : memref<1x8xf32, #tpu.memory_space<vmem>>, vector<1x8xf32>
    %125 = vector.broadcast %124 : vector<1x8xf32> to vector<256x8xf32>
    %126 = arith.addf %123, %125 : vector<256x8xf32>
    %c0_155 = arith.constant 0 : index
    %c0_156 = arith.constant 0 : index
    %c0_157 = arith.constant 0 : index
    %c1_158 = arith.constant 1 : index
    %c1_159 = arith.constant 1 : index
    %c0_160 = arith.constant 0 : index
    %127 = vector.load %arg1[%c0_155, %c0_156, %c0_157, %c1_158, %c1_159, %c0_160] : memref<1x1x1x18x24x8xf32, #tpu.memory_space<vmem>>, vector<1x1x1x16x16x8xf32>
    %128 = vector.shape_cast %127 : vector<1x1x1x16x16x8xf32> to vector<16x16x8xf32>
    %129 = vector.shape_cast %128 : vector<16x16x8xf32> to vector<256x8xf32>
    %130 = arith.addf %126, %129 : vector<256x8xf32>
    %cst_161 = arith.constant 0.000000e+00 : f32
    %131 = vector.broadcast %cst_161 : f32 to vector<256x8xf32>
    %132 = arith.maximumf %130, %131 : vector<256x8xf32>
    %133 = vector.shape_cast %132 : vector<256x8xf32> to vector<16x16x8xf32>
    %c0_162 = arith.constant 0 : index
    %c0_163 = arith.constant 0 : index
    %c0_164 = arith.constant 0 : index
    %c0_165 = arith.constant 0 : index
    %134 = vector.load %arg6[%c0_162, %c0_163, %c0_164, %c0_165] : memref<1x16x16x8xf32, #tpu.memory_space<vmem>>, vector<1x16x16x8xf32>
    %135 = vector.shape_cast %134 : vector<1x16x16x8xf32> to vector<16x16x8xf32>
    %136 = vector.shape_cast %133 : vector<16x16x8xf32> to vector<1x16x16x8xf32>
    tpu.vector_store %arg6[%c0_162, %c0_163, %c0_164, %c0_165], %136 {strides = array<i32>} : memref<1x16x16x8xf32, #tpu.memory_space<vmem>>, vector<1x16x16x8xf32>,
    return
  }
  func.func @transform_0(%arg0: i32) -> (i32, i32, i32, i32, i32, i32) {
    %c0_i32 = arith.constant 0 : i32
    %c0_i32_0 = arith.constant 0 : i32
    %c0_i32_1 = arith.constant 0 : i32
    %c0_i32_2 = arith.constant 0 : i32
    %c0_i32_3 = arith.constant 0 : i32
    %c0_i32_4 = arith.constant 0 : i32
    return %arg0, %c0_i32, %c0_i32_0, %c0_i32_1, %c0_i32_2, %c0_i32_3 : i32, i32, i32, i32, i32, i32
  }
  func.func @transform_1(%arg0: i32) -> (i32, i32, i32) {
    %c0_i32 = arith.constant 0 : i32
    %c0_i32_0 = arith.constant 0 : i32
    %c0_i32_1 = arith.constant 0 : i32
    %c0_i32_2 = arith.constant 0 : i32
    return %c0_i32, %c0_i32_0, %c0_i32_1 : i32, i32, i32
  }
  func.func @transform_2(%arg0: i32) -> (i32, i32) {
    %c0_i32 = arith.constant 0 : i32
    %c0_i32_0 = arith.constant 0 : i32
    %c0_i32_1 = arith.constant 0 : i32
    return %c0_i32, %c0_i32_0 : i32, i32
  }
  func.func @transform_3(%arg0: i32) -> (i32, i32, i32) {
    %c0_i32 = arith.constant 0 : i32
    %c0_i32_0 = arith.constant 0 : i32
    %c0_i32_1 = arith.constant 0 : i32
    %c0_i32_2 = arith.constant 0 : i32
    return %c0_i32, %c0_i32_0, %c0_i32_1 : i32, i32, i32
  }
  func.func @transform_4(%arg0: i32) -> (i32, i32) {
    %c0_i32 = arith.constant 0 : i32
    %c0_i32_0 = arith.constant 0 : i32
    %c0_i32_1 = arith.constant 0 : i32
    return %c0_i32, %c0_i32_0 : i32, i32
  }
  func.func @transform_5(%arg0: i32) -> (i32, i32, i32, i32) {
    %c0_i32 = arith.constant 0 : i32
    %c0_i32_0 = arith.constant 0 : i32
    %c0_i32_1 = arith.constant 0 : i32
    %c0_i32_2 = arith.constant 0 : i32
    return %arg0, %c0_i32, %c0_i32_0, %c0_i32_1 : i32, i32, i32, i32
  }
}

</mosaic_0001>

<bundles_post_ra>
// kernel: resblock_forward.1
= control target key start
LH: loop header
LB: loop body
LE: loop exit
PB: predicated region body
PF: predicated region fallthrough
CT: control target
= control target key end

     0   :  { %s10329_s18 = smov 0   ;;  %s12302_s0 = inlined_call_operand.vmem [shape: f32[2,1,1,18,24,8], index: 0, kind: input, shape index: {}]   ;;  %s12303_s1 = inlined_call_operand.vmem [shape: f32[9,8,8], index: 1, kind: input, shape index: {}]   ;;  %s12304_s2 = inlined_call_operand.vmem [shape: f32[1,8], index: 2, kind: input, shape index: {}]   ;;  %s12305_s3 = inlined_call_operand.vmem [shape: f32[9,8,8], index: 3, kind: input, shape index: {}]   ;;  %s12306_s4 = inlined_call_operand.vmem [shape: f32[1,8], index: 4, kind: input, shape index: {}]   ;;  %s12307_s5 = inlined_call_operand.vmem [shape: f32[2,16,16,8], index: 5, kind: output, shape index: {}]  }
   0x1 LB: > { %s7445_s19 = sadd.s32 4294967295, %s10296_s18   ;;  %p7449_p0 = scmp.ge.s32.totalorder %s10296_s18, 1  ;;  %s10296_s18 = sphi %s10329_s18, %s15_s18  }
   0x2   : > { %p187_p1 = scmp.lt.s32.totalorder %s10296_s18, 3 }
   0x4   : > { %p188_p2 = pnand %p7449_p0, %p187_p1 }
   0x6   : > { %191 = sbr.rel (%p188_p2) target bundleno = 1547 (0x60b), region = 40 }
   0xd   : > { %v7453_v0 = vld [vmem:[%s12303_s1 + $0x8] sm:$0xff]  ;;  %p215_p3 = scmp.lt.s32.totalorder %s7445_s19, 1  ;;  %v312_v1 = vld [vmem:[%s12303_s1] sm:$0xff]  ;;  %vm225_vm0 = vcmask 64512   ;;  %v10360_v5 = vld [vmem:[%s12303_s1 + $0x10] sm:$0xff] }
   0xe   : > { %8868 = vmatprep.subr.mxu0 %v7453_v0  ;;  %v10520_v38 = vld [vmem:[%s12303_s1 + $0x18] sm:$0xff] }
   0xf   : > { %8869 = vmatpush3.msra.mxu0 %v7453_v0  ;;  %s12593_s19 = smov (!%p215_p3, %s7445_s19), 1 }
  0x10   : > { %8918 = vmatprep.subr.mxu0 %v312_v1  ;;  %s10280_s24 = smul.u32 432, %s12593_s19  ;;  %s8273_s17 = sshll.u32 %s12593_s19, 8 }
  0x11   : > { %s12173_s22 = scalar_lea.vmem %s12307_s5, %s8273_s17 }
  0x12   : > { %s10349_s27 = scalar_lea.vmem %s12302_s0, %s10280_s24 }
  0x13   : > { %v313_v2 = vld [vmem:[%s10349_s27 + $0x1] sm:$0xff]  ;;  %v314_v3 = vld [vmem:[%s10349_s27 + $0x9] sm:$0xff]  ;;  %v10354_v4 = vld [vmem:[%s10349_s27 + $0x19] sm:$0xff] }
  0x14   : > { %8870 = vmatprep.mubr.msk.f32.mxu0 %vm225_vm0, %v313_v2  ;;  %v10366_v6 = vld [vmem:[%s10349_s27 + $0x21] sm:$0xff]  ;;  %v10369_v7 = vld [vmem:[%s10349_s27 + $0x31] sm:$0xff]  ;;  %v10377_v8 = vld [vmem:[%s10349_s27 + $0x39] sm:$0xff] }
  0x15   : > { %8871 = vmatmul.mubr.msk.f32.vlgmr.msra.gmra.mrb[0].mxu0 %vm225_vm0, %v314_v3  ;;  %v10380_v9 = vld [vmem:[%s10349_s27 + $0x49] sm:$0xff]  ;;  %v10387_v10 = vld [vmem:[%s10349_s27 + $0x51] sm:$0xff]  ;;  %v10390_v11 = vld [vmem:[%s10349_s27 + $0x61] sm:$0xff] }
  0x16   : > { %8919 = vmatpush3.msra.mxu0 %v312_v1  ;;  %8873 = vmatprep.mubr.msk.f32.mxu0 %vm225_vm0, %v10354_v4  ;;  %v10397_v12 = vld [vmem:[%s10349_s27 + $0x69] sm:$0xff]  ;;  %v10400_v13 = vld [vmem:[%s10349_s27 + $0x79] sm:$0xff]  ;;  %v10407_v14 = vld [vmem:[%s10349_s27 + $0x81] sm:$0xff] }
  0x17   : > { %8968 = vmatprep.subr.mxu0 %v10360_v5  ;;  %v10410_v15 = vld [vmem:[%s10349_s27 + $0x91] sm:$0xff]  ;;  %v10417_v16 = vld [vmem:[%s10349_s27 + $0x99] sm:$0xff]  ;;  %v10420_v17 = vld [vmem:[%s10349_s27 + $0xa9] sm:$0xff] }
  0x18   : > { %v10427_v18 = vld [vmem:[%s10349_s27 + $0xb1] sm:$0xff]  ;;  %v10430_v19 = vld [vmem:[%s10349_s27 + $0xc1] sm:$0xff]  ;;  %v10437_v20 = vld [vmem:[%s10349_s27 + $0xc9] sm:$0xff] }
  0x19   : > { %8874 = vmatmul.mubr.msk.f32.gmra.mrb[2].mxu0 %vm225_vm0, %v10366_v6  ;;  %v10440_v21 = vld [vmem:[%s10349_s27 + $0xd9] sm:$0xff]  ;;  %v10447_v22 = vld [vmem:[%s10349_s27 + $0xe1] sm:$0xff]  ;;  %v10450_v23 = vld [vmem:[%s10349_s27 + $0xf1] sm:$0xff] }
  0x1a   : > { %8876 = vmatprep.mubr.msk.f32.mxu0 %vm225_vm0, %v10369_v7  ;;  %v10457_v24 = vld [vmem:[%s10349_s27 + $0xf9] sm:$0xff]  ;;  %v10460_v25 = vld [vmem:[%s10349_s27 + $0x109] sm:$0xff]  ;;  %v10467_v26 = vld [vmem:[%s10349_s27 + $0x111] sm:$0xff] }
  0x1b   : > { %v10470_v27 = vld [vmem:[%s10349_s27 + $0x121] sm:$0xff]  ;;  %v10477_v28 = vld [vmem:[%s10349_s27 + $0x129] sm:$0xff]  ;;  %v10480_v29 = vld [vmem:[%s10349_s27 + $0x139] sm:$0xff] }
  0x1c   : > { %12425 = vst [vmem:[#allocation3_spill] sm:$0xff] %v10470_v27  ;;  %12426 = vst [vmem:[#allocation4_spill] sm:$0xff] %v10477_v28  ;;  %v10487_v30 = vld [vmem:[%s10349_s27 + $0x141] sm:$0xff]  ;;  %v10490_v31 = vld [vmem:[%s10349_s27 + $0x151] sm:$0xff] }
  0x1d   : > { %8877 = vmatmul.mubr.msk.f32.gmra.mrb[4].mxu0 %vm225_vm0, %v10377_v8  ;;  %12427 = vst [vmem:[#allocation5_spill] sm:$0xff] %v10480_v29  ;;  %12428 = vst [vmem:[#allocation6_spill] sm:$0xff] %v10487_v30  ;;  %v10497_v32 = vld [vmem:[%s10349_s27 + $0x159] sm:$0xff]  ;;  %v10500_v33 = vld [vmem:[%s10349_s27 + $0x169] sm:$0xff] }
  0x1e   : > { %8879 = vmatprep.mubr.msk.f32.mxu0 %vm225_vm0, %v10380_v9  ;;  %12429 = vst [vmem:[#allocation7_spill] sm:$0xff] %v10490_v31  ;;  %12430 = vst [vmem:[#allocation8_spill] sm:$0xff] %v10497_v32  ;;  %v10507_v34 = vld [vmem:[%s10349_s27 + $0x171] sm:$0xff]  ;;  %v280_v35 = vld [vmem:[%s10349_s27] sm:$0xff] }
  0x1f   : > { %12431 = vst [vmem:[#allocation9_spill] sm:$0xff] %v10500_v33  ;;  %12432 = vst [vmem:[#allocation10_spill] sm:$0xff] %v10507_v34  ;;  %v281_v36 = vld [vmem:[%s10349_s27 + $0x8] sm:$0xff]  ;;  %v10515_v37 = vld [vmem:[%s10349_s27 + $0x18] sm:$0xff] }
  0x20   : > { %v10527_v39 = vld [vmem:[%s10349_s27 + $0x20] sm:$0xff]  ;;  %v10530_v40 = vld [vmem:[%s10349_s27 + $0x30] sm:$0xff]  ;;  %v10538_v41 = vld [vmem:[%s10349_s27 + $0x38] sm:$0xff] }
  0x21   : > { %8880 = vmatmul.mubr.msk.f32.gmra.mrb[6].mxu0 %vm225_vm0, %v10387_v10  ;;  %v10541_v42 = vld [vmem:[%s10349_s27 + $0x48] sm:$0xff]  ;;  %v10548_v43 = vld [vmem:[%s10349_s27 + $0x50] sm:$0xff]  ;;  %v10551_v44 = vld [vmem:[%s10349_s27 + $0x60] sm:$0xff] }
  0x22   : > { %8882 = vmatprep.mubr.msk.f32.mxu0 %vm225_vm0, %v10390_v11  ;;  %v10558_v45 = vld [vmem:[%s10349_s27 + $0x68] sm:$0xff]  ;;  %v10561_v46 = vld [vmem:[%s10349_s27 + $0x78] sm:$0xff]  ;;  %v10568_v47 = vld [vmem:[%s10349_s27 + $0x80] sm:$0xff] }
  0x23   : > { %v10571_v48 = vld [vmem:[%s10349_s27 + $0x90] sm:$0xff]  ;;  %v10578_v49 = vld [vmem:[%s10349_s27 + $0x98] sm:$0xff]  ;;  %v10581_v50 = vld [vmem:[%s10349_s27 + $0xa8] sm:$0xff] }
  0x24   : > { %v10588_v51 = vld [vmem:[%s10349_s27 + $0xb0] sm:$0xff]  ;;  %v10591_v52 = vld [vmem:[%s10349_s27 + $0xc0] sm:$0xff]  ;;  %v10598_v53 = vld [vmem:[%s10349_s27 + $0xc8] sm:$0xff] }
  0x25   : > { %8883 = vmatmul.mubr.msk.f32.gmra.mrb[8].mxu0 %vm225_vm0, %v10397_v12  ;;  %v10601_v54 = vld [vmem:[%s10349_s27 + $0xd8] sm:$0xff]  ;;  %v10608_v55 = vld [vmem:[%s10349_s27 + $0xe0] sm:$0xff]  ;;  %v10611_v56 = vld [vmem:[%s10349_s27 + $0xf0] sm:$0xff] }
  0x26   : > { %8885 = vmatprep.mubr.msk.f32.mxu0 %vm225_vm0, %v10400_v13  ;;  %v10618_v57 = vld [vmem:[%s10349_s27 + $0xf8] sm:$0xff]  ;;  %v10621_v58 = vld [vmem:[%s10349_s27 + $0x108] sm:$0xff]  ;;  %v10628_v59 = vld [vmem:[%s10349_s27 + $0x110] sm:$0xff] }
  0x27   : > { %v10631_v60 = vld [vmem:[%s10349_s27 + $0x120] sm:$0xff]  ;;  %v10638_v61 = vld [vmem:[%s10349_s27 + $0x128] sm:$0xff]  ;;  %v10641_v62 = vld [vmem:[%s10349_s27 + $0x138] sm:$0xff] }
  0x28   : > { %v10648_v63 = vld [vmem:[%s10349_s27 + $0x140] sm:$0xff]  ;;  %v10651_v0 = vld [vmem:[%s10349_s27 + $0x150] sm:$0xff]  ;;  %v10658_v1 = vld [vmem:[%s10349_s27 + $0x158] sm:$0xff] }
  0x29   : > { %8886 = vmatmul.mubr.msk.f32.gmra.mrb[10].mxu0 %vm225_vm0, %v10407_v14  ;;  %v10661_v2 = vld [vmem:[%s10349_s27 + $0x168] sm:$0xff]  ;;  %v10668_v3 = vld [vmem:[%s10349_s27 + $0x170] sm:$0xff] }
  0x2a   : > { %8888 = vmatprep.mubr.msk.f32.mxu0 %vm225_vm0, %v10410_v15 }
  0x2d   : > { %8889 = vmatmul.mubr.msk.f32.gmra.mrb[12].mxu0 %vm225_vm0, %v10417_v16 }
  0x2e   : > { %8891 = vmatprep.mubr.msk.f32.mxu0 %vm225_vm0, %v10420_v17 }
  0x31   : > { %8892 = vmatmul.mubr.msk.f32.gmra.mrb[14].mxu0 %vm225_vm0, %v10427_v18 }
  0x32   : > { %8894 = vmatprep.mubr.msk.f32.mxu0 %vm225_vm0, %v10430_v19 }
  0x35   : > { %8895 = vmatmul.mubr.msk.f32.gmra.mrb[16].mxu0 %vm225_vm0, %v10437_v20 }
  0x36   : > { %8897 = vmatprep.mubr.msk.f32.mxu0 %vm225_vm0, %v10440_v21 }
  0x39   : > { %8898 = vmatmul.mubr.msk.f32.gmra.mrb[18].mxu0 %vm225_vm0, %v10447_v22 }
  0x3a   : > { %8900 = vmatprep.mubr.msk.f32.mxu0 %vm225_vm0, %v10450_v23 }
  0x3d   : > { %8901 = vmatmul.mubr.msk.f32.gmra.mrb[20].mxu0 %vm225_vm0, %v10457_v24 }
  0x3e   : > { %8903 = vmatprep.mubr.msk.f32.mxu0 %vm225_vm0, %v10460_v25 }
  0x41   : > { %8904 = vmatmul.mubr.msk.f32.gmra.mrb[22].mxu0 %vm225_vm0, %v10467_v26 }
  0x42   : > { %8906 = vmatprep.mubr.msk.f32.mxu0 %vm225_vm0, %v10470_v27 }
  0x45   : > { %8907 = vmatmul.mubr.msk.f32.gmra.mrb[24].mxu0 %vm225_vm0, %v10477_v28 }
  0x46   : > { %8909 = vmatprep.mubr.msk.f32.mxu0 %vm225_vm0, %v10480_v29 }
  0x49   : > { %8910 = vmatmul.mubr.msk.f32.gmra.mrb[26].mxu0 %vm225_vm0, %v10487_v30 }
  0x4a   : > { %8912 = vmatprep.mubr.msk.f32.mxu0 %vm225_vm0, %v10490_v31 }
  0x4d   : > { %8913 = vmatmul.mubr.msk.f32.gmra.mrb[28].mxu0 %vm225_vm0, %v10497_v32  ;;  %v10712_v32 = vld [vmem:[%s10349_s27 + $0x62] sm:$0xff] }
  0x4e   : > { %8915 = vmatprep.mubr.msk.f32.mxu0 %vm225_vm0, %v10500_v33  ;;  %v10691_v33 = vld [vmem:[%s10349_s27 + $0x32] sm:$0xff]  ;;  %12439 = vst [vmem:[#allocation17_spill] sm:$0xff] %v10712_v32 }
  0x4f   : > { %12435 = vst [vmem:[#allocation13_spill] sm:$0xff] %v10691_v33 }
  0x51   : > { %8916 = vmatmul.mubr.msk.f32.gmra.mrb[30].mxu0 %vm225_vm0, %v10507_v34  ;;  %v10681_v34 = vld [vmem:[%s12303_s1 + $0x20] sm:$0xff] }
  0x52   : > { %8920 = vmatprep.mubr.msk.f32.mxu0 %vm225_vm0, %v280_v35  ;;  %v990_v35 = vld [vmem:[%s10349_s27 + $0xa] sm:$0xff] }
  0x55   : > { %8921 = vmatmul.mubr.msk.f32.vlgmr.msra.gmra.mrb[0].mxu0 %vm225_vm0, %v281_v36  ;;  %v10676_v36 = vld [vmem:[%s10349_s27 + $0x1a] sm:$0xff] }
  0x56   : > { %8969 = vmatpush3.msra.mxu0 %v10360_v5  ;;  %8923 = vmatprep.mubr.msk.f32.mxu0 %vm225_vm0, %v10515_v37  ;;  %v989_v5 = vld [vmem:[%s10349_s27 + $0x2] sm:$0xff]  ;;  %12433 = vst [vmem:[#allocation11_spill] sm:$0xff] %v10676_v36 }
  0x57   : > { %9018 = vmatprep.subr.mxu0 %v10520_v38 }
  0x59   : > { %8924 = vmatmul.mubr.msk.f32.gmra.mrb[2].mxu0 %vm225_vm0, %v10527_v39 }
  0x5a   : > { %8926 = vmatprep.mubr.msk.f32.mxu0 %vm225_vm0, %v10530_v40 }
  0x5d   : > { %8927 = vmatmul.mubr.msk.f32.gmra.mrb[4].mxu0 %vm225_vm0, %v10538_v41 }
  0x5e   : > { %8929 = vmatprep.mubr.msk.f32.mxu0 %vm225_vm0, %v10541_v42 }
  0x61   : > { %8930 = vmatmul.mubr.msk.f32.gmra.mrb[6].mxu0 %vm225_vm0, %v10548_v43 }
  0x62   : > { %8932 = vmatprep.mubr.msk.f32.mxu0 %vm225_vm0, %v10551_v44 }
  0x65   : > { %8933 = vmatmul.mubr.msk.f32.gmra.mrb[8].mxu0 %vm225_vm0, %v10558_v45 }
  0x66   : > { %8935 = vmatprep.mubr.msk.f32.mxu0 %vm225_vm0, %v10561_v46 }
  0x69   : > { %8936 = vmatmul.mubr.msk.f32.gmra.mrb[10].mxu0 %vm225_vm0, %v10568_v47 }
  0x6a   : > { %8938 = vmatprep.mubr.msk.f32.mxu0 %vm225_vm0, %v10571_v48 }
  0x6d   : > { %8939 = vmatmul.mubr.msk.f32.gmra.mrb[12].mxu0 %vm225_vm0, %v10578_v49 }
  0x6e   : > { %8941 = vmatprep.mubr.msk.f32.mxu0 %vm225_vm0, %v10581_v50 }
  0x71   : > { %8942 = vmatmul.mubr.msk.f32.gmra.mrb[14].mxu0 %vm225_vm0, %v10588_v51 }
  0x72   : > { %8944 = vmatprep.mubr.msk.f32.mxu0 %vm225_vm0, %v10591_v52 }
  0x75   : > { %8945 = vmatmul.mubr.msk.f32.gmra.mrb[16].mxu0 %vm225_vm0, %v10598_v53 }
  0x76   : > { %8947 = vmatprep.mubr.msk.f32.mxu0 %vm225_vm0, %v10601_v54 }
  0x79   : > { %8948 = vmatmul.mubr.msk.f32.gmra.mrb[18].mxu0 %vm225_vm0, %v10608_v55 }
  0x7a   : > { %8950 = vmatprep.mubr.msk.f32.mxu0 %vm225_vm0, %v10611_v56 }
  0x7d   : > { %8951 = vmatmul.mubr.msk.f32.gmra.mrb[20].mxu0 %vm225_vm0, %v10618_v57 }
  0x7e   : > { %8953 = vmatprep.mubr.msk.f32.mxu0 %vm225_vm0, %v10621_v58 }
  0x81   : > { %8954 = vmatmul.mubr.msk.f32.gmra.mrb[22].mxu0 %vm225_vm0, %v10628_v59 }
  0x82   : > { %8956 = vmatprep.mubr.msk.f32.mxu0 %vm225_vm0, %v10631_v60 }
  0x85   : > { %8957 = vmatmul.mubr.msk.f32.gmra.mrb[24].mxu0 %vm225_vm0, %v10638_v61 }
  0x86   : > { %8959 = vmatprep.mubr.msk.f32.mxu0 %vm225_vm0, %v10641_v62 }
  0x89   : > { %8960 = vmatmul.mubr.msk.f32.gmra.mrb[26].mxu0 %vm225_vm0, %v10648_v63 }
  0x8a   : > { %8962 = vmatprep.mubr.msk.f32.mxu0 %vm225_vm0, %v10651_v0 }
  0x8d   : > { %8963 = vmatmul.mubr.msk.f32.gmra.mrb[28].mxu0 %vm225_vm0, %v10658_v1 }
  0x8e   : > { %8965 = vmatprep.mubr.msk.f32.mxu0 %vm225_vm0, %v10661_v2 }
  0x91   : > { %8966 = vmatmul.mubr.msk.f32.gmra.mrb[30].mxu0 %vm225_vm0, %v10668_v3 }
  0x92   : > { %8970 = vmatprep.mubr.msk.f32.mxu0 %vm225_vm0, %v989_v5  ;;  %v10688_v5 = vld [vmem:[%s10349_s27 + $0x22] sm:$0xff] }
  0x93   : > { %12434 = vst [vmem:[#allocation12_spill] sm:$0xff] %v10688_v5 }
  0x95   : > { %8971 = vmatmul.mubr.msk.f32.vlgmr.msra.gmra.mrb[0].mxu0 %vm225_vm0, %v990_v35  ;;  %v10699_v35 = vld [vmem:[%s10349_s27 + $0x3a] sm:$0xff] }
  0x96   : > { %9019 = vmatpush3.msra.mxu0 %v10520_v38  ;;  %8973 = vmatprep.mubr.msk.f32.mxu0 %vm225_vm0, %v10676_v36  ;;  %12436 = vst [vmem:[#allocation14_spill] sm:$0xff] %v10699_v35  ;;  %v10702_v38 = vld [vmem:[%s10349_s27 + $0x4a] sm:$0xff]  ;;  %v10709_v36 = vld [vmem:[%s10349_s27 + $0x52] sm:$0xff] }
  0x97   : > { %9068 = vmatprep.subr.mxu0 %v10681_v34  ;;  %12437 = vst [vmem:[#allocation15_spill] sm:$0xff] %v10702_v38  ;;  %12438 = vst [vmem:[#allocation16_spill] sm:$0xff] %v10709_v36 }
  0x99   : > { %8974 = vmatmul.mubr.msk.f32.gmra.mrb[2].mxu0 %vm225_vm0, %v10688_v5  ;;  %v10722_v5 = vld [vmem:[%s10349_s27 + $0x7a] sm:$0xff] }
  0x9a   : > { %8976 = vmatprep.mubr.msk.f32.mxu0 %vm225_vm0, %v10691_v33  ;;  %v10719_v33 = vld [vmem:[%s10349_s27 + $0x6a] sm:$0xff]  ;;  %12441 = vst [vmem:[#allocation19_spill] sm:$0xff] %v10722_v5 }
  0x9b   : > { %12440 = vst [vmem:[#allocation18_spill] sm:$0xff] %v10719_v33 }
  0x9d   : > { %8977 = vmatmul.mubr.msk.f32.gmra.mrb[4].mxu0 %vm225_vm0, %v10699_v35  ;;  %v10732_v35 = vld [vmem:[%s10349_s27 + $0x92] sm:$0xff] }
  0x9e   : > { %8979 = vmatprep.mubr.msk.f32.mxu0 %vm225_vm0, %v10702_v38  ;;  %v10729_v38 = vld [vmem:[%s10349_s27 + $0x82] sm:$0xff]  ;;  %12443 = vst [vmem:[#allocation21_spill] sm:$0xff] %v10732_v35 }
  0x9f   : > { %12442 = vst [vmem:[#allocation20_spill] sm:$0xff] %v10729_v38 }
  0xa1   : > { %8980 = vmatmul.mubr.msk.f32.gmra.mrb[6].mxu0 %vm225_vm0, %v10709_v36  ;;  %v10742_v36 = vld [vmem:[%s10349_s27 + $0xaa] sm:$0xff] }
  0xa2   : > { %8982 = vmatprep.mubr.msk.f32.mxu0 %vm225_vm0, %v10712_v32  ;;  %v10739_v32 = vld [vmem:[%s10349_s27 + $0x9a] sm:$0xff]  ;;  %12445 = vst [vmem:[#allocation23_spill] sm:$0xff] %v10742_v36 }
  0xa3   : > { %12444 = vst [vmem:[#allocation22_spill] sm:$0xff] %v10739_v32 }
  0xa5   : > { %8983 = vmatmul.mubr.msk.f32.gmra.mrb[8].mxu0 %vm225_vm0, %v10719_v33  ;;  %v10752_v33 = vld [vmem:[%s10349_s27 + $0xc2] sm:$0xff] }
  0xa6   : > { %8985 = vmatprep.mubr.msk.f32.mxu0 %vm225_vm0, %v10722_v5  ;;  %v10749_v5 = vld [vmem:[%s10349_s27 + $0xb2] sm:$0xff]  ;;  %12447 = vst [vmem:[#allocation25_spill] sm:$0xff] %v10752_v33 }
  0xa7   : > { %12446 = vst [vmem:[#allocation24_spill] sm:$0xff] %v10749_v5 }
  0xa9   : > { %8986 = vmatmul.mubr.msk.f32.gmra.mrb[10].mxu0 %vm225_vm0, %v10729_v38  ;;  %v10762_v38 = vld [vmem:[%s10349_s27 + $0xda] sm:$0xff] }
  0xaa   : > { %8988 = vmatprep.mubr.msk.f32.mxu0 %vm225_vm0, %v10732_v35  ;;  %v10759_v35 = vld [vmem:[%s10349_s27 + $0xca] sm:$0xff]  ;;  %12449 = vst [vmem:[#allocation27_spill] sm:$0xff] %v10762_v38 }
  0xab   : > { %12448 = vst [vmem:[#allocation26_spill] sm:$0xff] %v10759_v35 }
  0xad   : > { %8989 = vmatmul.mubr.msk.f32.gmra.mrb[12].mxu0 %vm225_vm0, %v10739_v32  ;;  %v10772_v32 = vld [vmem:[%s10349_s27 + $0xf2] sm:$0xff] }
  0xae   : > { %8991 = vmatprep.mubr.msk.f32.mxu0 %vm225_vm0, %v10742_v36  ;;  %v10769_v36 = vld [vmem:[%s10349_s27 + $0xe2] sm:$0xff]  ;;  %12451 = vst [vmem:[#allocation29_spill] sm:$0xff] %v10772_v32 }
  0xaf   : > { %12450 = vst [vmem:[#allocation28_spill] sm:$0xff] %v10769_v36 }
  0xb1   : > { %8992 = vmatmul.mubr.msk.f32.gmra.mrb[14].mxu0 %vm225_vm0, %v10749_v5  ;;  %v10782_v5 = vld [vmem:[%s10349_s27 + $0x10a] sm:$0xff] }
  0xb2   : > { %8994 = vmatprep.mubr.msk.f32.mxu0 %vm225_vm0, %v10752_v33  ;;  %v10779_v33 = vld [vmem:[%s10349_s27 + $0xfa] sm:$0xff]  ;;  %12453 = vst [vmem:[#allocation31_spill] sm:$0xff] %v10782_v5 }
  0xb3   : > { %12452 = vst [vmem:[#allocation30_spill] sm:$0xff] %v10779_v33 }
  0xb5   : > { %8995 = vmatmul.mubr.msk.f32.gmra.mrb[16].mxu0 %vm225_vm0, %v10759_v35  ;;  %v10792_v35 = vld [vmem:[%s10349_s27 + $0x122] sm:$0xff] }
  0xb6   : > { %8997 = vmatprep.mubr.msk.f32.mxu0 %vm225_vm0, %v10762_v38  ;;  %v10789_v38 = vld [vmem:[%s10349_s27 + $0x112] sm:$0xff]  ;;  %12455 = vst [vmem:[#allocation33_spill] sm:$0xff] %v10792_v35 }
  0xb7   : > { %12454 = vst [vmem:[#allocation32_spill] sm:$0xff] %v10789_v38 }
  0xb9   : > { %8998 = vmatmul.mubr.msk.f32.gmra.mrb[18].mxu0 %vm225_vm0, %v10769_v36  ;;  %v10802_v36 = vld [vmem:[%s10349_s27 + $0x13a] sm:$0xff] }
  0xba   : > { %9000 = vmatprep.mubr.msk.f32.mxu0 %vm225_vm0, %v10772_v32  ;;  %v10799_v32 = vld [vmem:[%s10349_s27 + $0x12a] sm:$0xff]  ;;  %12456 = vst [vmem:[#allocation34_spill] sm:$0xff] %v10802_v36 }
  0xbd   : > { %9001 = vmatmul.mubr.msk.f32.gmra.mrb[20].mxu0 %vm225_vm0, %v10779_v33  ;;  %v10812_v33 = vld [vmem:[%s10349_s27 + $0x152] sm:$0xff] }
  0xbe   : > { %9003 = vmatprep.mubr.msk.f32.mxu0 %vm225_vm0, %v10782_v5  ;;  %v10809_v5 = vld [vmem:[%s10349_s27 + $0x142] sm:$0xff]  ;;  %12457 = vst [vmem:[#allocation35_spill] sm:$0xff] %v10812_v33 }
  0xc1   : > { %9004 = vmatmul.mubr.msk.f32.gmra.mrb[22].mxu0 %vm225_vm0, %v10789_v38  ;;  %v10822_v38 = vld [vmem:[%s10349_s27 + $0x16a] sm:$0xff] }
  0xc2   : > { %9006 = vmatprep.mubr.msk.f32.mxu0 %vm225_vm0, %v10792_v35  ;;  %v10819_v35 = vld [vmem:[%s10349_s27 + $0x15a] sm:$0xff]  ;;  %12458 = vst [vmem:[#allocation36_spill] sm:$0xff] %v10822_v38 }
  0xc5   : > { %9007 = vmatmul.mubr.msk.f32.gmra.mrb[24].mxu0 %vm225_vm0, %v10799_v32 }
  0xc6   : > { %9009 = vmatprep.mubr.msk.f32.mxu0 %vm225_vm0, %v10802_v36  ;;  %v10829_v36 = vld [vmem:[%s10349_s27 + $0x172] sm:$0xff] }
  0xc9   : > { %9010 = vmatmul.mubr.msk.f32.gmra.mrb[26].mxu0 %vm225_vm0, %v10809_v5 }
  0xca   : > { %9012 = vmatprep.mubr.msk.f32.mxu0 %vm225_vm0, %v10812_v33  ;;  %v7713_v33 = vld [vmem:[%s12303_s1 + $0x28] sm:$0xff] }
  0xcd   : > { %9013 = vmatmul.mubr.msk.f32.gmra.mrb[28].mxu0 %vm225_vm0, %v10819_v35 }
  0xce   : > { %9015 = vmatprep.mubr.msk.f32.mxu0 %vm225_vm0, %v10822_v38 }
  0xd1   : > { %9016 = vmatmul.mubr.msk.f32.gmra.mrb[30].mxu0 %vm225_vm0, %v10829_v36 }
  0xd2   : > { %9020 = vmatprep.mubr.msk.f32.mxu0 %vm225_vm0, %v10515_v37  ;;  %v10903_v37 = vld [vmem:[%s10349_s27 + $0x188] sm:$0xff] }
  0xd5   : > { %9021 = vmatmul.mubr.msk.f32.vlgmr.msra.gmra.mrb[0].mxu0 %vm225_vm0, %v10527_v39  ;;  %v7778_v39 = vld [vmem:[%s12303_s1 + $0x30] sm:$0xff] }
  0xd6   : > { %9069 = vmatpush3.msra.mxu0 %v10681_v34  ;;  %9023 = vmatprep.mubr.msk.f32.mxu0 %vm225_vm0, %v10530_v40  ;;  %v10896_v34 = vld [vmem:[%s10349_s27 + $0x180] sm:$0xff] }
  0xd7   : > { %9118 = vmatprep.subr.mxu0 %v7713_v33 }
  0xd9   : > { %9024 = vmatmul.mubr.msk.f32.gmra.mrb[2].mxu0 %vm225_vm0, %v10538_v41 }
  0xda   : > { %9026 = vmatprep.mubr.msk.f32.mxu0 %vm225_vm0, %v10541_v42 }
  0xdd   : > { %9027 = vmatmul.mubr.msk.f32.gmra.mrb[4].mxu0 %vm225_vm0, %v10548_v43 }
  0xde   : > { %9029 = vmatprep.mubr.msk.f32.mxu0 %vm225_vm0, %v10551_v44 }
  0xe1   : > { %9030 = vmatmul.mubr.msk.f32.gmra.mrb[6].mxu0 %vm225_vm0, %v10558_v45 }
  0xe2   : > { %9032 = vmatprep.mubr.msk.f32.mxu0 %vm225_vm0, %v10561_v46 }
  0xe5   : > { %9033 = vmatmul.mubr.msk.f32.gmra.mrb[8].mxu0 %vm225_vm0, %v10568_v47 }
  0xe6   : > { %9035 = vmatprep.mubr.msk.f32.mxu0 %vm225_vm0, %v10571_v48 }
  0xe9   : > { %9036 = vmatmul.mubr.msk.f32.gmra.mrb[10].mxu0 %vm225_vm0, %v10578_v49 }
  0xea   : > { %9038 = vmatprep.mubr.msk.f32.mxu0 %vm225_vm0, %v10581_v50 }
  0xed   : > { %9039 = vmatmul.mubr.msk.f32.gmra.mrb[12].mxu0 %vm225_vm0, %v10588_v51 }
  0xee   : > { %9041 = vmatprep.mubr.msk.f32.mxu0 %vm225_vm0, %v10591_v52 }
  0xf1   : > { %9042 = vmatmul.mubr.msk.f32.gmra.mrb[14].mxu0 %vm225_vm0, %v10598_v53 }
  0xf2   : > { %9044 = vmatprep.mubr.msk.f32.mxu0 %vm225_vm0, %v10601_v54 }
  0xf5   : > { %9045 = vmatmul.mubr.msk.f32.gmra.mrb[16].mxu0 %vm225_vm0, %v10608_v55 }
  0xf6   : > { %9047 = vmatprep.mubr.msk.f32.mxu0 %vm225_vm0, %v10611_v56 }
  0xf9   : > { %9048 = vmatmul.mubr.msk.f32.gmra.mrb[18].mxu0 %vm225_vm0, %v10618_v57 }
  0xfa   : > { %9050 = vmatprep.mubr.msk.f32.mxu0 %vm225_vm0, %v10621_v58 }
  0xfd   : > { %9051 = vmatmul.mubr.msk.f32.gmra.mrb[20].mxu0 %vm225_vm0, %v10628_v59 }
  0xfe   : > { %9053 = vmatprep.mubr.msk.f32.mxu0 %vm225_vm0, %v10631_v60 }
 0x101   : > { %9054 = vmatmul.mubr.msk.f32.gmra.mrb[22].mxu0 %vm225_vm0, %v10638_v61 }
 0x102   : > { %9056 = vmatprep.mubr.msk.f32.mxu0 %vm225_vm0, %v10641_v62 }
 0x105   : > { %9057 = vmatmul.mubr.msk.f32.gmra.mrb[24].mxu0 %vm225_vm0, %v10648_v63 }
 0x106   : > { %9059 = vmatprep.mubr.msk.f32.mxu0 %vm225_vm0, %v10651_v0 }
 0x109   : > { %9060 = vmatmul.mubr.msk.f32.gmra.mrb[26].mxu0 %vm225_vm0, %v10658_v1 }
 0x10a   : > { %9062 = vmatprep.mubr.msk.f32.mxu0 %vm225_vm0, %v10661_v2 }
 0x10d   : > { %9063 = vmatmul.mubr.msk.f32.gmra.mrb[28].mxu0 %vm225_vm0, %v10668_v3 }
 0x10e   : > { %9065 = vmatprep.mubr.msk.f32.mxu0 %vm225_vm0, %v10896_v34 }
 0x111   : > { %9066 = vmatmul.mubr.msk.f32.gmra.mrb[30].mxu0 %vm225_vm0, %v10903_v37 }
 0x112   : > { %9070 = vmatprep.mubr.msk.f32.mxu0 %vm225_vm0, %v10354_v4  ;;  %v12459_v4 = vld [vmem:[#allocation8_spill] sm:$0xff] }
 0x115   : > { %9071 = vmatmul.mubr.msk.f32.vlgmr.msra.gmra.mrb[0].mxu0 %vm225_vm0, %v10366_v6  ;;  %v12460_v6 = vld [vmem:[#allocation9_spill] sm:$0xff] }
 0x116   : > { %9119 = vmatpush3.msra.mxu0 %v7713_v33  ;;  %9073 = vmatprep.mubr.msk.f32.mxu0 %vm225_vm0, %v10369_v7  ;;  %v10969_v33 = vld [vmem:[%s10349_s27 + $0x181] sm:$0xff] }
 0x117   : > { %9168 = vmatprep.subr.mxu0 %v7778_v39  ;;  %12461 = vst [vmem:[#allocation37_spill] sm:$0xff] %v10969_v33 }
 0x119   : > { %9074 = vmatmul.mubr.msk.f32.gmra.mrb[2].mxu0 %vm225_vm0, %v10377_v8 }
 0x11a   : > { %9076 = vmatprep.mubr.msk.f32.mxu0 %vm225_vm0, %v10380_v9 }
 0x11d   : > { %9077 = vmatmul.mubr.msk.f32.gmra.mrb[4].mxu0 %vm225_vm0, %v10387_v10 }
 0x11e   : > { %9079 = vmatprep.mubr.msk.f32.mxu0 %vm225_vm0, %v10390_v11 }
 0x121   : > { %9080 = vmatmul.mubr.msk.f32.gmra.mrb[6].mxu0 %vm225_vm0, %v10397_v12 }
 0x122   : > { %9082 = vmatprep.mubr.msk.f32.mxu0 %vm225_vm0, %v10400_v13 }
 0x125   : > { %9083 = vmatmul.mubr.msk.f32.gmra.mrb[8].mxu0 %vm225_vm0, %v10407_v14 }
 0x126   : > { %9085 = vmatprep.mubr.msk.f32.mxu0 %vm225_vm0, %v10410_v15 }
 0x129   : > { %9086 = vmatmul.mubr.msk.f32.gmra.mrb[10].mxu0 %vm225_vm0, %v10417_v16 }
 0x12a   : > { %9088 = vmatprep.mubr.msk.f32.mxu0 %vm225_vm0, %v10420_v17 }
 0x12d   : > { %9089 = vmatmul.mubr.msk.f32.gmra.mrb[12].mxu0 %vm225_vm0, %v10427_v18 }
 0x12e   : > { %9091 = vmatprep.mubr.msk.f32.mxu0 %vm225_vm0, %v10430_v19 }
 0x131   : > { %9092 = vmatmul.mubr.msk.f32.gmra.mrb[14].mxu0 %vm225_vm0, %v10437_v20 }
 0x132   : > { %9094 = vmatprep.mubr.msk.f32.mxu0 %vm225_vm0, %v10440_v21 }
 0x135   : > { %9095 = vmatmul.mubr.msk.f32.gmra.mrb[16].mxu0 %vm225_vm0, %v10447_v22 }
 0x136   : > { %9097 = vmatprep.mubr.msk.f32.mxu0 %vm225_vm0, %v10450_v23 }
 0x139   : > { %9098 = vmatmul.mubr.msk.f32.gmra.mrb[18].mxu0 %vm225_vm0, %v10457_v24 }
 0x13a   : > { %9100 = vmatprep.mubr.msk.f32.mxu0 %vm225_vm0, %v10460_v25 }
 0x13d   : > { %9101 = vmatmul.mubr.msk.f32.gmra.mrb[20].mxu0 %vm225_vm0, %v10467_v26 }
 0x13e   : > { %9103 = vmatprep.mubr.msk.f32.mxu0 %vm225_vm0, %v10470_v27  ;;  %v12462_v27 = vld [vmem:[#allocation10_spill] sm:$0xff] }
 0x141   : > { %9104 = vmatmul.mubr.msk.f32.gmra.mrb[22].mxu0 %vm225_vm0, %v10477_v28  ;;  %v12471_v28 = vld [vmem:[#allocation18_spill] sm:$0xff] }
 0x142   : > { %9106 = vmatprep.mubr.msk.f32.mxu0 %vm225_vm0, %v10480_v29  ;;  %v10976_v29 = vld [vmem:[%s10349_s27 + $0x189] sm:$0xff] }
 0x143   : > { %12463 = vst [vmem:[#allocation38_spill] sm:$0xff] %v10976_v29 }
 0x145   : > { %9107 = vmatmul.mubr.msk.f32.gmra.mrb[24].mxu0 %vm225_vm0, %v10487_v30  ;;  %v12468_v30 = vld [vmem:[#allocation15_spill] sm:$0xff] }
 0x146   : > { %9109 = vmatprep.mubr.msk.f32.mxu0 %vm225_vm0, %v10490_v31  ;;  %v12464_v31 = vld [vmem:[#allocation11_spill] sm:$0xff] }
 0x149   : > { %9110 = vmatmul.mubr.msk.f32.gmra.mrb[26].mxu0 %vm225_vm0, %v12459_v4  ;;  %v12465_v4 = vld [vmem:[#allocation12_spill] sm:$0xff] }
 0x14a   : > { %9112 = vmatprep.mubr.msk.f32.mxu0 %vm225_vm0, %v12460_v6  ;;  %v7843_v6 = vld [vmem:[%s12303_s1 + $0x38] sm:$0xff] }
 0x14d   : > { %9113 = vmatmul.mubr.msk.f32.gmra.mrb[28].mxu0 %vm225_vm0, %v12462_v27  ;;  %v12466_v27 = vld [vmem:[#allocation13_spill] sm:$0xff] }
 0x14e   : > { %9115 = vmatprep.mubr.msk.f32.mxu0 %vm225_vm0, %v10969_v33  ;;  %v12467_v33 = vld [vmem:[#allocation14_spill] sm:$0xff] }
 0x151   : > { %9116 = vmatmul.mubr.msk.f32.gmra.mrb[30].mxu0 %vm225_vm0, %v10976_v29  ;;  %v12469_v29 = vld [vmem:[#allocation16_spill] sm:$0xff] }
 0x152   : > { %9120 = vmatprep.mubr.msk.f32.mxu0 %vm225_vm0, %v12464_v31  ;;  %v12470_v31 = vld [vmem:[#allocation17_spill] sm:$0xff] }
 0x155   : > { %9121 = vmatmul.mubr.msk.f32.vlgmr.msra.gmra.mrb[0].mxu0 %vm225_vm0, %v12465_v4  ;;  %v12473_v4 = vld [vmem:[#allocation20_spill] sm:$0xff] }
 0x156   : > { %9169 = vmatpush3.msra.mxu0 %v7778_v39  ;;  %9123 = vmatprep.mubr.msk.f32.mxu0 %vm225_vm0, %v12466_v27  ;;  %v12472_v39 = vld [vmem:[#allocation19_spill] sm:$0xff]  ;;  %v12474_v27 = vld [vmem:[#allocation21_spill] sm:$0xff] }
 0x157   : > { %9218 = vmatprep.subr.mxu0 %v7843_v6 }
 0x159   : > { %9124 = vmatmul.mubr.msk.f32.gmra.mrb[2].mxu0 %vm225_vm0, %v12467_v33  ;;  %v12475_v33 = vld [vmem:[#allocation22_spill] sm:$0xff] }
 0x15a   : > { %9126 = vmatprep.mubr.msk.f32.mxu0 %vm225_vm0, %v12468_v30  ;;  %v12476_v30 = vld [vmem:[#allocation23_spill] sm:$0xff] }
 0x15d   : > { %9127 = vmatmul.mubr.msk.f32.gmra.mrb[4].mxu0 %vm225_vm0, %v12469_v29  ;;  %v12477_v29 = vld [vmem:[#allocation24_spill] sm:$0xff] }
 0x15e   : > { %9129 = vmatprep.mubr.msk.f32.mxu0 %vm225_vm0, %v12470_v31  ;;  %v12478_v31 = vld [vmem:[#allocation25_spill] sm:$0xff] }
 0x161   : > { %9130 = vmatmul.mubr.msk.f32.gmra.mrb[6].mxu0 %vm225_vm0, %v12471_v28 }
 0x162   : > { %9132 = vmatprep.mubr.msk.f32.mxu0 %vm225_vm0, %v12472_v39  ;;  %v12479_v39 = vld [vmem:[#allocation26_spill] sm:$0xff] }
 0x165   : > { %9133 = vmatmul.mubr.msk.f32.gmra.mrb[8].mxu0 %vm225_vm0, %v12473_v4  ;;  %v12480_v4 = vld [vmem:[#allocation27_spill] sm:$0xff] }
 0x166   : > { %9135 = vmatprep.mubr.msk.f32.mxu0 %vm225_vm0, %v12474_v27  ;;  %v12481_v27 = vld [vmem:[#allocation28_spill] sm:$0xff] }
 0x169   : > { %9136 = vmatmul.mubr.msk.f32.gmra.mrb[10].mxu0 %vm225_vm0, %v12475_v33  ;;  %v12482_v33 = vld [vmem:[#allocation29_spill] sm:$0xff] }
 0x16a   : > { %9138 = vmatprep.mubr.msk.f32.mxu0 %vm225_vm0, %v12476_v30  ;;  %v12483_v30 = vld [vmem:[#allocation30_spill] sm:$0xff] }
 0x16d   : > { %9139 = vmatmul.mubr.msk.f32.gmra.mrb[12].mxu0 %vm225_vm0, %v12477_v29  ;;  %v12484_v29 = vld [vmem:[#allocation31_spill] sm:$0xff] }
 0x16e   : > { %9141 = vmatprep.mubr.msk.f32.mxu0 %vm225_vm0, %v12478_v31  ;;  %v12485_v31 = vld [vmem:[#allocation32_spill] sm:$0xff] }
 0x171   : > { %9142 = vmatmul.mubr.msk.f32.gmra.mrb[14].mxu0 %vm225_vm0, %v12479_v39  ;;  %v12486_v39 = vld [vmem:[#allocation33_spill] sm:$0xff] }
 0x172   : > { %9144 = vmatprep.mubr.msk.f32.mxu0 %vm225_vm0, %v12480_v4  ;;  %v12487_v4 = vld [vmem:[#allocation34_spill] sm:$0xff] }
 0x175   : > { %9145 = vmatmul.mubr.msk.f32.gmra.mrb[16].mxu0 %vm225_vm0, %v12481_v27 }
 0x176   : > { %9147 = vmatprep.mubr.msk.f32.mxu0 %vm225_vm0, %v12482_v33  ;;  %v12488_v33 = vld [vmem:[#allocation35_spill] sm:$0xff] }
 0x179   : > { %9148 = vmatmul.mubr.msk.f32.gmra.mrb[18].mxu0 %vm225_vm0, %v12483_v30 }
 0x17a   : > { %9150 = vmatprep.mubr.msk.f32.mxu0 %vm225_vm0, %v12484_v29 }
 0x17d   : > { %9151 = vmatmul.mubr.msk.f32.gmra.mrb[20].mxu0 %vm225_vm0, %v12485_v31  ;;  %v11042_v31 = vld [vmem:[%s10349_s27 + $0x182] sm:$0xff] }
 0x17e   : > { %9153 = vmatprep.mubr.msk.f32.mxu0 %vm225_vm0, %v12486_v39 }
 0x181   : > { %9154 = vmatmul.mubr.msk.f32.gmra.mrb[22].mxu0 %vm225_vm0, %v10799_v32 }
 0x182   : > { %9156 = vmatprep.mubr.msk.f32.mxu0 %vm225_vm0, %v12487_v4  ;;  %v11049_v4 = vld [vmem:[%s10349_s27 + $0x18a] sm:$0xff] }
 0x185   : > { %9157 = vmatmul.mubr.msk.f32.gmra.mrb[24].mxu0 %vm225_vm0, %v10809_v5 }
 0x186   : > { %9159 = vmatprep.mubr.msk.f32.mxu0 %vm225_vm0, %v12488_v33 }
 0x189   : > { %9160 = vmatmul.mubr.msk.f32.gmra.mrb[26].mxu0 %vm225_vm0, %v10819_v35 }
 0x18a   : > { %9162 = vmatprep.mubr.msk.f32.mxu0 %vm225_vm0, %v10822_v38  ;;  %v11058_v38 = vld [vmem:[%s12303_s1 + $0x40] sm:$0xff] }
 0x18d   : > { %9163 = vmatmul.mubr.msk.f32.gmra.mrb[28].mxu0 %vm225_vm0, %v10829_v36 }
 0x18e   : > { %9165 = vmatprep.mubr.msk.f32.mxu0 %vm225_vm0, %v11042_v31 }
 0x191   : > { %9166 = vmatmul.mubr.msk.f32.gmra.mrb[30].mxu0 %vm225_vm0, %v11049_v4 }
 0x192   : > { %9170 = vmatprep.mubr.msk.f32.mxu0 %vm225_vm0, %v10530_v40  ;;  %v7776_v40 = vld [vmem:[%s10349_s27 + $0x198] sm:$0xff] }
 0x195   : > { %9171 = vmatmul.mubr.msk.f32.vlgmr.msra.gmra.mrb[0].mxu0 %vm225_vm0, %v10538_v41  ;;  %v7777_v41 = vld [vmem:[%s10349_s27 + $0x1a0] sm:$0xff] }
 0x196   : > { %9219 = vmatpush3.msra.mxu0 %v7843_v6  ;;  %9173 = vmatprep.mubr.msk.f32.mxu0 %vm225_vm0, %v10541_v42  ;;  %v10298_v42 = vmov 0.0  }
 0x197   : > { %9268 = vmatprep.subr.mxu0 %v11058_v38  ;;  %230 = vst.msk [vmem:[#allocation2 + $0x20] sm:$0xff] %vm225_vm0, %v10298_v42  ;;  %231 = vst.msk [vmem:[#allocation2 + $0x28] sm:$0xff] %vm225_vm0, %v10298_v42 }
 0x198   : > { %226 = vst.msk [vmem:[#allocation2] sm:$0xff] %vm225_vm0, %v10298_v42  ;;  %227 = vst.msk [vmem:[#allocation2 + $0x8] sm:$0xff] %vm225_vm0, %v10298_v42 }
 0x199   : > { %9174 = vmatmul.mubr.msk.f32.gmra.mrb[2].mxu0 %vm225_vm0, %v10548_v43  ;;  %228 = vst.msk [vmem:[#allocation2 + $0x10] sm:$0xff] %vm225_vm0, %v10298_v42  ;;  %229 = vst.msk [vmem:[#allocation2 + $0x18] sm:$0xff] %vm225_vm0, %v10298_v42  ;;  %v12507_v43 = vld [vmem:[#allocation22_spill] sm:$0xff] }
 0x19a   : > { %9176 = vmatprep.mubr.msk.f32.mxu0 %vm225_vm0, %v10551_v44  ;;  %232 = vst.msk [vmem:[#allocation2 + $0x30] sm:$0xff] %vm225_vm0, %v10298_v42  ;;  %233 = vst.msk [vmem:[#allocation2 + $0x38] sm:$0xff] %vm225_vm0, %v10298_v42  ;;  %v12508_v44 = vld [vmem:[#allocation23_spill] sm:$0xff] }
 0x19b   : > { %234 = vst.msk [vmem:[#allocation2 + $0x40] sm:$0xff] %vm225_vm0, %v10298_v42  ;;  %235 = vst.msk [vmem:[#allocation2 + $0x48] sm:$0xff] %vm225_vm0, %v10298_v42 }
 0x19c   : > { %236 = vst.msk [vmem:[#allocation2 + $0x50] sm:$0xff] %vm225_vm0, %v10298_v42  ;;  %237 = vst.msk [vmem:[#allocation2 + $0x58] sm:$0xff] %vm225_vm0, %v10298_v42 }
 0x19d   : > { %9177 = vmatmul.mubr.msk.f32.gmra.mrb[4].mxu0 %vm225_vm0, %v10558_v45  ;;  %238 = vst.msk [vmem:[#allocation2 + $0x60] sm:$0xff] %vm225_vm0, %v10298_v42  ;;  %239 = vst.msk [vmem:[#allocation2 + $0x68] sm:$0xff] %vm225_vm0, %v10298_v42  ;;  %v12509_v45 = vld [vmem:[#allocation24_spill] sm:$0xff] }
 0x19e   : > { %9179 = vmatprep.mubr.msk.f32.mxu0 %vm225_vm0, %v10561_v46  ;;  %240 = vst.msk [vmem:[#allocation2 + $0x70] sm:$0xff] %vm225_vm0, %v10298_v42  ;;  %241 = vst.msk [vmem:[#allocation2 + $0x78] sm:$0xff] %vm225_vm0, %v10298_v42  ;;  %v12510_v46 = vld [vmem:[#allocation25_spill] sm:$0xff] }
 0x19f   : > { %242 = vst.msk [vmem:[#allocation2 + $0x80] sm:$0xff] %vm225_vm0, %v10298_v42  ;;  %243 = vst.msk [vmem:[#allocation2 + $0x88] sm:$0xff] %vm225_vm0, %v10298_v42 }
 0x1a0   : > { %244 = vst.msk [vmem:[#allocation2 + $0x90] sm:$0xff] %vm225_vm0, %v10298_v42  ;;  %245 = vst.msk [vmem:[#allocation2 + $0x98] sm:$0xff] %vm225_vm0, %v10298_v42 }
 0x1a1   : > { %9180 = vmatmul.mubr.msk.f32.gmra.mrb[6].mxu0 %vm225_vm0, %v10568_v47  ;;  %246 = vst.msk [vmem:[#allocation2 + $0xa0] sm:$0xff] %vm225_vm0, %v10298_v42  ;;  %247 = vst.msk [vmem:[#allocation2 + $0xa8] sm:$0xff] %vm225_vm0, %v10298_v42  ;;  %v12512_v47 = vld [vmem:[#allocation27_spill] sm:$0xff] }
 0x1a2   : > { %9182 = vmatprep.mubr.msk.f32.mxu0 %vm225_vm0, %v10571_v48  ;;  %248 = vst.msk [vmem:[#allocation2 + $0xb0] sm:$0xff] %vm225_vm0, %v10298_v42  ;;  %249 = vst.msk [vmem:[#allocation2 + $0xb8] sm:$0xff] %vm225_vm0, %v10298_v42  ;;  %v12513_v48 = vld [vmem:[#allocation29_spill] sm:$0xff] }
 0x1a3   : > { %250 = vst.msk [vmem:[#allocation2 + $0xc0] sm:$0xff] %vm225_vm0, %v10298_v42  ;;  %251 = vst.msk [vmem:[#allocation2 + $0xc8] sm:$0xff] %vm225_vm0, %v10298_v42 }
 0x1a4   : > { %252 = vst.msk [vmem:[#allocation2 + $0xd0] sm:$0xff] %vm225_vm0, %v10298_v42  ;;  %253 = vst.msk [vmem:[#allocation2 + $0xd8] sm:$0xff] %vm225_vm0, %v10298_v42 }
 0x1a5   : > { %9183 = vmatmul.mubr.msk.f32.gmra.mrb[8].mxu0 %vm225_vm0, %v10578_v49  ;;  %254 = vst.msk [vmem:[#allocation2 + $0xe0] sm:$0xff] %vm225_vm0, %v10298_v42  ;;  %255 = vst.msk [vmem:[#allocation2 + $0xe8] sm:$0xff] %vm225_vm0, %v10298_v42  ;;  %v12514_v49 = vld [vmem:[#allocation32_spill] sm:$0xff] }
 0x1a6   : > { %9185 = vmatprep.mubr.msk.f32.mxu0 %vm225_vm0, %v10581_v50  ;;  %256 = vst.msk [vmem:[#allocation2 + $0xf0] sm:$0xff] %vm225_vm0, %v10298_v42  ;;  %257 = vst.msk [vmem:[#allocation2 + $0xf8] sm:$0xff] %vm225_vm0, %v10298_v42  ;;  %v7942_v50 = vld [vmem:[%s12305_s3 + $0x8] sm:$0xff] }
 0x1a7   : > { %258 = vst.msk [vmem:[#allocation2 + $0x100] sm:$0xff] %vm225_vm0, %v10298_v42  ;;  %259 = vst.msk [vmem:[#allocation2 + $0x108] sm:$0xff] %vm225_vm0, %v10298_v42  ;;  %9318 = vmatprep.subr.mxu1 %v7942_v50 }
 0x1a8   : > { %260 = vst.msk [vmem:[#allocation2 + $0x110] sm:$0xff] %vm225_vm0, %v10298_v42  ;;  %261 = vst.msk [vmem:[#allocation2 + $0x118] sm:$0xff] %vm225_vm0, %v10298_v42  ;;  %9319 = vmatpush3.msra.mxu1 %v7942_v50 }
 0x1a9   : > { %9186 = vmatmul.mubr.msk.f32.gmra.mrb[10].mxu0 %vm225_vm0, %v10588_v51  ;;  %262 = vst.msk [vmem:[#allocation2 + $0x120] sm:$0xff] %vm225_vm0, %v10298_v42  ;;  %263 = vst.msk [vmem:[#allocation2 + $0x128] sm:$0xff] %vm225_vm0, %v10298_v42  ;;  %v3837_v51 = vld [vmem:[#allocation2 + $0x1] sm:$0xff] }
 0x1aa   : > { %9188 = vmatprep.mubr.msk.f32.mxu0 %vm225_vm0, %v10591_v52  ;;  %264 = vst.msk [vmem:[#allocation2 + $0x130] sm:$0xff] %vm225_vm0, %v10298_v42  ;;  %265 = vst.msk [vmem:[#allocation2 + $0x138] sm:$0xff] %vm225_vm0, %v10298_v42  ;;  %9320 = vmatprep.mubr.msk.f32.mxu1 %vm225_vm0, %v3837_v51  ;;  %v3838_v52 = vld [vmem:[#allocation2 + $0x9] sm:$0xff] }
 0x1ab   : > { %266 = vst.msk [vmem:[#allocation2 + $0x140] sm:$0xff] %vm225_vm0, %v10298_v42  ;;  %267 = vst.msk [vmem:[#allocation2 + $0x148] sm:$0xff] %vm225_vm0, %v10298_v42  ;;  %9321 = vmatmul.mubr.msk.f32.vlgmr.msra.gmra.mrb[0].mxu1 %vm225_vm0, %v3838_v52 }
 0x1ac   : > { %268 = vst.msk [vmem:[#allocation2 + $0x150] sm:$0xff] %vm225_vm0, %v10298_v42  ;;  %269 = vst.msk [vmem:[#allocation2 + $0x158] sm:$0xff] %vm225_vm0, %v10298_v42 }
 0x1ad   : > { %9189 = vmatmul.mubr.msk.f32.gmra.mrb[12].mxu0 %vm225_vm0, %v10598_v53  ;;  %270 = vst.msk [vmem:[#allocation2 + $0x160] sm:$0xff] %vm225_vm0, %v10298_v42  ;;  %271 = vst.msk [vmem:[#allocation2 + $0x168] sm:$0xff] %vm225_vm0, %v10298_v42  ;;  %v3836_v53 = vld [vmem:[%s12305_s3] sm:$0xff] }
 0x1ae   : > { %9191 = vmatprep.mubr.msk.f32.mxu0 %vm225_vm0, %v10601_v54  ;;  %272 = vst.msk [vmem:[#allocation2 + $0x170] sm:$0xff] %vm225_vm0, %v10298_v42  ;;  %273 = vst.msk [vmem:[#allocation2 + $0x178] sm:$0xff] %vm225_vm0, %v10298_v42  ;;  %9368 = vmatprep.subr.mxu1 %v3836_v53  ;;  %v11317_v54 = vld [vmem:[%s12305_s3 + $0x10] sm:$0xff] }
 0x1af   : > { %274 = vst.msk [vmem:[#allocation2 + $0x180] sm:$0xff] %vm225_vm0, %v10298_v42  ;;  %275 = vst.msk [vmem:[#allocation2 + $0x188] sm:$0xff] %vm225_vm0, %v10298_v42  ;;  %9369 = vmatpush3.msra.mxu1 %v3836_v53 }
 0x1b0   : > { %276 = vst.msk [vmem:[#allocation2 + $0x190] sm:$0xff] %vm225_vm0, %v10298_v42  ;;  %277 = vst.msk [vmem:[#allocation2 + $0x198] sm:$0xff] %vm225_vm0, %v10298_v42  ;;  %9418 = vmatprep.subr.mxu1 %v11317_v54 }
 0x1b1   : > { %9192 = vmatmul.mubr.msk.f32.gmra.mrb[14].mxu0 %vm225_vm0, %v10608_v55  ;;  %278 = vst.msk [vmem:[#allocation2 + $0x1a0] sm:$0xff] %vm225_vm0, %v10298_v42  ;;  %279 = vst.msk [vmem:[#allocation2 + $0x1a8] sm:$0xff] %vm225_vm0, %v10298_v42  ;;  %v11323_v55 = vld [vmem:[%s12304_s2] ss:$0 sm:$0xff] }
 0x1b2   : > { %9194 = vmatprep.mubr.msk.f32.mxu0 %vm225_vm0, %v10611_v56 }
 0x1b5   : > { %9195 = vmatmul.mubr.msk.f32.gmra.mrb[16].mxu0 %vm225_vm0, %v10618_v57 }
 0x1b6   : > { %9197 = vmatprep.mubr.msk.f32.mxu0 %vm225_vm0, %v10621_v58 }
 0x1b9   : > { %9198 = vmatmul.mubr.msk.f32.gmra.mrb[18].mxu0 %vm225_vm0, %v10628_v59 }
 0x1ba   : > { %9200 = vmatprep.mubr.msk.f32.mxu0 %vm225_vm0, %v10631_v60 }
 0x1bd   : > { %9201 = vmatmul.mubr.msk.f32.gmra.mrb[20].mxu0 %vm225_vm0, %v10638_v61 }
 0x1be   : > { %9203 = vmatprep.mubr.msk.f32.mxu0 %vm225_vm0, %v10641_v62 }
 0x1c1   : > { %9204 = vmatmul.mubr.msk.f32.gmra.mrb[22].mxu0 %vm225_vm0, %v10648_v63 }
 0x1c2   : > { %9206 = vmatprep.mubr.msk.f32.mxu0 %vm225_vm0, %v10651_v0 }
 0x1c5   : > { %9207 = vmatmul.mubr.msk.f32.gmra.mrb[24].mxu0 %vm225_vm0, %v10658_v1 }
 0x1c6   : > { %9209 = vmatprep.mubr.msk.f32.mxu0 %vm225_vm0, %v10661_v2 }
 0x1c9   : > { %9210 = vmatmul.mubr.msk.f32.gmra.mrb[26].mxu0 %vm225_vm0, %v10668_v3 }
 0x1ca   : > { %9212 = vmatprep.mubr.msk.f32.mxu0 %vm225_vm0, %v10896_v34 }
 0x1cd   : > { %9213 = vmatmul.mubr.msk.f32.gmra.mrb[28].mxu0 %vm225_vm0, %v10903_v37 }
 0x1ce   : > { %9215 = vmatprep.mubr.msk.f32.mxu0 %vm225_vm0, %v7776_v40 }
 0x1d1   : > { %9216 = vmatmul.mubr.msk.f32.gmra.mrb[30].mxu0 %vm225_vm0, %v7777_v41 }
 0x1d2   : > { %9220 = vmatprep.mubr.msk.f32.mxu0 %vm225_vm0, %v10369_v7  ;;  %v12489_v7 = vld [vmem:[#allocation3_spill] sm:$0xff] }
 0x1d5   : > { %9221 = vmatmul.mubr.msk.f32.vlgmr.msra.gmra.mrb[0].mxu0 %vm225_vm0, %v10377_v8  ;;  %v12490_v8 = vld [vmem:[#allocation4_spill] sm:$0xff] }
 0x1d6   : > { %9269 = vmatpush3.msra.mxu0 %v11058_v38  ;;  %9223 = vmatprep.mubr.msk.f32.mxu0 %vm225_vm0, %v10380_v9  ;;  %v12491_v9 = vld [vmem:[#allocation5_spill] sm:$0xff] }
 0x1d9   : > { %9224 = vmatmul.mubr.msk.f32.gmra.mrb[2].mxu0 %vm225_vm0, %v10387_v10  ;;  %v12492_v10 = vld [vmem:[#allocation6_spill] sm:$0xff] }
 0x1da   : > { %9226 = vmatprep.mubr.msk.f32.mxu0 %vm225_vm0, %v10390_v11  ;;  %v12493_v11 = vld [vmem:[#allocation7_spill] sm:$0xff] }
 0x1dd   : > { %9227 = vmatmul.mubr.msk.f32.gmra.mrb[4].mxu0 %vm225_vm0, %v10397_v12  ;;  %v12494_v12 = vld [vmem:[#allocation8_spill] sm:$0xff] }
 0x1de   : > { %9229 = vmatprep.mubr.msk.f32.mxu0 %vm225_vm0, %v10400_v13  ;;  %v12495_v13 = vld [vmem:[#allocation9_spill] sm:$0xff] }
 0x1e1   : > { %9230 = vmatmul.mubr.msk.f32.gmra.mrb[6].mxu0 %vm225_vm0, %v10407_v14  ;;  %v12496_v14 = vld [vmem:[#allocation10_spill] sm:$0xff] }
 0x1e2   : > { %9232 = vmatprep.mubr.msk.f32.mxu0 %vm225_vm0, %v10410_v15  ;;  %v12497_v15 = vld [vmem:[#allocation37_spill] sm:$0xff] }
 0x1e5   : > { %9233 = vmatmul.mubr.msk.f32.gmra.mrb[8].mxu0 %vm225_vm0, %v10417_v16  ;;  %v7841_v16 = vld [vmem:[%s10349_s27 + $0x199] sm:$0xff] }
 0x1e6   : > { %9235 = vmatprep.mubr.msk.f32.mxu0 %vm225_vm0, %v10420_v17  ;;  %v12498_v17 = vld [vmem:[#allocation38_spill] sm:$0xff] }
 0x1e9   : > { %9236 = vmatmul.mubr.msk.f32.gmra.mrb[10].mxu0 %vm225_vm0, %v10427_v18  ;;  %v7842_v18 = vld [vmem:[%s10349_s27 + $0x1a1] sm:$0xff] }
 0x1ea   : > { %9238 = vmatprep.mubr.msk.f32.mxu0 %vm225_vm0, %v10430_v19  ;;  %v12499_v19 = vld [vmem:[#allocation13_spill] sm:$0xff] }
 0x1ed   : > { %9239 = vmatmul.mubr.msk.f32.gmra.mrb[12].mxu0 %vm225_vm0, %v10437_v20  ;;  %v12500_v20 = vld [vmem:[#allocation14_spill] sm:$0xff] }
 0x1ee   : > { %9241 = vmatprep.mubr.msk.f32.mxu0 %vm225_vm0, %v10440_v21  ;;  %v12501_v21 = vld [vmem:[#allocation15_spill] sm:$0xff] }
 0x1f1   : > { %9242 = vmatmul.mubr.msk.f32.gmra.mrb[14].mxu0 %vm225_vm0, %v10447_v22  ;;  %v12502_v22 = vld [vmem:[#allocation16_spill] sm:$0xff] }
 0x1f2   : > { %9244 = vmatprep.mubr.msk.f32.mxu0 %vm225_vm0, %v10450_v23  ;;  %v12503_v23 = vld [vmem:[#allocation17_spill] sm:$0xff] }
 0x1f5   : > { %9245 = vmatmul.mubr.msk.f32.gmra.mrb[16].mxu0 %vm225_vm0, %v10457_v24  ;;  %v12504_v24 = vld [vmem:[#allocation19_spill] sm:$0xff] }
 0x1f6   : > { %9247 = vmatprep.mubr.msk.f32.mxu0 %vm225_vm0, %v10460_v25  ;;  %v12505_v25 = vld [vmem:[#allocation20_spill] sm:$0xff] }
 0x1f9   : > { %9248 = vmatmul.mubr.msk.f32.gmra.mrb[18].mxu0 %vm225_vm0, %v10467_v26  ;;  %v12506_v26 = vld [vmem:[#allocation21_spill] sm:$0xff] }
 0x1fa   : > { %9250 = vmatprep.mubr.msk.f32.mxu0 %vm225_vm0, %v12489_v7 }
 0x1fd   : > { %9251 = vmatmul.mubr.msk.f32.gmra.mrb[20].mxu0 %vm225_vm0, %v12490_v8 }
 0x1fe   : > { %9253 = vmatprep.mubr.msk.f32.mxu0 %vm225_vm0, %v12491_v9 }
 0x201   : > { %9254 = vmatmul.mubr.msk.f32.gmra.mrb[22].mxu0 %vm225_vm0, %v12492_v10 }
 0x202   : > { %9256 = vmatprep.mubr.msk.f32.mxu0 %vm225_vm0, %v12493_v11 }
 0x205   : > { %9257 = vmatmul.mubr.msk.f32.gmra.mrb[24].mxu0 %vm225_vm0, %v12494_v12 }
 0x206   : > { %9259 = vmatprep.mubr.msk.f32.mxu0 %vm225_vm0, %v12495_v13 }
 0x209   : > { %9260 = vmatmul.mubr.msk.f32.gmra.mrb[26].mxu0 %vm225_vm0, %v12496_v14 }
 0x20a   : > { %9262 = vmatprep.mubr.msk.f32.mxu0 %vm225_vm0, %v12497_v15 }
 0x20d   : > { %9263 = vmatmul.mubr.msk.f32.gmra.mrb[28].mxu0 %vm225_vm0, %v12498_v17 }
 0x20e   : > { %9265 = vmatprep.mubr.msk.f32.mxu0 %vm225_vm0, %v7841_v16 }
 0x211   : > { %9266 = vmatmul.mubr.msk.f32.gmra.mrb[30].mxu0 %vm225_vm0, %v7842_v18 }
 0x212   : > { %9270 = vmatprep.mubr.msk.f32.mxu0 %vm225_vm0, %v12499_v19 }
 0x215   : > { %9271 = vmatmul.mubr.msk.f32.vlgmr.msra.gmra.mrb[0].mxu0 %vm225_vm0, %v12500_v20 }
 0x216   : > { %9273 = vmatprep.mubr.msk.f32.mxu0 %vm225_vm0, %v12501_v21 }
 0x219   : > { %9274 = vmatmul.mubr.msk.f32.gmra.mrb[2].mxu0 %vm225_vm0, %v12502_v22 }
 0x21a   : > { %9276 = vmatprep.mubr.msk.f32.mxu0 %vm225_vm0, %v12503_v23 }
 0x21d   : > { %9277 = vmatmul.mubr.msk.f32.gmra.mrb[4].mxu0 %vm225_vm0, %v12471_v28  ;;  %v12511_v28 = vld [vmem:[#allocation26_spill] sm:$0xff] }
 0x21e   : > { %9279 = vmatprep.mubr.msk.f32.mxu0 %vm225_vm0, %v12504_v24 }
 0x221   : > { %9280 = vmatmul.mubr.msk.f32.gmra.mrb[6].mxu0 %vm225_vm0, %v12505_v25 }
 0x222   : > { %9282 = vmatprep.mubr.msk.f32.mxu0 %vm225_vm0, %v12506_v26 }
 0x225   : > { %9283 = vmatmul.mubr.msk.f32.gmra.mrb[8].mxu0 %vm225_vm0, %v12507_v43 }
 0x226   : > { %9285 = vmatprep.mubr.msk.f32.mxu0 %vm225_vm0, %v12508_v44 }
 0x229   : > { %9286 = vmatmul.mubr.msk.f32.gmra.mrb[10].mxu0 %vm225_vm0, %v12509_v45 }
 0x22a   : > { %9288 = vmatprep.mubr.msk.f32.mxu0 %vm225_vm0, %v12510_v46 }
 0x22d   : > { %9289 = vmatmul.mubr.msk.f32.gmra.mrb[12].mxu0 %vm225_vm0, %v12511_v28 }
 0x22e   : > { %9291 = vmatprep.mubr.msk.f32.mxu0 %vm225_vm0, %v12512_v47 }
 0x231   : > { %9292 = vmatmul.mubr.msk.f32.gmra.mrb[14].mxu0 %vm225_vm0, %v12481_v27  ;;  %v12515_v27 = vld [vmem:[#allocation34_spill] sm:$0xff] }
 0x232   : > { %9294 = vmatprep.mubr.msk.f32.mxu0 %vm225_vm0, %v12513_v48 }
 0x235   : > { %9295 = vmatmul.mubr.msk.f32.gmra.mrb[16].mxu0 %vm225_vm0, %v12483_v30  ;;  %v7906_v30 = vld [vmem:[%s10349_s27 + $0x19a] sm:$0xff] }
 0x236   : > { %9297 = vmatprep.mubr.msk.f32.mxu0 %vm225_vm0, %v12484_v29  ;;  %v12516_v29 = vld [vmem:[#allocation36_spill] sm:$0xff] }
 0x239   : > { %9298 = vmatmul.mubr.msk.f32.gmra.mrb[18].mxu0 %vm225_vm0, %v12514_v49 }
 0x23a   : > { %9300 = vmatprep.mubr.msk.f32.mxu0 %vm225_vm0, %v12486_v39 }
 0x23d   : > { %9301 = vmatmul.mubr.msk.f32.gmra.mrb[20].mxu0 %vm225_vm0, %v10799_v32  ;;  %v7907_v32 = vld [vmem:[%s10349_s27 + $0x1a2] sm:$0xff] }
 0x23e   : > { %9303 = vmatprep.mubr.msk.f32.mxu0 %vm225_vm0, %v12515_v27 }
 0x241   : > { %9304 = vmatmul.mubr.msk.f32.gmra.mrb[22].mxu0 %vm225_vm0, %v10809_v5 }
 0x242   : > { %9306 = vmatprep.mubr.msk.f32.mxu0 %vm225_vm0, %v12488_v33 }
 0x245   : > { %9307 = vmatmul.mubr.msk.f32.gmra.mrb[24].mxu0 %vm225_vm0, %v10819_v35 }
 0x246   : > { %9309 = vmatprep.mubr.msk.f32.mxu0 %vm225_vm0, %v12516_v29 }
 0x249   : > { %9310 = vmatmul.mubr.msk.f32.gmra.mrb[26].mxu0 %vm225_vm0, %v10829_v36 }
 0x24a   : > { %9312 = vmatprep.mubr.msk.f32.mxu0 %vm225_vm0, %v11042_v31 }
 0x24d   : > { %9313 = vmatmul.mubr.msk.f32.gmra.mrb[28].mxu0 %vm225_vm0, %v11049_v4 }
 0x24e   : > { %9315 = vmatprep.mubr.msk.f32.mxu0 %vm225_vm0, %v7906_v30 }
 0x251   : > { %9316 = vmatmul.mubr.msk.f32.gmra.mrb[30].mxu0 %vm225_vm0, %v7907_v32 }
 0x2e8   : > { %v9272_v56 = vpop.f32.mrb[0].mxu0 }
 0x2e9   : > { %v3708_v57 = vadd.f32 %v9272_v56, %v11323_v55  ;;  %v3509_v58 = vpop.f32.mrb[1].mxu0 }
 0x2ea   : > { %v3707_v59 = vadd.f32 %v11323_v55, %v3509_v58 }
 0x2eb   : > { %v3740_v60 = vmax.f32 %v3708_v57, 0.0 }
 0x2ec   : > { %v3739_v61 = vmax.f32 %v3707_v59, 0.0  ;;  %v9275_v62 = vpop.f32.mrb[2].mxu0 }
 0x2ed   : > { %3773 = vst.msk [vmem:[#allocation2 + $0x21] sm:$0xff] %vm225_vm0, %v3740_v60  ;;  %v3710_v63 = vadd.f32 %v9275_v62, %v11323_v55  ;;  %v3519_v0 = vpop.f32.mrb[3].mxu0 }
 0x2ee   : > { %3772 = vst.msk [vmem:[#allocation2 + $0x19] sm:$0xff] %vm225_vm0, %v3739_v61  ;;  %v3709_v1 = vadd.f32 %v11323_v55, %v3519_v0 }
 0x2ef   : > { %v3742_v2 = vmax.f32 %v3710_v63, 0.0 }
 0x2f0   : > { %v3741_v3 = vmax.f32 %v3709_v1, 0.0  ;;  %v9278_v36 = vpop.f32.mrb[4].mxu0 }
 0x2f1   : > { %3775 = vst.msk [vmem:[#allocation2 + $0x39] sm:$0xff] %vm225_vm0, %v3742_v2  ;;  %v3712_v5 = vadd.f32 %v9278_v36, %v11323_v55  ;;  %v3529_v35 = vpop.f32.mrb[5].mxu0 }
 0x2f2   : > { %3774 = vst.msk [vmem:[#allocation2 + $0x31] sm:$0xff] %vm225_vm0, %v3741_v3  ;;  %v3711_v38 = vadd.f32 %v11323_v55, %v3529_v35 }
 0x2f3   : > { %v3744_v34 = vmax.f32 %v3712_v5, 0.0 }
 0x2f4   : > { %v3743_v37 = vmax.f32 %v3711_v38, 0.0  ;;  %v9281_v6 = vpop.f32.mrb[6].mxu0  ;;  %v11343_v40 = vld [vmem:[#allocation2 + $0x21] sm:$0xff] }
 0x2f5   : > { %3777 = vst.msk [vmem:[#allocation2 + $0x51] sm:$0xff] %vm225_vm0, %v3744_v34  ;;  %v3714_v33 = vadd.f32 %v9281_v6, %v11323_v55  ;;  %v3539_v31 = vpop.f32.mrb[7].mxu0  ;;  %v11337_v39 = vld [vmem:[#allocation2 + $0x19] sm:$0xff] }
 0x2f6   : > { %3776 = vst.msk [vmem:[#allocation2 + $0x49] sm:$0xff] %vm225_vm0, %v3743_v37  ;;  %v3713_v4 = vadd.f32 %v11323_v55, %v3539_v31  ;;  %9323 = vmatprep.mubr.msk.f32.mxu1 %vm225_vm0, %v11337_v39 }
 0x2f7   : > { %v3746_v41 = vmax.f32 %v3714_v33, 0.0  ;;  %9324 = vmatmul.mubr.msk.f32.gmra.mrb[2].mxu1 %vm225_vm0, %v11343_v40 }
 0x2f8   : > { %v3745_v42 = vmax.f32 %v3713_v4, 0.0  ;;  %v9284_v7 = vpop.f32.mrb[8].mxu0  ;;  %v11355_v12 = vld [vmem:[#allocation2 + $0x39] sm:$0xff] }
 0x2f9   : > { %3779 = vst.msk [vmem:[#allocation2 + $0x69] sm:$0xff] %vm225_vm0, %v3746_v41  ;;  %v3716_v8 = vadd.f32 %v9284_v7, %v11323_v55  ;;  %v3549_v9 = vpop.f32.mrb[9].mxu0  ;;  %v11349_v10 = vld [vmem:[#allocation2 + $0x31] sm:$0xff] }
 0x2fa   : > { %3778 = vst.msk [vmem:[#allocation2 + $0x61] sm:$0xff] %vm225_vm0, %v3745_v42  ;;  %v3715_v11 = vadd.f32 %v11323_v55, %v3549_v9  ;;  %9326 = vmatprep.mubr.msk.f32.mxu1 %vm225_vm0, %v11349_v10 }
 0x2fb   : > { %v3748_v13 = vmax.f32 %v3716_v8, 0.0  ;;  %9327 = vmatmul.mubr.msk.f32.gmra.mrb[4].mxu1 %vm225_vm0, %v11355_v12 }
 0x2fc   : > { %v3747_v14 = vmax.f32 %v3715_v11, 0.0  ;;  %v9287_v15 = vpop.f32.mrb[10].mxu0  ;;  %v11367_v20 = vld [vmem:[#allocation2 + $0x51] sm:$0xff] }
 0x2fd   : > { %3781 = vst.msk [vmem:[#allocation2 + $0x81] sm:$0xff] %vm225_vm0, %v3748_v13  ;;  %v3718_v16 = vadd.f32 %v9287_v15, %v11323_v55  ;;  %v3559_v17 = vpop.f32.mrb[11].mxu0  ;;  %v11361_v18 = vld [vmem:[#allocation2 + $0x49] sm:$0xff] }
 0x2fe   : > { %3780 = vst.msk [vmem:[#allocation2 + $0x79] sm:$0xff] %vm225_vm0, %v3747_v14  ;;  %v3717_v19 = vadd.f32 %v11323_v55, %v3559_v17  ;;  %9329 = vmatprep.mubr.msk.f32.mxu1 %vm225_vm0, %v11361_v18 }
 0x2ff   : > { %v3750_v21 = vmax.f32 %v3718_v16, 0.0  ;;  %9330 = vmatmul.mubr.msk.f32.gmra.mrb[6].mxu1 %vm225_vm0, %v11367_v20 }
 0x300   : > { %v3749_v22 = vmax.f32 %v3717_v19, 0.0  ;;  %v9290_v23 = vpop.f32.mrb[12].mxu0  ;;  %v11379_v44 = vld [vmem:[#allocation2 + $0x69] sm:$0xff] }
 0x301   : > { %3783 = vst.msk [vmem:[#allocation2 + $0x99] sm:$0xff] %vm225_vm0, %v3750_v21  ;;  %v3720_v24 = vadd.f32 %v9290_v23, %v11323_v55  ;;  %v3569_v25 = vpop.f32.mrb[13].mxu0  ;;  %v11373_v26 = vld [vmem:[#allocation2 + $0x61] sm:$0xff] }
 0x302   : > { %3782 = vst.msk [vmem:[#allocation2 + $0x91] sm:$0xff] %vm225_vm0, %v3749_v22  ;;  %v3719_v43 = vadd.f32 %v11323_v55, %v3569_v25  ;;  %9332 = vmatprep.mubr.msk.f32.mxu1 %vm225_vm0, %v11373_v26 }
 0x303   : > { %v3752_v45 = vmax.f32 %v3720_v24, 0.0  ;;  %9333 = vmatmul.mubr.msk.f32.gmra.mrb[8].mxu1 %vm225_vm0, %v11379_v44 }
 0x304   : > { %v3751_v46 = vmax.f32 %v3719_v43, 0.0  ;;  %v9293_v28 = vpop.f32.mrb[14].mxu0  ;;  %v11391_v29 = vld [vmem:[#allocation2 + $0x81] sm:$0xff] }
 0x305   : > { %3785 = vst.msk [vmem:[#allocation2 + $0xb1] sm:$0xff] %vm225_vm0, %v3752_v45  ;;  %v3722_v47 = vadd.f32 %v9293_v28, %v11323_v55  ;;  %v3579_v48 = vpop.f32.mrb[15].mxu0  ;;  %v11385_v49 = vld [vmem:[#allocation2 + $0x79] sm:$0xff] }
 0x306   : > { %3784 = vst.msk [vmem:[#allocation2 + $0xa9] sm:$0xff] %vm225_vm0, %v3751_v46  ;;  %v3721_v27 = vadd.f32 %v11323_v55, %v3579_v48  ;;  %9335 = vmatprep.mubr.msk.f32.mxu1 %vm225_vm0, %v11385_v49 }
 0x307   : > { %v3754_v30 = vmax.f32 %v3722_v47, 0.0  ;;  %9336 = vmatmul.mubr.msk.f32.gmra.mrb[10].mxu1 %vm225_vm0, %v11391_v29 }
 0x308   : > { %v3753_v32 = vmax.f32 %v3721_v27, 0.0  ;;  %v9296_v50 = vpop.f32.mrb[16].mxu0  ;;  %v11403_v57 = vld [vmem:[#allocation2 + $0x99] sm:$0xff] }
 0x309   : > { %3787 = vst.msk [vmem:[#allocation2 + $0xc9] sm:$0xff] %vm225_vm0, %v3754_v30  ;;  %v3724_v51 = vadd.f32 %v9296_v50, %v11323_v55  ;;  %v3589_v52 = vpop.f32.mrb[17].mxu0  ;;  %v11397_v53 = vld [vmem:[#allocation2 + $0x91] sm:$0xff] }
 0x30a   : > { %3786 = vst.msk [vmem:[#allocation2 + $0xc1] sm:$0xff] %vm225_vm0, %v3753_v32  ;;  %v3723_v56 = vadd.f32 %v11323_v55, %v3589_v52  ;;  %9338 = vmatprep.mubr.msk.f32.mxu1 %vm225_vm0, %v11397_v53 }
 0x30b   : > { %v3756_v58 = vmax.f32 %v3724_v51, 0.0  ;;  %9339 = vmatmul.mubr.msk.f32.gmra.mrb[12].mxu1 %vm225_vm0, %v11403_v57 }
 0x30c   : > { %v3755_v59 = vmax.f32 %v3723_v56, 0.0  ;;  %v9299_v60 = vpop.f32.mrb[18].mxu0  ;;  %v11415_v1 = vld [vmem:[#allocation2 + $0xb1] sm:$0xff] }
 0x30d   : > { %3789 = vst.msk [vmem:[#allocation2 + $0xe1] sm:$0xff] %vm225_vm0, %v3756_v58  ;;  %v3726_v61 = vadd.f32 %v9299_v60, %v11323_v55  ;;  %v3599_v62 = vpop.f32.mrb[19].mxu0  ;;  %v11409_v63 = vld [vmem:[#allocation2 + $0xa9] sm:$0xff] }
 0x30e   : > { %3788 = vst.msk [vmem:[#allocation2 + $0xd9] sm:$0xff] %vm225_vm0, %v3755_v59  ;;  %v3725_v0 = vadd.f32 %v11323_v55, %v3599_v62  ;;  %9341 = vmatprep.mubr.msk.f32.mxu1 %vm225_vm0, %v11409_v63 }
 0x30f   : > { %v3758_v2 = vmax.f32 %v3726_v61, 0.0  ;;  %9342 = vmatmul.mubr.msk.f32.gmra.mrb[14].mxu1 %vm225_vm0, %v11415_v1 }
 0x310   : > { %v3757_v3 = vmax.f32 %v3725_v0, 0.0  ;;  %v9302_v36 = vpop.f32.mrb[20].mxu0  ;;  %v11427_v37 = vld [vmem:[#allocation2 + $0xc9] sm:$0xff] }
 0x311   : > { %3791 = vst.msk [vmem:[#allocation2 + $0xf9] sm:$0xff] %vm225_vm0, %v3758_v2  ;;  %v3728_v5 = vadd.f32 %v9302_v36, %v11323_v55  ;;  %v3609_v35 = vpop.f32.mrb[21].mxu0  ;;  %v11421_v38 = vld [vmem:[#allocation2 + $0xc1] sm:$0xff] }
 0x312   : > { %3790 = vst.msk [vmem:[#allocation2 + $0xf1] sm:$0xff] %vm225_vm0, %v3757_v3  ;;  %v3727_v34 = vadd.f32 %v11323_v55, %v3609_v35  ;;  %9344 = vmatprep.mubr.msk.f32.mxu1 %vm225_vm0, %v11421_v38  ;;  %v3804_v35 = vld [vmem:[#allocation2] sm:$0xff] }
 0x313   : > { %v3760_v6 = vmax.f32 %v3728_v5, 0.0  ;;  %9345 = vmatmul.mubr.msk.f32.gmra.mrb[16].mxu1 %vm225_vm0, %v11427_v37 }
 0x314   : > { %v3759_v33 = vmax.f32 %v3727_v34, 0.0  ;;  %v9305_v31 = vpop.f32.mrb[22].mxu0  ;;  %v11439_v8 = vld [vmem:[#allocation2 + $0xe1] sm:$0xff] }
 0x315   : > { %3793 = vst.msk [vmem:[#allocation2 + $0x111] sm:$0xff] %vm225_vm0, %v3760_v6  ;;  %v3730_v4 = vadd.f32 %v9305_v31, %v11323_v55  ;;  %v3619_v41 = vpop.f32.mrb[23].mxu0  ;;  %v11433_v42 = vld [vmem:[#allocation2 + $0xd9] sm:$0xff]  ;;  %v3805_v6 = vld [vmem:[#allocation2 + $0x8] sm:$0xff] }
 0x316   : > { %3792 = vst.msk [vmem:[#allocation2 + $0x109] sm:$0xff] %vm225_vm0, %v3759_v33  ;;  %v3729_v7 = vadd.f32 %v11323_v55, %v3619_v41  ;;  %9347 = vmatprep.mubr.msk.f32.mxu1 %vm225_vm0, %v11433_v42  ;;  %v11513_v33 = vld [vmem:[%s12305_s3 + $0x18] sm:$0xff]  ;;  %v11526_v41 = vld [vmem:[#allocation2 + $0x30] sm:$0xff] }
 0x317   : > { %v3762_v9 = vmax.f32 %v3730_v4, 0.0  ;;  %9348 = vmatmul.mubr.msk.f32.gmra.mrb[18].mxu1 %vm225_vm0, %v11439_v8  ;;  %v11516_v31 = vld [vmem:[#allocation2 + $0x18] sm:$0xff]  ;;  %v11522_v4 = vld [vmem:[#allocation2 + $0x20] sm:$0xff] }
 0x318   : > { %v3761_v11 = vmax.f32 %v3729_v7, 0.0  ;;  %v9308_v13 = vpop.f32.mrb[24].mxu0  ;;  %v11451_v19 = vld [vmem:[#allocation2 + $0xf9] sm:$0xff] }
 0x319   : > { %3795 = vst.msk [vmem:[#allocation2 + $0x129] sm:$0xff] %vm225_vm0, %v3762_v9  ;;  %v3732_v14 = vadd.f32 %v9308_v13, %v11323_v55  ;;  %v3629_v15 = vpop.f32.mrb[25].mxu0  ;;  %v11445_v16 = vld [vmem:[#allocation2 + $0xf1] sm:$0xff]  ;;  %v11546_v13 = vld [vmem:[#allocation2 + $0x68] sm:$0xff] }
 0x31a   : > { %3794 = vst.msk [vmem:[#allocation2 + $0x121] sm:$0xff] %vm225_vm0, %v3761_v11  ;;  %v3731_v17 = vadd.f32 %v11323_v55, %v3629_v15  ;;  %9350 = vmatprep.mubr.msk.f32.mxu1 %vm225_vm0, %v11445_v16  ;;  %v11530_v7 = vld [vmem:[#allocation2 + $0x38] sm:$0xff]  ;;  %v11538_v9 = vld [vmem:[#allocation2 + $0x50] sm:$0xff]  ;;  %v11542_v11 = vld [vmem:[#allocation2 + $0x60] sm:$0xff] }
 0x31b   : > { %v3764_v21 = vmax.f32 %v3732_v14, 0.0  ;;  %9351 = vmatmul.mubr.msk.f32.gmra.mrb[20].mxu1 %vm225_vm0, %v11451_v19  ;;  %v11550_v14 = vld [vmem:[#allocation2 + $0x78] sm:$0xff]  ;;  %v11554_v15 = vld [vmem:[#allocation2 + $0x80] sm:$0xff] }
 0x31c   : > { %v3763_v22 = vmax.f32 %v3731_v17, 0.0  ;;  %v9311_v23 = vpop.f32.mrb[26].mxu0  ;;  %v11463_v46 = vld [vmem:[#allocation2 + $0x111] sm:$0xff] }
 0x31d   : > { %3797 = vst.msk [vmem:[#allocation2 + $0x141] sm:$0xff] %vm225_vm0, %v3764_v21  ;;  %v3734_v24 = vadd.f32 %v9311_v23, %v11323_v55  ;;  %v3639_v25 = vpop.f32.mrb[27].mxu0  ;;  %v11457_v43 = vld [vmem:[#allocation2 + $0x109] sm:$0xff]  ;;  %v11562_v21 = vld [vmem:[#allocation2 + $0x98] sm:$0xff] }
 0x31e   : > { %3796 = vst.msk [vmem:[#allocation2 + $0x139] sm:$0xff] %vm225_vm0, %v3763_v22  ;;  %v3733_v45 = vadd.f32 %v11323_v55, %v3639_v25  ;;  %9353 = vmatprep.mubr.msk.f32.mxu1 %vm225_vm0, %v11457_v43  ;;  %v11558_v17 = vld [vmem:[#allocation2 + $0x90] sm:$0xff]  ;;  %v11566_v22 = vld [vmem:[#allocation2 + $0xa8] sm:$0xff] }
 0x31f   : > { %v3766_v28 = vmax.f32 %v3734_v24, 0.0  ;;  %9354 = vmatmul.mubr.msk.f32.gmra.mrb[22].mxu1 %vm225_vm0, %v11463_v46  ;;  %v11570_v23 = vld [vmem:[#allocation2 + $0xb0] sm:$0xff]  ;;  %v11574_v24 = vld [vmem:[#allocation2 + $0xc0] sm:$0xff]  ;;  %v11578_v25 = vld [vmem:[#allocation2 + $0xc8] sm:$0xff] }
 0x320   : > { %v3765_v47 = vmax.f32 %v3733_v45, 0.0  ;;  %v9314_v48 = vpop.f32.mrb[28].mxu0  ;;  %v11475_v51 = vld [vmem:[#allocation2 + $0x129] sm:$0xff]  ;;  %v11582_v45 = vld [vmem:[#allocation2 + $0xd8] sm:$0xff] }
 0x321   : > { %3799 = vst.msk [vmem:[#allocation2 + $0x159] sm:$0xff] %vm225_vm0, %v3766_v28  ;;  %v3736_v27 = vadd.f32 %v9314_v48, %v11323_v55  ;;  %v3649_v30 = vpop.f32.mrb[29].mxu0  ;;  %v11469_v32 = vld [vmem:[#allocation2 + $0x121] sm:$0xff]  ;;  %v11594_v48 = vld [vmem:[#allocation2 + $0xf8] sm:$0xff] }
 0x322   : > { %3798 = vst.msk [vmem:[#allocation2 + $0x151] sm:$0xff] %vm225_vm0, %v3765_v47  ;;  %v3735_v50 = vadd.f32 %v11323_v55, %v3649_v30  ;;  %9356 = vmatprep.mubr.msk.f32.mxu1 %vm225_vm0, %v11469_v32  ;;  %v11586_v28 = vld [vmem:[#allocation2 + $0xe0] sm:$0xff]  ;;  %v11590_v47 = vld [vmem:[#allocation2 + $0xf0] sm:$0xff] }
 0x323   : > { %v3768_v52 = vmax.f32 %v3736_v27, 0.0  ;;  %9357 = vmatmul.mubr.msk.f32.gmra.mrb[24].mxu1 %vm225_vm0, %v11475_v51  ;;  %v11598_v27 = vld [vmem:[#allocation2 + $0x108] sm:$0xff]  ;;  %v11602_v30 = vld [vmem:[#allocation2 + $0x110] sm:$0xff] }
 0x324   : > { %v3767_v56 = vmax.f32 %v3735_v50, 0.0  ;;  %v9317_v58 = vpop.f32.mrb[30].mxu0  ;;  %v11487_v0 = vld [vmem:[#allocation2 + $0x141] sm:$0xff] }
 0x325   : > { %3801 = vst.msk [vmem:[#allocation2 + $0x171] sm:$0xff] %vm225_vm0, %v3768_v52  ;;  %v3738_v59 = vadd.f32 %v9317_v58, %v11323_v55  ;;  %v3659_v60 = vpop.f32.mrb[31].mxu0  ;;  %v11481_v61 = vld [vmem:[#allocation2 + $0x139] sm:$0xff]  ;;  %v11610_v52 = vld [vmem:[#allocation2 + $0x128] sm:$0xff] }
 0x326   : > { %3800 = vst.msk [vmem:[#allocation2 + $0x169] sm:$0xff] %vm225_vm0, %v3767_v56  ;;  %v3737_v62 = vadd.f32 %v11323_v55, %v3659_v60  ;;  %9359 = vmatprep.mubr.msk.f32.mxu1 %vm225_vm0, %v11481_v61  ;;  %v11606_v50 = vld [vmem:[#allocation2 + $0x120] sm:$0xff]  ;;  %v11614_v56 = vld [vmem:[#allocation2 + $0x138] sm:$0xff] }
 0x327   : > { %v3770_v2 = vmax.f32 %v3738_v59, 0.0  ;;  %9360 = vmatmul.mubr.msk.f32.gmra.mrb[26].mxu1 %vm225_vm0, %v11487_v0  ;;  %v11618_v58 = vld [vmem:[#allocation2 + $0x140] sm:$0xff] }
 0x328   : > { %v3769_v3 = vmax.f32 %v3737_v62, 0.0  ;;  %v11497_v55 = vld [vmem:[#allocation2 + $0x159] sm:$0xff] }
 0x329   : > { %3803 = vst.msk [vmem:[#allocation2 + $0x189] sm:$0xff] %vm225_vm0, %v3770_v2  ;;  %v11492_v36 = vld [vmem:[#allocation2 + $0x151] sm:$0xff]  ;;  %v4513_v2 = vld [vmem:[#allocation2 + $0x2] sm:$0xff] }
 0x32a   : > { %3802 = vst.msk [vmem:[#allocation2 + $0x181] sm:$0xff] %vm225_vm0, %v3769_v3  ;;  %9362 = vmatprep.mubr.msk.f32.mxu1 %vm225_vm0, %v11492_v36  ;;  %v11622_v59 = vld [vmem:[#allocation2 + $0x150] sm:$0xff]  ;;  %v11626_v60 = vld [vmem:[#allocation2 + $0x158] sm:$0xff] }
 0x32b   : > { %9363 = vmatmul.mubr.msk.f32.gmra.mrb[28].mxu1 %vm225_vm0, %v11497_v55 }
 0x32c   : > { %v11505_v34 = vld [vmem:[#allocation2 + $0x171] sm:$0xff] }
 0x32d   : > { %v11501_v5 = vld [vmem:[#allocation2 + $0x169] sm:$0xff]  ;;  %12518 = vst [vmem:[#allocation12_spill] sm:$0xff] %v11505_v34 }
 0x32e   : > { %12517 = vst [vmem:[#allocation11_spill] sm:$0xff] %v11501_v5  ;;  %9365 = vmatprep.mubr.msk.f32.mxu1 %vm225_vm0, %v11501_v5  ;;  %v11630_v62 = vld [vmem:[#allocation2 + $0x168] sm:$0xff]  ;;  %v11634_v3 = vld [vmem:[#allocation2 + $0x170] sm:$0xff] }
 0x32f   : > { %9366 = vmatmul.mubr.msk.f32.gmra.mrb[30].mxu1 %vm225_vm0, %v11505_v34  ;;  %v11645_v34 = vld [vmem:[#allocation2 + $0x1a] sm:$0xff]  ;;  %v11651_v5 = vld [vmem:[#allocation2 + $0x22] sm:$0xff] }
 0x330   : > { %9370 = vmatprep.mubr.msk.f32.mxu1 %vm225_vm0, %v3804_v35  ;;  %v4514_v35 = vld [vmem:[#allocation2 + $0xa] sm:$0xff]  ;;  %12519 = vst [vmem:[#allocation18_spill] sm:$0xff] %v11645_v34  ;;  %12520 = vst [vmem:[#allocation28_spill] sm:$0xff] %v11651_v5 }
 0x333   : > { %9371 = vmatmul.mubr.msk.f32.vlgmr.msra.gmra.mrb[0].mxu1 %vm225_vm0, %v3805_v6  ;;  %v11642_v6 = vld [vmem:[%s12305_s3 + $0x20] sm:$0xff] }
 0x334   : > { %9419 = vmatpush3.msra.mxu1 %v11317_v54  ;;  %9373 = vmatprep.mubr.msk.f32.mxu1 %vm225_vm0, %v11516_v31  ;;  %v11534_v54 = vld [vmem:[#allocation2 + $0x48] sm:$0xff] }
 0x335   : > { %9468 = vmatprep.subr.mxu1 %v11513_v33 }
 0x337   : > { %9374 = vmatmul.mubr.msk.f32.gmra.mrb[2].mxu1 %vm225_vm0, %v11522_v4 }
 0x338   : > { %9376 = vmatprep.mubr.msk.f32.mxu1 %vm225_vm0, %v11526_v41 }
 0x33b   : > { %9377 = vmatmul.mubr.msk.f32.gmra.mrb[4].mxu1 %vm225_vm0, %v11530_v7 }
 0x33c   : > { %9379 = vmatprep.mubr.msk.f32.mxu1 %vm225_vm0, %v11534_v54 }
 0x33f   : > { %9380 = vmatmul.mubr.msk.f32.gmra.mrb[6].mxu1 %vm225_vm0, %v11538_v9 }
 0x340   : > { %9382 = vmatprep.mubr.msk.f32.mxu1 %vm225_vm0, %v11542_v11 }
 0x343   : > { %9383 = vmatmul.mubr.msk.f32.gmra.mrb[8].mxu1 %vm225_vm0, %v11546_v13 }
 0x344   : > { %9385 = vmatprep.mubr.msk.f32.mxu1 %vm225_vm0, %v11550_v14 }
 0x347   : > { %9386 = vmatmul.mubr.msk.f32.gmra.mrb[10].mxu1 %vm225_vm0, %v11554_v15 }
 0x348   : > { %9388 = vmatprep.mubr.msk.f32.mxu1 %vm225_vm0, %v11558_v17 }
 0x34b   : > { %9389 = vmatmul.mubr.msk.f32.gmra.mrb[12].mxu1 %vm225_vm0, %v11562_v21 }
 0x34c   : > { %9391 = vmatprep.mubr.msk.f32.mxu1 %vm225_vm0, %v11566_v22 }
 0x34f   : > { %9392 = vmatmul.mubr.msk.f32.gmra.mrb[14].mxu1 %vm225_vm0, %v11570_v23 }
 0x350   : > { %9394 = vmatprep.mubr.msk.f32.mxu1 %vm225_vm0, %v11574_v24 }
 0x353   : > { %9395 = vmatmul.mubr.msk.f32.gmra.mrb[16].mxu1 %vm225_vm0, %v11578_v25 }
 0x354   : > { %9397 = vmatprep.mubr.msk.f32.mxu1 %vm225_vm0, %v11582_v45 }
 0x357   : > { %9398 = vmatmul.mubr.msk.f32.gmra.mrb[18].mxu1 %vm225_vm0, %v11586_v28 }
 0x358   : > { %9400 = vmatprep.mubr.msk.f32.mxu1 %vm225_vm0, %v11590_v47 }
 0x35b   : > { %9401 = vmatmul.mubr.msk.f32.gmra.mrb[20].mxu1 %vm225_vm0, %v11594_v48 }
 0x35c   : > { %9403 = vmatprep.mubr.msk.f32.mxu1 %vm225_vm0, %v11598_v27 }
 0x35f   : > { %9404 = vmatmul.mubr.msk.f32.gmra.mrb[22].mxu1 %vm225_vm0, %v11602_v30 }
 0x360   : > { %9406 = vmatprep.mubr.msk.f32.mxu1 %vm225_vm0, %v11606_v50 }
 0x363   : > { %9407 = vmatmul.mubr.msk.f32.gmra.mrb[24].mxu1 %vm225_vm0, %v11610_v52 }
 0x364   : > { %9409 = vmatprep.mubr.msk.f32.mxu1 %vm225_vm0, %v11614_v56 }
 0x367   : > { %9410 = vmatmul.mubr.msk.f32.gmra.mrb[26].mxu1 %vm225_vm0, %v11618_v58 }
 0x368   : > { %9412 = vmatprep.mubr.msk.f32.mxu1 %vm225_vm0, %v11622_v59 }
 0x36b   : > { %9413 = vmatmul.mubr.msk.f32.gmra.mrb[28].mxu1 %vm225_vm0, %v11626_v60 }
 0x36c   : > { %9415 = vmatprep.mubr.msk.f32.mxu1 %vm225_vm0, %v11630_v62 }
 0x36f   : > { %9416 = vmatmul.mubr.msk.f32.gmra.mrb[30].mxu1 %vm225_vm0, %v11634_v3 }
 0x370   : > { %9420 = vmatprep.mubr.msk.f32.mxu1 %vm225_vm0, %v4513_v2  ;;  %v11655_v2 = vld [vmem:[#allocation2 + $0x32] sm:$0xff] }
 0x371   : > { %12521 = vst [vmem:[#allocation30_spill] sm:$0xff] %v11655_v2 }
 0x373   : > { %9421 = vmatmul.mubr.msk.f32.vlgmr.msra.gmra.mrb[0].mxu1 %vm225_vm0, %v4514_v35  ;;  %v11659_v35 = vld [vmem:[#allocation2 + $0x3a] sm:$0xff] }
 0x374   : > { %9469 = vmatpush3.msra.mxu1 %v11513_v33  ;;  %9423 = vmatprep.mubr.msk.f32.mxu1 %vm225_vm0, %v11645_v34  ;;  %12522 = vst [vmem:[#allocation31_spill] sm:$0xff] %v11659_v35  ;;  %v11663_v33 = vld [vmem:[#allocation2 + $0x4a] sm:$0xff]  ;;  %v11667_v34 = vld [vmem:[#allocation2 + $0x52] sm:$0xff] }
 0x375   : > { %9518 = vmatprep.subr.mxu1 %v11642_v6  ;;  %12523 = vst [vmem:[#allocation33_spill] sm:$0xff] %v11663_v33  ;;  %12524 = vst [vmem:[#allocation35_spill] sm:$0xff] %v11667_v34 }
 0x377   : > { %9424 = vmatmul.mubr.msk.f32.gmra.mrb[2].mxu1 %vm225_vm0, %v11651_v5  ;;  %v11671_v5 = vld [vmem:[#allocation2 + $0x62] sm:$0xff] }
 0x378   : > { %9426 = vmatprep.mubr.msk.f32.mxu1 %vm225_vm0, %v11655_v2  ;;  %12525 = vst [vmem:[#allocation3_spill] sm:$0xff] %v11671_v5  ;;  %v11675_v2 = vld [vmem:[#allocation2 + $0x6a] sm:$0xff] }
 0x379   : > { %12526 = vst [vmem:[#allocation4_spill] sm:$0xff] %v11675_v2 }
 0x37b   : > { %9427 = vmatmul.mubr.msk.f32.gmra.mrb[4].mxu1 %vm225_vm0, %v11659_v35  ;;  %v11679_v35 = vld [vmem:[#allocation2 + $0x7a] sm:$0xff] }
 0x37c   : > { %9429 = vmatprep.mubr.msk.f32.mxu1 %vm225_vm0, %v11663_v33  ;;  %12527 = vst [vmem:[#allocation5_spill] sm:$0xff] %v11679_v35  ;;  %v11683_v33 = vld [vmem:[#allocation2 + $0x82] sm:$0xff] }
 0x37d   : > { %12528 = vst [vmem:[#allocation6_spill] sm:$0xff] %v11683_v33 }
 0x37f   : > { %9430 = vmatmul.mubr.msk.f32.gmra.mrb[6].mxu1 %vm225_vm0, %v11667_v34  ;;  %v11687_v34 = vld [vmem:[#allocation2 + $0x92] sm:$0xff] }
 0x380   : > { %9432 = vmatprep.mubr.msk.f32.mxu1 %vm225_vm0, %v11671_v5  ;;  %12529 = vst [vmem:[#allocation7_spill] sm:$0xff] %v11687_v34  ;;  %v11691_v5 = vld [vmem:[#allocation2 + $0x9a] sm:$0xff] }
 0x381   : > { %12530 = vst [vmem:[#allocation8_spill] sm:$0xff] %v11691_v5 }
 0x383   : > { %9433 = vmatmul.mubr.msk.f32.gmra.mrb[8].mxu1 %vm225_vm0, %v11675_v2  ;;  %v11695_v2 = vld [vmem:[#allocation2 + $0xaa] sm:$0xff] }
 0x384   : > { %9435 = vmatprep.mubr.msk.f32.mxu1 %vm225_vm0, %v11679_v35  ;;  %12531 = vst [vmem:[#allocation9_spill] sm:$0xff] %v11695_v2  ;;  %v11699_v35 = vld [vmem:[#allocation2 + $0xb2] sm:$0xff] }
 0x385   : > { %12532 = vst [vmem:[#allocation10_spill] sm:$0xff] %v11699_v35 }
 0x387   : > { %9436 = vmatmul.mubr.msk.f32.gmra.mrb[10].mxu1 %vm225_vm0, %v11683_v33  ;;  %v11703_v33 = vld [vmem:[#allocation2 + $0xc2] sm:$0xff] }
 0x388   : > { %9438 = vmatprep.mubr.msk.f32.mxu1 %vm225_vm0, %v11687_v34  ;;  %12533 = vst [vmem:[#allocation37_spill] sm:$0xff] %v11703_v33  ;;  %v11707_v34 = vld [vmem:[#allocation2 + $0xca] sm:$0xff] }
 0x389   : > { %12534 = vst [vmem:[#allocation38_spill] sm:$0xff] %v11707_v34 }
 0x38b   : > { %9439 = vmatmul.mubr.msk.f32.gmra.mrb[12].mxu1 %vm225_vm0, %v11691_v5  ;;  %v11711_v5 = vld [vmem:[#allocation2 + $0xda] sm:$0xff] }
 0x38c   : > { %9441 = vmatprep.mubr.msk.f32.mxu1 %vm225_vm0, %v11695_v2  ;;  %12535 = vst [vmem:[#allocation13_spill] sm:$0xff] %v11711_v5  ;;  %v11715_v2 = vld [vmem:[#allocation2 + $0xe2] sm:$0xff] }
 0x38d   : > { %12536 = vst [vmem:[#allocation14_spill] sm:$0xff] %v11715_v2 }
 0x38f   : > { %9442 = vmatmul.mubr.msk.f32.gmra.mrb[14].mxu1 %vm225_vm0, %v11699_v35  ;;  %v11719_v35 = vld [vmem:[#allocation2 + $0xf2] sm:$0xff] }
 0x390   : > { %9444 = vmatprep.mubr.msk.f32.mxu1 %vm225_vm0, %v11703_v33  ;;  %12537 = vst [vmem:[#allocation15_spill] sm:$0xff] %v11719_v35  ;;  %v11723_v33 = vld [vmem:[#allocation2 + $0xfa] sm:$0xff] }
 0x391   : > { %12538 = vst [vmem:[#allocation16_spill] sm:$0xff] %v11723_v33 }
 0x393   : > { %9445 = vmatmul.mubr.msk.f32.gmra.mrb[16].mxu1 %vm225_vm0, %v11707_v34  ;;  %v11727_v34 = vld [vmem:[#allocation2 + $0x10a] sm:$0xff] }
 0x394   : > { %9447 = vmatprep.mubr.msk.f32.mxu1 %vm225_vm0, %v11711_v5  ;;  %12539 = vst [vmem:[#allocation17_spill] sm:$0xff] %v11727_v34  ;;  %v11731_v5 = vld [vmem:[#allocation2 + $0x112] sm:$0xff] }
 0x395   : > { %12540 = vst [vmem:[#allocation19_spill] sm:$0xff] %v11731_v5 }
 0x397   : > { %9448 = vmatmul.mubr.msk.f32.gmra.mrb[18].mxu1 %vm225_vm0, %v11715_v2  ;;  %v11735_v2 = vld [vmem:[#allocation2 + $0x122] sm:$0xff] }
 0x398   : > { %9450 = vmatprep.mubr.msk.f32.mxu1 %vm225_vm0, %v11719_v35  ;;  %12541 = vst [vmem:[#allocation20_spill] sm:$0xff] %v11735_v2  ;;  %v11739_v35 = vld [vmem:[#allocation2 + $0x12a] sm:$0xff] }
 0x399   : > { %12542 = vst [vmem:[#allocation21_spill] sm:$0xff] %v11739_v35 }
 0x39b   : > { %9451 = vmatmul.mubr.msk.f32.gmra.mrb[20].mxu1 %vm225_vm0, %v11723_v33  ;;  %v11743_v33 = vld [vmem:[#allocation2 + $0x13a] sm:$0xff] }
 0x39c   : > { %9453 = vmatprep.mubr.msk.f32.mxu1 %vm225_vm0, %v11727_v34  ;;  %12543 = vst [vmem:[#allocation22_spill] sm:$0xff] %v11743_v33  ;;  %v11747_v34 = vld [vmem:[#allocation2 + $0x142] sm:$0xff] }
 0x39f   : > { %9454 = vmatmul.mubr.msk.f32.gmra.mrb[22].mxu1 %vm225_vm0, %v11731_v5  ;;  %v11751_v5 = vld [vmem:[#allocation2 + $0x152] sm:$0xff] }
 0x3a0   : > { %9456 = vmatprep.mubr.msk.f32.mxu1 %vm225_vm0, %v11735_v2  ;;  %12544 = vst [vmem:[#allocation23_spill] sm:$0xff] %v11751_v5  ;;  %v11755_v2 = vld [vmem:[#allocation2 + $0x15a] sm:$0xff] }
 0x3a3   : > { %9457 = vmatmul.mubr.msk.f32.gmra.mrb[24].mxu1 %vm225_vm0, %v11739_v35  ;;  %v11759_v35 = vld [vmem:[#allocation2 + $0x16a] sm:$0xff] }
 0x3a4   : > { %9459 = vmatprep.mubr.msk.f32.mxu1 %vm225_vm0, %v11743_v33  ;;  %12545 = vst [vmem:[#allocation24_spill] sm:$0xff] %v11759_v35  ;;  %v11763_v33 = vld [vmem:[#allocation2 + $0x172] sm:$0xff] }
 0x3a7   : > { %9460 = vmatmul.mubr.msk.f32.gmra.mrb[26].mxu1 %vm225_vm0, %v11747_v34 }
 0x3a8   : > { %9462 = vmatprep.mubr.msk.f32.mxu1 %vm225_vm0, %v11751_v5  ;;  %v8106_v5 = vld [vmem:[%s12305_s3 + $0x28] sm:$0xff] }
 0x3ab   : > { %9463 = vmatmul.mubr.msk.f32.gmra.mrb[28].mxu1 %vm225_vm0, %v11755_v2 }
 0x3ac   : > { %9465 = vmatprep.mubr.msk.f32.mxu1 %vm225_vm0, %v11759_v35 }
 0x3af   : > { %9466 = vmatmul.mubr.msk.f32.gmra.mrb[30].mxu1 %vm225_vm0, %v11763_v33 }
 0x3b0   : > { %9470 = vmatprep.mubr.msk.f32.mxu1 %vm225_vm0, %v11516_v31  ;;  %v11831_v31 = vld [vmem:[#allocation2 + $0x180] sm:$0xff] }
 0x3b3   : > { %9471 = vmatmul.mubr.msk.f32.vlgmr.msra.gmra.mrb[0].mxu1 %vm225_vm0, %v11522_v4  ;;  %v11835_v4 = vld [vmem:[#allocation2 + $0x188] sm:$0xff] }
 0x3b4   : > { %9519 = vmatpush3.msra.mxu1 %v11642_v6  ;;  %9473 = vmatprep.mubr.msk.f32.mxu1 %vm225_vm0, %v11526_v41  ;;  %v8139_v6 = vld [vmem:[%s12305_s3 + $0x30] sm:$0xff] }
 0x3b5   : > { %9568 = vmatprep.subr.mxu1 %v8106_v5 }
 0x3b7   : > { %9474 = vmatmul.mubr.msk.f32.gmra.mrb[2].mxu1 %vm225_vm0, %v11530_v7 }
 0x3b8   : > { %9476 = vmatprep.mubr.msk.f32.mxu1 %vm225_vm0, %v11534_v54 }
 0x3bb   : > { %9477 = vmatmul.mubr.msk.f32.gmra.mrb[4].mxu1 %vm225_vm0, %v11538_v9 }
 0x3bc   : > { %9479 = vmatprep.mubr.msk.f32.mxu1 %vm225_vm0, %v11542_v11 }
 0x3bf   : > { %9480 = vmatmul.mubr.msk.f32.gmra.mrb[6].mxu1 %vm225_vm0, %v11546_v13 }
 0x3c0   : > { %9482 = vmatprep.mubr.msk.f32.mxu1 %vm225_vm0, %v11550_v14 }
 0x3c3   : > { %9483 = vmatmul.mubr.msk.f32.gmra.mrb[8].mxu1 %vm225_vm0, %v11554_v15 }
 0x3c4   : > { %9485 = vmatprep.mubr.msk.f32.mxu1 %vm225_vm0, %v11558_v17 }
 0x3c7   : > { %9486 = vmatmul.mubr.msk.f32.gmra.mrb[10].mxu1 %vm225_vm0, %v11562_v21 }
 0x3c8   : > { %9488 = vmatprep.mubr.msk.f32.mxu1 %vm225_vm0, %v11566_v22 }
 0x3cb   : > { %9489 = vmatmul.mubr.msk.f32.gmra.mrb[12].mxu1 %vm225_vm0, %v11570_v23 }
 0x3cc   : > { %9491 = vmatprep.mubr.msk.f32.mxu1 %vm225_vm0, %v11574_v24 }
 0x3cf   : > { %9492 = vmatmul.mubr.msk.f32.gmra.mrb[14].mxu1 %vm225_vm0, %v11578_v25 }
 0x3d0   : > { %9494 = vmatprep.mubr.msk.f32.mxu1 %vm225_vm0, %v11582_v45 }
 0x3d3   : > { %9495 = vmatmul.mubr.msk.f32.gmra.mrb[16].mxu1 %vm225_vm0, %v11586_v28 }
 0x3d4   : > { %9497 = vmatprep.mubr.msk.f32.mxu1 %vm225_vm0, %v11590_v47 }
 0x3d7   : > { %9498 = vmatmul.mubr.msk.f32.gmra.mrb[18].mxu1 %vm225_vm0, %v11594_v48 }
 0x3d8   : > { %9500 = vmatprep.mubr.msk.f32.mxu1 %vm225_vm0, %v11598_v27 }
 0x3db   : > { %9501 = vmatmul.mubr.msk.f32.gmra.mrb[20].mxu1 %vm225_vm0, %v11602_v30 }
 0x3dc   : > { %9503 = vmatprep.mubr.msk.f32.mxu1 %vm225_vm0, %v11606_v50 }
 0x3df   : > { %9504 = vmatmul.mubr.msk.f32.gmra.mrb[22].mxu1 %vm225_vm0, %v11610_v52 }
 0x3e0   : > { %9506 = vmatprep.mubr.msk.f32.mxu1 %vm225_vm0, %v11614_v56 }
 0x3e3   : > { %9507 = vmatmul.mubr.msk.f32.gmra.mrb[24].mxu1 %vm225_vm0, %v11618_v58 }
 0x3e4   : > { %9509 = vmatprep.mubr.msk.f32.mxu1 %vm225_vm0, %v11622_v59 }
 0x3e7   : > { %9510 = vmatmul.mubr.msk.f32.gmra.mrb[26].mxu1 %vm225_vm0, %v11626_v60 }
 0x3e8   : > { %9512 = vmatprep.mubr.msk.f32.mxu1 %vm225_vm0, %v11630_v62 }
 0x3eb   : > { %9513 = vmatmul.mubr.msk.f32.gmra.mrb[28].mxu1 %vm225_vm0, %v11634_v3 }
 0x3ec   : > { %9515 = vmatprep.mubr.msk.f32.mxu1 %vm225_vm0, %v11831_v31 }
 0x3ef   : > { %9516 = vmatmul.mubr.msk.f32.gmra.mrb[30].mxu1 %vm225_vm0, %v11835_v4 }
 0x3f0   : > { %9520 = vmatprep.mubr.msk.f32.mxu1 %vm225_vm0, %v11337_v39  ;;  %v12546_v39 = vld [vmem:[#allocation11_spill] sm:$0xff] }
 0x3f3   : > { %9521 = vmatmul.mubr.msk.f32.vlgmr.msra.gmra.mrb[0].mxu1 %vm225_vm0, %v11343_v40  ;;  %v12547_v40 = vld [vmem:[#allocation12_spill] sm:$0xff] }
 0x3f4   : > { %9569 = vmatpush3.msra.mxu1 %v8106_v5  ;;  %9523 = vmatprep.mubr.msk.f32.mxu1 %vm225_vm0, %v11349_v10  ;;  %v11902_v10 = vld [vmem:[#allocation2 + $0x181] sm:$0xff]  ;;  %v12555_v5 = vld [vmem:[#allocation4_spill] sm:$0xff] }
 0x3f5   : > { %9618 = vmatprep.subr.mxu1 %v8139_v6 }
 0x3f7   : > { %9524 = vmatmul.mubr.msk.f32.gmra.mrb[2].mxu1 %vm225_vm0, %v11355_v12  ;;  %v11906_v12 = vld [vmem:[#allocation2 + $0x189] sm:$0xff] }
 0x3f8   : > { %9526 = vmatprep.mubr.msk.f32.mxu1 %vm225_vm0, %v11361_v18  ;;  %v12548_v18 = vld [vmem:[#allocation18_spill] sm:$0xff] }
 0x3fb   : > { %9527 = vmatmul.mubr.msk.f32.gmra.mrb[4].mxu1 %vm225_vm0, %v11367_v20  ;;  %v8172_v20 = vld [vmem:[%s12305_s3 + $0x38] sm:$0xff] }
 0x3fc   : > { %9529 = vmatprep.mubr.msk.f32.mxu1 %vm225_vm0, %v11373_v26  ;;  %v12549_v26 = vld [vmem:[#allocation28_spill] sm:$0xff] }
 0x3ff   : > { %9530 = vmatmul.mubr.msk.f32.gmra.mrb[6].mxu1 %vm225_vm0, %v11379_v44  ;;  %v12550_v44 = vld [vmem:[#allocation30_spill] sm:$0xff] }
 0x400   : > { %9532 = vmatprep.mubr.msk.f32.mxu1 %vm225_vm0, %v11385_v49  ;;  %v12551_v49 = vld [vmem:[#allocation31_spill] sm:$0xff] }
 0x403   : > { %9533 = vmatmul.mubr.msk.f32.gmra.mrb[8].mxu1 %vm225_vm0, %v11391_v29  ;;  %v12552_v29 = vld [vmem:[#allocation33_spill] sm:$0xff] }
 0x404   : > { %9535 = vmatprep.mubr.msk.f32.mxu1 %vm225_vm0, %v11397_v53  ;;  %v12553_v53 = vld [vmem:[#allocation35_spill] sm:$0xff] }
 0x407   : > { %9536 = vmatmul.mubr.msk.f32.gmra.mrb[10].mxu1 %vm225_vm0, %v11403_v57  ;;  %v12554_v57 = vld [vmem:[#allocation3_spill] sm:$0xff] }
 0x408   : > { %9538 = vmatprep.mubr.msk.f32.mxu1 %vm225_vm0, %v11409_v63 }
 0x40b   : > { %9539 = vmatmul.mubr.msk.f32.gmra.mrb[12].mxu1 %vm225_vm0, %v11415_v1 }
 0x40c   : > { %9541 = vmatprep.mubr.msk.f32.mxu1 %vm225_vm0, %v11421_v38 }
 0x40f   : > { %9542 = vmatmul.mubr.msk.f32.gmra.mrb[14].mxu1 %vm225_vm0, %v11427_v37 }
 0x410   : > { %9544 = vmatprep.mubr.msk.f32.mxu1 %vm225_vm0, %v11433_v42 }
 0x413   : > { %9545 = vmatmul.mubr.msk.f32.gmra.mrb[16].mxu1 %vm225_vm0, %v11439_v8 }
 0x414   : > { %9547 = vmatprep.mubr.msk.f32.mxu1 %vm225_vm0, %v11445_v16 }
 0x417   : > { %9548 = vmatmul.mubr.msk.f32.gmra.mrb[18].mxu1 %vm225_vm0, %v11451_v19 }
 0x418   : > { %9550 = vmatprep.mubr.msk.f32.mxu1 %vm225_vm0, %v11457_v43 }
 0x41b   : > { %9551 = vmatmul.mubr.msk.f32.gmra.mrb[20].mxu1 %vm225_vm0, %v11463_v46 }
 0x41c   : > { %9553 = vmatprep.mubr.msk.f32.mxu1 %vm225_vm0, %v11469_v32 }
 0x41f   : > { %9554 = vmatmul.mubr.msk.f32.gmra.mrb[22].mxu1 %vm225_vm0, %v11475_v51 }
 0x420   : > { %9556 = vmatprep.mubr.msk.f32.mxu1 %vm225_vm0, %v11481_v61 }
 0x423   : > { %9557 = vmatmul.mubr.msk.f32.gmra.mrb[24].mxu1 %vm225_vm0, %v11487_v0 }
 0x424   : > { %9559 = vmatprep.mubr.msk.f32.mxu1 %vm225_vm0, %v11492_v36 }
 0x427   : > { %9560 = vmatmul.mubr.msk.f32.gmra.mrb[26].mxu1 %vm225_vm0, %v11497_v55 }
 0x428   : > { %9562 = vmatprep.mubr.msk.f32.mxu1 %vm225_vm0, %v12546_v39 }
 0x42b   : > { %9563 = vmatmul.mubr.msk.f32.gmra.mrb[28].mxu1 %vm225_vm0, %v12547_v40 }
 0x42c   : > { %9565 = vmatprep.mubr.msk.f32.mxu1 %vm225_vm0, %v11902_v10 }
 0x42f   : > { %9566 = vmatmul.mubr.msk.f32.gmra.mrb[30].mxu1 %vm225_vm0, %v11906_v12 }
 0x430   : > { %9570 = vmatprep.mubr.msk.f32.mxu1 %vm225_vm0, %v12548_v18  ;;  %v12557_v18 = vld [vmem:[#allocation6_spill] sm:$0xff] }
 0x433   : > { %9571 = vmatmul.mubr.msk.f32.vlgmr.msra.gmra.mrb[0].mxu1 %vm225_vm0, %v12549_v26  ;;  %v12558_v26 = vld [vmem:[#allocation7_spill] sm:$0xff] }
 0x434   : > { %9619 = vmatpush3.msra.mxu1 %v8139_v6  ;;  %9573 = vmatprep.mubr.msk.f32.mxu1 %vm225_vm0, %v12550_v44  ;;  %v12556_v6 = vld [vmem:[#allocation5_spill] sm:$0xff] }
 0x435   : > { %9668 = vmatprep.subr.mxu1 %v8172_v20 }
 0x437   : > { %9574 = vmatmul.mubr.msk.f32.gmra.mrb[2].mxu1 %vm225_vm0, %v12551_v49  ;;  %v12559_v49 = vld [vmem:[#allocation8_spill] sm:$0xff] }
 0x438   : > { %9576 = vmatprep.mubr.msk.f32.mxu1 %vm225_vm0, %v12552_v29  ;;  %v12560_v29 = vld [vmem:[#allocation9_spill] sm:$0xff] }
 0x43b   : > { %9577 = vmatmul.mubr.msk.f32.gmra.mrb[4].mxu1 %vm225_vm0, %v12553_v53  ;;  %v12561_v53 = vld [vmem:[#allocation10_spill] sm:$0xff] }
 0x43c   : > { %9579 = vmatprep.mubr.msk.f32.mxu1 %vm225_vm0, %v12554_v57  ;;  %v12562_v57 = vld [vmem:[#allocation37_spill] sm:$0xff] }
 0x43f   : > { %9580 = vmatmul.mubr.msk.f32.gmra.mrb[6].mxu1 %vm225_vm0, %v12555_v5  ;;  %v12563_v5 = vld [vmem:[#allocation38_spill] sm:$0xff] }
 0x440   : > { %9582 = vmatprep.mubr.msk.f32.mxu1 %vm225_vm0, %v12556_v6  ;;  %v12564_v6 = vld [vmem:[#allocation13_spill] sm:$0xff] }
 0x443   : > { %9583 = vmatmul.mubr.msk.f32.gmra.mrb[8].mxu1 %vm225_vm0, %v12557_v18  ;;  %v12565_v18 = vld [vmem:[#allocation14_spill] sm:$0xff] }
 0x444   : > { %9585 = vmatprep.mubr.msk.f32.mxu1 %vm225_vm0, %v12558_v26  ;;  %v12566_v26 = vld [vmem:[#allocation15_spill] sm:$0xff] }
 0x447   : > { %9586 = vmatmul.mubr.msk.f32.gmra.mrb[10].mxu1 %vm225_vm0, %v12559_v49  ;;  %v12567_v49 = vld [vmem:[#allocation16_spill] sm:$0xff] }
 0x448   : > { %9588 = vmatprep.mubr.msk.f32.mxu1 %vm225_vm0, %v12560_v29  ;;  %v12568_v29 = vld [vmem:[#allocation17_spill] sm:$0xff] }
 0x44b   : > { %9589 = vmatmul.mubr.msk.f32.gmra.mrb[12].mxu1 %vm225_vm0, %v12561_v53  ;;  %v12569_v53 = vld [vmem:[#allocation19_spill] sm:$0xff] }
 0x44c   : > { %9591 = vmatprep.mubr.msk.f32.mxu1 %vm225_vm0, %v12562_v57  ;;  %v12570_v57 = vld [vmem:[#allocation20_spill] sm:$0xff] }
 0x44f   : > { %9592 = vmatmul.mubr.msk.f32.gmra.mrb[14].mxu1 %vm225_vm0, %v12563_v5  ;;  %v12571_v5 = vld [vmem:[#allocation21_spill] sm:$0xff] }
 0x450   : > { %9594 = vmatprep.mubr.msk.f32.mxu1 %vm225_vm0, %v12564_v6  ;;  %v12572_v6 = vld [vmem:[#allocation22_spill] sm:$0xff] }
 0x453   : > { %9595 = vmatmul.mubr.msk.f32.gmra.mrb[16].mxu1 %vm225_vm0, %v12565_v18 }
 0x454   : > { %9597 = vmatprep.mubr.msk.f32.mxu1 %vm225_vm0, %v12566_v26  ;;  %v12573_v26 = vld [vmem:[#allocation23_spill] sm:$0xff] }
 0x457   : > { %9598 = vmatmul.mubr.msk.f32.gmra.mrb[18].mxu1 %vm225_vm0, %v12567_v49 }
 0x458   : > { %9600 = vmatprep.mubr.msk.f32.mxu1 %vm225_vm0, %v12568_v29 }
 0x45b   : > { %9601 = vmatmul.mubr.msk.f32.gmra.mrb[20].mxu1 %vm225_vm0, %v12569_v53 }
 0x45c   : > { %9603 = vmatprep.mubr.msk.f32.mxu1 %vm225_vm0, %v12570_v57  ;;  %v11973_v57 = vld [vmem:[#allocation2 + $0x182] sm:$0xff] }
 0x45f   : > { %9604 = vmatmul.mubr.msk.f32.gmra.mrb[22].mxu1 %vm225_vm0, %v12571_v5 }
 0x460   : > { %9606 = vmatprep.mubr.msk.f32.mxu1 %vm225_vm0, %v12572_v6  ;;  %v11977_v6 = vld [vmem:[#allocation2 + $0x18a] sm:$0xff] }
 0x463   : > { %9607 = vmatmul.mubr.msk.f32.gmra.mrb[24].mxu1 %vm225_vm0, %v11747_v34 }
 0x464   : > { %9609 = vmatprep.mubr.msk.f32.mxu1 %vm225_vm0, %v12573_v26 }
 0x467   : > { %9610 = vmatmul.mubr.msk.f32.gmra.mrb[26].mxu1 %vm225_vm0, %v11755_v2 }
 0x468   : > { %9612 = vmatprep.mubr.msk.f32.mxu1 %vm225_vm0, %v11759_v35  ;;  %v8205_v35 = vld [vmem:[%s12305_s3 + $0x40] sm:$0xff] }
 0x46b   : > { %9613 = vmatmul.mubr.msk.f32.gmra.mrb[28].mxu1 %vm225_vm0, %v11763_v33 }
 0x46c   : > { %9615 = vmatprep.mubr.msk.f32.mxu1 %vm225_vm0, %v11973_v57 }
 0x46f   : > { %9616 = vmatmul.mubr.msk.f32.gmra.mrb[30].mxu1 %vm225_vm0, %v11977_v6 }
 0x470   : > { %9620 = vmatprep.mubr.msk.f32.mxu1 %vm225_vm0, %v11526_v41  ;;  %v6092_v41 = vld [vmem:[#allocation2 + $0x198] sm:$0xff] }
 0x473   : > { %9621 = vmatmul.mubr.msk.f32.vlgmr.msra.gmra.mrb[0].mxu1 %vm225_vm0, %v11530_v7  ;;  %v6093_v7 = vld [vmem:[#allocation2 + $0x1a0] sm:$0xff] }
 0x474   : > { %9669 = vmatpush3.msra.mxu1 %v8172_v20  ;;  %9623 = vmatprep.mubr.msk.f32.mxu1 %vm225_vm0, %v11534_v54  ;;  %v6449_v54 = vld [vmem:[#allocation2 + $0x31] sm:$0xff] }
 0x475   : > { %9718 = vmatprep.subr.mxu1 %v8205_v35  ;;  %v8244_v20 = vld [vmem:[%s10349_s27 + $0x51] sm:$0xff] }
 0x477   : > { %9624 = vmatmul.mubr.msk.f32.gmra.mrb[2].mxu1 %vm225_vm0, %v11538_v9  ;;  %v6450_v9 = vld [vmem:[#allocation2 + $0x39] sm:$0xff] }
 0x478   : > { %9626 = vmatprep.mubr.msk.f32.mxu1 %vm225_vm0, %v11542_v11  ;;  %v6451_v11 = vld [vmem:[#allocation2 + $0x49] sm:$0xff] }
 0x47b   : > { %9627 = vmatmul.mubr.msk.f32.gmra.mrb[4].mxu1 %vm225_vm0, %v11546_v13  ;;  %v6452_v13 = vld [vmem:[#allocation2 + $0x51] sm:$0xff] }
 0x47c   : > { %9629 = vmatprep.mubr.msk.f32.mxu1 %vm225_vm0, %v11550_v14  ;;  %v6453_v14 = vld [vmem:[#allocation2 + $0x61] sm:$0xff] }
 0x47f   : > { %9630 = vmatmul.mubr.msk.f32.gmra.mrb[6].mxu1 %vm225_vm0, %v11554_v15  ;;  %v6454_v15 = vld [vmem:[#allocation2 + $0x69] sm:$0xff] }
 0x480   : > { %9632 = vmatprep.mubr.msk.f32.mxu1 %vm225_vm0, %v11558_v17  ;;  %v6455_v17 = vld [vmem:[#allocation2 + $0x79] sm:$0xff] }
 0x483   : > { %9633 = vmatmul.mubr.msk.f32.gmra.mrb[8].mxu1 %vm225_vm0, %v11562_v21  ;;  %v6456_v21 = vld [vmem:[#allocation2 + $0x81] sm:$0xff] }
 0x484   : > { %9635 = vmatprep.mubr.msk.f32.mxu1 %vm225_vm0, %v11566_v22  ;;  %v6457_v22 = vld [vmem:[#allocation2 + $0x91] sm:$0xff] }
 0x487   : > { %9636 = vmatmul.mubr.msk.f32.gmra.mrb[10].mxu1 %vm225_vm0, %v11570_v23  ;;  %v6458_v23 = vld [vmem:[#allocation2 + $0x99] sm:$0xff] }
 0x488   : > { %9638 = vmatprep.mubr.msk.f32.mxu1 %vm225_vm0, %v11574_v24  ;;  %v12588_v24 = vld [vmem:[#allocation15_spill] sm:$0xff] }
 0x48b   : > { %9639 = vmatmul.mubr.msk.f32.gmra.mrb[12].mxu1 %vm225_vm0, %v11578_v25  ;;  %v12589_v25 = vld [vmem:[#allocation20_spill] sm:$0xff] }
 0x48c   : > { %9641 = vmatprep.mubr.msk.f32.mxu1 %vm225_vm0, %v11582_v45  ;;  %v12590_v45 = vld [vmem:[#allocation22_spill] sm:$0xff] }
 0x48f   : > { %9642 = vmatmul.mubr.msk.f32.gmra.mrb[14].mxu1 %vm225_vm0, %v11586_v28  ;;  %v12591_v28 = vld [vmem:[#allocation24_spill] sm:$0xff] }
 0x490   : > { %9644 = vmatprep.mubr.msk.f32.mxu1 %vm225_vm0, %v11590_v47  ;;  %v6866_v47 = vld [vmem:[#allocation2 + $0x19a] sm:$0xff] }
 0x493   : > { %9645 = vmatmul.mubr.msk.f32.gmra.mrb[16].mxu1 %vm225_vm0, %v11594_v48  ;;  %v12163_v48 = vld [vmem:[%s12306_s4] ss:$0 sm:$0xff] }
 0x494   : > { %9647 = vmatprep.mubr.msk.f32.mxu1 %vm225_vm0, %v11598_v27 }
 0x497   : > { %9648 = vmatmul.mubr.msk.f32.gmra.mrb[18].mxu1 %vm225_vm0, %v11602_v30  ;;  %v8240_v30 = vld [vmem:[%s10349_s27 + $0x21] sm:$0xff] }
 0x498   : > { %9650 = vmatprep.mubr.msk.f32.mxu1 %vm225_vm0, %v11606_v50 }
 0x49b   : > { %9651 = vmatmul.mubr.msk.f32.gmra.mrb[20].mxu1 %vm225_vm0, %v11610_v52 }
 0x49c   : > { %9653 = vmatprep.mubr.msk.f32.mxu1 %vm225_vm0, %v11614_v56  ;;  %v8239_v56 = vld [vmem:[%s10349_s27 + $0x19] sm:$0xff] }
 0x49f   : > { %9654 = vmatmul.mubr.msk.f32.gmra.mrb[22].mxu1 %vm225_vm0, %v11618_v58 }
 0x4a0   : > { %9656 = vmatprep.mubr.msk.f32.mxu1 %vm225_vm0, %v11622_v59 }
 0x4a3   : > { %9657 = vmatmul.mubr.msk.f32.gmra.mrb[24].mxu1 %vm225_vm0, %v11626_v60 }
 0x4a4   : > { %9659 = vmatprep.mubr.msk.f32.mxu1 %vm225_vm0, %v11630_v62 }
 0x4a7   : > { %9660 = vmatmul.mubr.msk.f32.gmra.mrb[26].mxu1 %vm225_vm0, %v11634_v3  ;;  %v8242_v3 = vld [vmem:[%s10349_s27 + $0x39] sm:$0xff] }
 0x4a8   : > { %9662 = vmatprep.mubr.msk.f32.mxu1 %vm225_vm0, %v11831_v31  ;;  %v8241_v31 = vld [vmem:[%s10349_s27 + $0x31] sm:$0xff] }
 0x4ab   : > { %9663 = vmatmul.mubr.msk.f32.gmra.mrb[28].mxu1 %vm225_vm0, %v11835_v4 }
 0x4ac   : > { %9665 = vmatprep.mubr.msk.f32.mxu1 %vm225_vm0, %v6092_v41  ;;  %v8246_v41 = vld [vmem:[%s10349_s27 + $0x69] sm:$0xff] }
 0x4af   : > { %9666 = vmatmul.mubr.msk.f32.gmra.mrb[30].mxu1 %vm225_vm0, %v6093_v7 }
 0x4b0   : > { %9670 = vmatprep.mubr.msk.f32.mxu1 %vm225_vm0, %v6449_v54 }
 0x4b3   : > { %9671 = vmatmul.mubr.msk.f32.vlgmr.msra.gmra.mrb[0].mxu1 %vm225_vm0, %v6450_v9 }
 0x4b4   : > { %9719 = vmatpush3.msra.mxu1 %v8205_v35  ;;  %9673 = vmatprep.mubr.msk.f32.mxu1 %vm225_vm0, %v6451_v11  ;;  %v8245_v11 = vld [vmem:[%s10349_s27 + $0x61] sm:$0xff] }
 0x4b7   : > { %9674 = vmatmul.mubr.msk.f32.gmra.mrb[2].mxu1 %vm225_vm0, %v6452_v13 }
 0x4b8   : > { %9676 = vmatprep.mubr.msk.f32.mxu1 %vm225_vm0, %v6453_v14 }
 0x4bb   : > { %9677 = vmatmul.mubr.msk.f32.gmra.mrb[4].mxu1 %vm225_vm0, %v6454_v15 }
 0x4bc   : > { %9679 = vmatprep.mubr.msk.f32.mxu1 %vm225_vm0, %v6455_v17 }
 0x4bf   : > { %9680 = vmatmul.mubr.msk.f32.gmra.mrb[6].mxu1 %vm225_vm0, %v6456_v21 }
 0x4c0   : > { %9682 = vmatprep.mubr.msk.f32.mxu1 %vm225_vm0, %v6457_v22  ;;  %v8248_v22 = vld [vmem:[%s10349_s27 + $0x81] sm:$0xff] }
 0x4c3   : > { %9683 = vmatmul.mubr.msk.f32.gmra.mrb[8].mxu1 %vm225_vm0, %v6458_v23 }
 0x4c4   : > { %9685 = vmatprep.mubr.msk.f32.mxu1 %vm225_vm0, %v11409_v63  ;;  %v6479_v63 = vld [vmem:[#allocation2 + $0x199] sm:$0xff] }
 0x4c7   : > { %9686 = vmatmul.mubr.msk.f32.gmra.mrb[10].mxu1 %vm225_vm0, %v11415_v1  ;;  %v6480_v1 = vld [vmem:[#allocation2 + $0x1a1] sm:$0xff] }
 0x4c8   : > { %9688 = vmatprep.mubr.msk.f32.mxu1 %vm225_vm0, %v11421_v38  ;;  %v12574_v38 = vld [vmem:[#allocation31_spill] sm:$0xff] }
 0x4cb   : > { %9689 = vmatmul.mubr.msk.f32.gmra.mrb[12].mxu1 %vm225_vm0, %v11427_v37  ;;  %v12575_v37 = vld [vmem:[#allocation33_spill] sm:$0xff] }
 0x4cc   : > { %9691 = vmatprep.mubr.msk.f32.mxu1 %vm225_vm0, %v11433_v42  ;;  %v12576_v42 = vld [vmem:[#allocation35_spill] sm:$0xff] }
 0x4cf   : > { %9692 = vmatmul.mubr.msk.f32.gmra.mrb[14].mxu1 %vm225_vm0, %v11439_v8  ;;  %v12577_v8 = vld [vmem:[#allocation3_spill] sm:$0xff] }
 0x4d0   : > { %9694 = vmatprep.mubr.msk.f32.mxu1 %vm225_vm0, %v11445_v16  ;;  %v12578_v16 = vld [vmem:[#allocation4_spill] sm:$0xff] }
 0x4d3   : > { %9695 = vmatmul.mubr.msk.f32.gmra.mrb[16].mxu1 %vm225_vm0, %v11451_v19  ;;  %v12579_v19 = vld [vmem:[#allocation5_spill] sm:$0xff] }
 0x4d4   : > { %9697 = vmatprep.mubr.msk.f32.mxu1 %vm225_vm0, %v11457_v43  ;;  %v12580_v43 = vld [vmem:[#allocation6_spill] sm:$0xff] }
 0x4d7   : > { %9698 = vmatmul.mubr.msk.f32.gmra.mrb[18].mxu1 %vm225_vm0, %v11463_v46  ;;  %v12581_v46 = vld [vmem:[#allocation7_spill] sm:$0xff] }
 0x4d8   : > { %9700 = vmatprep.mubr.msk.f32.mxu1 %vm225_vm0, %v11469_v32  ;;  %v12582_v32 = vld [vmem:[#allocation8_spill] sm:$0xff] }
 0x4db   : > { %9701 = vmatmul.mubr.msk.f32.gmra.mrb[20].mxu1 %vm225_vm0, %v11475_v51  ;;  %v12583_v51 = vld [vmem:[#allocation9_spill] sm:$0xff] }
 0x4dc   : > { %9703 = vmatprep.mubr.msk.f32.mxu1 %vm225_vm0, %v11481_v61  ;;  %v12584_v61 = vld [vmem:[#allocation10_spill] sm:$0xff] }
 0x4df   : > { %9704 = vmatmul.mubr.msk.f32.gmra.mrb[22].mxu1 %vm225_vm0, %v11487_v0  ;;  %v12585_v0 = vld [vmem:[#allocation37_spill] sm:$0xff] }
 0x4e0   : > { %9706 = vmatprep.mubr.msk.f32.mxu1 %vm225_vm0, %v11492_v36  ;;  %v12586_v36 = vld [vmem:[#allocation38_spill] sm:$0xff] }
 0x4e3   : > { %9707 = vmatmul.mubr.msk.f32.gmra.mrb[24].mxu1 %vm225_vm0, %v11497_v55  ;;  %v12587_v55 = vld [vmem:[#allocation13_spill] sm:$0xff] }
 0x4e4   : > { %9709 = vmatprep.mubr.msk.f32.mxu1 %vm225_vm0, %v12546_v39 }
 0x4e7   : > { %9710 = vmatmul.mubr.msk.f32.gmra.mrb[26].mxu1 %vm225_vm0, %v12547_v40 }
 0x4e8   : > { %9712 = vmatprep.mubr.msk.f32.mxu1 %vm225_vm0, %v11902_v10 }
 0x4eb   : > { %9713 = vmatmul.mubr.msk.f32.gmra.mrb[28].mxu1 %vm225_vm0, %v11906_v12 }
 0x4ec   : > { %9715 = vmatprep.mubr.msk.f32.mxu1 %vm225_vm0, %v6479_v63 }
 0x4ef   : > { %9716 = vmatmul.mubr.msk.f32.gmra.mrb[30].mxu1 %vm225_vm0, %v6480_v1 }
 0x4f0   : > { %9720 = vmatprep.mubr.msk.f32.mxu1 %vm225_vm0, %v12550_v44 }
 0x4f3   : > { %9721 = vmatmul.mubr.msk.f32.vlgmr.msra.gmra.mrb[0].mxu1 %vm225_vm0, %v12574_v38  ;;  %v8247_v38 = vld [vmem:[%s10349_s27 + $0x79] sm:$0xff] }
 0x4f4   : > { %9723 = vmatprep.mubr.msk.f32.mxu1 %vm225_vm0, %v12575_v37 }
 0x4f7   : > { %9724 = vmatmul.mubr.msk.f32.gmra.mrb[2].mxu1 %vm225_vm0, %v12576_v42 }
 0x4f8   : > { %9726 = vmatprep.mubr.msk.f32.mxu1 %vm225_vm0, %v12577_v8 }
 0x4fb   : > { %9727 = vmatmul.mubr.msk.f32.gmra.mrb[4].mxu1 %vm225_vm0, %v12578_v16 }
 0x4fc   : > { %9729 = vmatprep.mubr.msk.f32.mxu1 %vm225_vm0, %v12579_v19 }
 0x4ff   : > { %9730 = vmatmul.mubr.msk.f32.gmra.mrb[6].mxu1 %vm225_vm0, %v12580_v43  ;;  %v8250_v43 = vld [vmem:[%s10349_s27 + $0x99] sm:$0xff] }
 0x500   : > { %9732 = vmatprep.mubr.msk.f32.mxu1 %vm225_vm0, %v12581_v46 }
 0x503   : > { %9733 = vmatmul.mubr.msk.f32.gmra.mrb[8].mxu1 %vm225_vm0, %v12582_v32 }
 0x504   : > { %9735 = vmatprep.mubr.msk.f32.mxu1 %vm225_vm0, %v12583_v51 }
 0x507   : > { %9736 = vmatmul.mubr.msk.f32.gmra.mrb[10].mxu1 %vm225_vm0, %v12584_v61  ;;  %v8249_v61 = vld [vmem:[%s10349_s27 + $0x91] sm:$0xff] }
 0x508   : > { %9738 = vmatprep.mubr.msk.f32.mxu1 %vm225_vm0, %v12585_v0 }
 0x50b   : > { %9739 = vmatmul.mubr.msk.f32.gmra.mrb[12].mxu1 %vm225_vm0, %v12586_v36 }
 0x50c   : > { %9741 = vmatprep.mubr.msk.f32.mxu1 %vm225_vm0, %v12587_v55 }
 0x50f   : > { %9742 = vmatmul.mubr.msk.f32.gmra.mrb[14].mxu1 %vm225_vm0, %v12565_v18 }
 0x510   : > { %9744 = vmatprep.mubr.msk.f32.mxu1 %vm225_vm0, %v12588_v24 }
 0x513   : > { %9745 = vmatmul.mubr.msk.f32.gmra.mrb[16].mxu1 %vm225_vm0, %v12567_v49 }
 0x514   : > { %9747 = vmatprep.mubr.msk.f32.mxu1 %vm225_vm0, %v12568_v29 }
 0x517   : > { %9748 = vmatmul.mubr.msk.f32.gmra.mrb[18].mxu1 %vm225_vm0, %v12569_v53  ;;  %v8243_v53 = vld [vmem:[%s10349_s27 + $0x49] sm:$0xff] }
 0x518   : > { %9750 = vmatprep.mubr.msk.f32.mxu1 %vm225_vm0, %v12589_v25 }
 0x51b   : > { %9751 = vmatmul.mubr.msk.f32.gmra.mrb[20].mxu1 %vm225_vm0, %v12571_v5 }
 0x51c   : > { %9753 = vmatprep.mubr.msk.f32.mxu1 %vm225_vm0, %v12590_v45  ;;  %v8252_v45 = vld [vmem:[%s10349_s27 + $0xb1] sm:$0xff] }
 0x51f   : > { %9754 = vmatmul.mubr.msk.f32.gmra.mrb[22].mxu1 %vm225_vm0, %v11747_v34  ;;  %v6867_v34 = vld [vmem:[#allocation2 + $0x1a2] sm:$0xff] }
 0x520   : > { %9756 = vmatprep.mubr.msk.f32.mxu1 %vm225_vm0, %v12573_v26 }
 0x523   : > { %9757 = vmatmul.mubr.msk.f32.gmra.mrb[24].mxu1 %vm225_vm0, %v11755_v2 }
 0x524   : > { %9759 = vmatprep.mubr.msk.f32.mxu1 %vm225_vm0, %v12591_v28 }
 0x527   : > { %9760 = vmatmul.mubr.msk.f32.gmra.mrb[26].mxu1 %vm225_vm0, %v11763_v33 }
 0x528   : > { %9762 = vmatprep.mubr.msk.f32.mxu1 %vm225_vm0, %v11973_v57 }
 0x52b   : > { %9763 = vmatmul.mubr.msk.f32.gmra.mrb[28].mxu1 %vm225_vm0, %v11977_v6 }
 0x52c   : > { %9765 = vmatprep.mubr.msk.f32.mxu1 %vm225_vm0, %v6866_v47 }
 0x52f   : > { %9766 = vmatmul.mubr.msk.f32.gmra.mrb[30].mxu1 %vm225_vm0, %v6867_v34 }
 0x5c6   : > { %v9722_v27 = vpop.f32.mrb[0].mxu1 }
 0x5c7   : > { %v7231_v50 = vadd.f32 %v9722_v27, %v12163_v48  ;;  %v7032_v52 = vpop.f32.mrb[1].mxu1  ;;  %v8251_v27 = vld [vmem:[%s10349_s27 + $0xa9] sm:$0xff] }
 0x5c8   : > { %v7230_v58 = vadd.f32 %v12163_v48, %v7032_v52 }
 0x5c9   : > { %v7295_v59 = vadd.f32 %v8240_v30, %v7231_v50 }
 0x5ca   : > { %v7294_v60 = vadd.f32 %v8239_v56, %v7230_v58  ;;  %v9725_v62 = vpop.f32.mrb[2].mxu1 }
 0x5cb   : > { %v7327_v2 = vmax.f32 %v7295_v59, 0.0  ;;  %v7233_v35 = vadd.f32 %v9725_v62, %v12163_v48  ;;  %v7042_v33 = vpop.f32.mrb[3].mxu1  ;;  %v8254_v59 = vld [vmem:[%s10349_s27 + $0xc9] sm:$0xff] }
 0x5cc   : > { %v7326_v4 = vmax.f32 %v7294_v60, 0.0  ;;  %v7232_v39 = vadd.f32 %v12163_v48, %v7042_v33 }
 0x5cd   : > { %7359 = vst.msk [vmem:[%s12173_s22 + $0x8] sm:$0xff] %vm225_vm0, %v7327_v2  ;;  %v7297_v40 = vadd.f32 %v8242_v3, %v7233_v35  ;;  %v8253_v2 = vld [vmem:[%s10349_s27 + $0xc1] sm:$0xff] }
 0x5ce   : > { %7358 = vst.msk [vmem:[%s12173_s22] sm:$0xff] %vm225_vm0, %v7326_v4  ;;  %v7296_v10 = vadd.f32 %v8241_v31, %v7232_v39  ;;  %v9728_v12 = vpop.f32.mrb[4].mxu1 }
 0x5cf   : > { %v7329_v44 = vmax.f32 %v7297_v40, 0.0  ;;  %v7235_v49 = vadd.f32 %v9728_v12, %v12163_v48  ;;  %v7052_v29 = vpop.f32.mrb[5].mxu1  ;;  %v8256_v40 = vld [vmem:[%s10349_s27 + $0xe1] sm:$0xff] }
 0x5d0   : > { %v7328_v57 = vmax.f32 %v7296_v10, 0.0  ;;  %v7234_v5 = vadd.f32 %v12163_v48, %v7052_v29 }
 0x5d1   : > { %7361 = vst.msk [vmem:[%s12173_s22 + $0x18] sm:$0xff] %vm225_vm0, %v7329_v44  ;;  %v7299_v6 = vadd.f32 %v8244_v20, %v7235_v49  ;;  %v8255_v44 = vld [vmem:[%s10349_s27 + $0xd9] sm:$0xff] }
 0x5d2   : > { %7360 = vst.msk [vmem:[%s12173_s22 + $0x10] sm:$0xff] %vm225_vm0, %v7328_v57  ;;  %v7298_v18 = vadd.f32 %v8243_v53, %v7234_v5  ;;  %v9731_v26 = vpop.f32.mrb[6].mxu1 }
 0x5d3   : > { %v7331_v7 = vmax.f32 %v7299_v6, 0.0  ;;  %v7237_v54 = vadd.f32 %v9731_v26, %v12163_v48  ;;  %v7062_v9 = vpop.f32.mrb[7].mxu1  ;;  %v8258_v6 = vld [vmem:[%s10349_s27 + $0xf9] sm:$0xff] }
 0x5d4   : > { %v7330_v13 = vmax.f32 %v7298_v18, 0.0  ;;  %v7236_v14 = vadd.f32 %v12163_v48, %v7062_v9 }
 0x5d5   : > { %7363 = vst.msk [vmem:[%s12173_s22 + $0x28] sm:$0xff] %vm225_vm0, %v7331_v7  ;;  %v7301_v15 = vadd.f32 %v8246_v41, %v7237_v54  ;;  %v8257_v7 = vld [vmem:[%s10349_s27 + $0xf1] sm:$0xff] }
 0x5d6   : > { %7362 = vst.msk [vmem:[%s12173_s22 + $0x20] sm:$0xff] %vm225_vm0, %v7330_v13  ;;  %v7300_v17 = vadd.f32 %v8245_v11, %v7236_v14  ;;  %v9734_v21 = vpop.f32.mrb[8].mxu1 }
 0x5d7   : > { %v7333_v23 = vmax.f32 %v7301_v15, 0.0  ;;  %v7239_v63 = vadd.f32 %v9734_v21, %v12163_v48  ;;  %v7072_v1 = vpop.f32.mrb[9].mxu1  ;;  %v8260_v15 = vld [vmem:[%s10349_s27 + $0x111] sm:$0xff] }
 0x5d8   : > { %v7332_v37 = vmax.f32 %v7300_v17, 0.0  ;;  %v7238_v42 = vadd.f32 %v12163_v48, %v7072_v1 }
 0x5d9   : > { %7365 = vst.msk [vmem:[%s12173_s22 + $0x38] sm:$0xff] %vm225_vm0, %v7333_v23  ;;  %v7303_v8 = vadd.f32 %v8248_v22, %v7239_v63  ;;  %v8259_v23 = vld [vmem:[%s10349_s27 + $0x109] sm:$0xff] }
 0x5da   : > { %7364 = vst.msk [vmem:[%s12173_s22 + $0x30] sm:$0xff] %vm225_vm0, %v7332_v37  ;;  %v7302_v16 = vadd.f32 %v8247_v38, %v7238_v42  ;;  %v9737_v19 = vpop.f32.mrb[10].mxu1 }
 0x5db   : > { %v7335_v46 = vmax.f32 %v7303_v8, 0.0  ;;  %v7241_v32 = vadd.f32 %v9737_v19, %v12163_v48  ;;  %v7082_v51 = vpop.f32.mrb[11].mxu1  ;;  %v8262_v8 = vld [vmem:[%s10349_s27 + $0x129] sm:$0xff] }
 0x5dc   : > { %v7334_v0 = vmax.f32 %v7302_v16, 0.0  ;;  %v7240_v36 = vadd.f32 %v12163_v48, %v7082_v51 }
 0x5dd   : > { %7367 = vst.msk [vmem:[%s12173_s22 + $0x48] sm:$0xff] %vm225_vm0, %v7335_v46  ;;  %v7305_v55 = vadd.f32 %v8250_v43, %v7241_v32  ;;  %v8261_v46 = vld [vmem:[%s10349_s27 + $0x121] sm:$0xff] }
 0x5de   : > { %7366 = vst.msk [vmem:[%s12173_s22 + $0x40] sm:$0xff] %vm225_vm0, %v7334_v0  ;;  %v7304_v24 = vadd.f32 %v8249_v61, %v7240_v36  ;;  %v9740_v25 = vpop.f32.mrb[12].mxu1 }
 0x5df   : > { %v7337_v28 = vmax.f32 %v7305_v55, 0.0  ;;  %v7243_v47 = vadd.f32 %v9740_v25, %v12163_v48  ;;  %v7092_v34 = vpop.f32.mrb[13].mxu1  ;;  %v8264_v55 = vld [vmem:[%s10349_s27 + $0x141] sm:$0xff] }
 0x5e0   : > { %v7336_v30 = vmax.f32 %v7304_v24, 0.0  ;;  %v7242_v50 = vadd.f32 %v12163_v48, %v7092_v34 }
 0x5e1   : > { %7369 = vst.msk [vmem:[%s12173_s22 + $0x58] sm:$0xff] %vm225_vm0, %v7337_v28  ;;  %v7307_v52 = vadd.f32 %v8252_v45, %v7243_v47  ;;  %v8263_v28 = vld [vmem:[%s10349_s27 + $0x139] sm:$0xff] }
 0x5e2   : > { %7368 = vst.msk [vmem:[%s12173_s22 + $0x50] sm:$0xff] %vm225_vm0, %v7336_v30  ;;  %v7306_v56 = vadd.f32 %v8251_v27, %v7242_v50  ;;  %v9743_v58 = vpop.f32.mrb[14].mxu1 }
 0x5e3   : > { %v7339_v60 = vmax.f32 %v7307_v52, 0.0  ;;  %v7245_v62 = vadd.f32 %v9743_v58, %v12163_v48  ;;  %v7102_v3 = vpop.f32.mrb[15].mxu1  ;;  %v8266_v52 = vld [vmem:[%s10349_s27 + $0x159] sm:$0xff] }
 0x5e4   : > { %v7338_v35 = vmax.f32 %v7306_v56, 0.0  ;;  %v7244_v33 = vadd.f32 %v12163_v48, %v7102_v3 }
 0x5e5   : > { %7371 = vst.msk [vmem:[%s12173_s22 + $0x68] sm:$0xff] %vm225_vm0, %v7339_v60  ;;  %v7309_v31 = vadd.f32 %v8254_v59, %v7245_v62  ;;  %v8265_v60 = vld [vmem:[%s10349_s27 + $0x151] sm:$0xff] }
 0x5e6   : > { %7370 = vst.msk [vmem:[%s12173_s22 + $0x60] sm:$0xff] %vm225_vm0, %v7338_v35  ;;  %v7308_v4 = vadd.f32 %v8253_v2, %v7244_v33  ;;  %v9746_v39 = vpop.f32.mrb[16].mxu1 }
 0x5e7   : > { %v7341_v10 = vmax.f32 %v7309_v31, 0.0  ;;  %v7247_v12 = vadd.f32 %v9746_v39, %v12163_v48  ;;  %v7112_v20 = vpop.f32.mrb[17].mxu1  ;;  %v8268_v31 = vld [vmem:[%s10349_s27 + $0x171] sm:$0xff] }
 0x5e8   : > { %v7340_v49 = vmax.f32 %v7308_v4, 0.0  ;;  %v7246_v29 = vadd.f32 %v12163_v48, %v7112_v20 }
 0x5e9   : > { %7373 = vst.msk [vmem:[%s12173_s22 + $0x78] sm:$0xff] %vm225_vm0, %v7341_v10  ;;  %v7311_v53 = vadd.f32 %v8256_v40, %v7247_v12  ;;  %v8267_v10 = vld [vmem:[%s10349_s27 + $0x169] sm:$0xff] }
 0x5ea   : > { %7372 = vst.msk [vmem:[%s12173_s22 + $0x70] sm:$0xff] %vm225_vm0, %v7340_v49  ;;  %v7310_v57 = vadd.f32 %v8255_v44, %v7246_v29  ;;  %v9749_v5 = vpop.f32.mrb[18].mxu1 }
 0x5eb   : > { %v7343_v18 = vmax.f32 %v7311_v53, 0.0  ;;  %v7249_v26 = vadd.f32 %v9749_v5, %v12163_v48  ;;  %v7122_v41 = vpop.f32.mrb[19].mxu1  ;;  %v8270_v53 = vld [vmem:[%s10349_s27 + $0x189] sm:$0xff] }
 0x5ec   : > { %v7342_v54 = vmax.f32 %v7310_v57, 0.0  ;;  %v7248_v9 = vadd.f32 %v12163_v48, %v7122_v41 }
 0x5ed   : > { %7375 = vst.msk [vmem:[%s12173_s22 + $0x88] sm:$0xff] %vm225_vm0, %v7343_v18  ;;  %v7313_v11 = vadd.f32 %v8258_v6, %v7249_v26  ;;  %v8269_v18 = vld [vmem:[%s10349_s27 + $0x181] sm:$0xff] }
 0x5ee   : > { %7374 = vst.msk [vmem:[%s12173_s22 + $0x80] sm:$0xff] %vm225_vm0, %v7342_v54  ;;  %v7312_v13 = vadd.f32 %v8257_v7, %v7248_v9  ;;  %v9752_v14 = vpop.f32.mrb[20].mxu1 }
 0x5ef   : > { %v7345_v17 = vmax.f32 %v7313_v11, 0.0  ;;  %v7251_v21 = vadd.f32 %v9752_v14, %v12163_v48  ;;  %v7132_v22 = vpop.f32.mrb[21].mxu1 }
 0x5f0   : > { %v7344_v63 = vmax.f32 %v7312_v13, 0.0  ;;  %v7250_v1 = vadd.f32 %v12163_v48, %v7132_v22 }
 0x5f1   : > { %7377 = vst.msk [vmem:[%s12173_s22 + $0x98] sm:$0xff] %vm225_vm0, %v7345_v17  ;;  %v7315_v38 = vadd.f32 %v8260_v15, %v7251_v21 }
 0x5f2   : > { %7376 = vst.msk [vmem:[%s12173_s22 + $0x90] sm:$0xff] %vm225_vm0, %v7344_v63  ;;  %v7314_v37 = vadd.f32 %v8259_v23, %v7250_v1  ;;  %v9755_v42 = vpop.f32.mrb[22].mxu1 }
 0x5f3   : > { %v7347_v16 = vmax.f32 %v7315_v38, 0.0  ;;  %v7253_v19 = vadd.f32 %v9755_v42, %v12163_v48  ;;  %v7142_v43 = vpop.f32.mrb[23].mxu1 }
 0x5f4   : > { %v7346_v32 = vmax.f32 %v7314_v37, 0.0  ;;  %v7252_v51 = vadd.f32 %v12163_v48, %v7142_v43 }
 0x5f5   : > { %7379 = vst.msk [vmem:[%s12173_s22 + $0xa8] sm:$0xff] %vm225_vm0, %v7347_v16  ;;  %v7317_v61 = vadd.f32 %v8262_v8, %v7253_v19 }
 0x5f6   : > { %7378 = vst.msk [vmem:[%s12173_s22 + $0xa0] sm:$0xff] %vm225_vm0, %v7346_v32  ;;  %v7316_v0 = vadd.f32 %v8261_v46, %v7252_v51  ;;  %v9758_v36 = vpop.f32.mrb[24].mxu1 }
 0x5f7   : > { %v7349_v24 = vmax.f32 %v7317_v61, 0.0  ;;  %v7255_v25 = vadd.f32 %v9758_v36, %v12163_v48  ;;  %v7152_v45 = vpop.f32.mrb[25].mxu1 }
 0x5f8   : > { %v7348_v47 = vmax.f32 %v7316_v0, 0.0  ;;  %v7254_v34 = vadd.f32 %v12163_v48, %v7152_v45 }
 0x5f9   : > { %7381 = vst.msk [vmem:[%s12173_s22 + $0xb8] sm:$0xff] %vm225_vm0, %v7349_v24  ;;  %v7319_v27 = vadd.f32 %v8264_v55, %v7255_v25 }
 0x5fa   : > { %7380 = vst.msk [vmem:[%s12173_s22 + $0xb0] sm:$0xff] %vm225_vm0, %v7348_v47  ;;  %v7318_v30 = vadd.f32 %v8263_v28, %v7254_v34  ;;  %v9761_v50 = vpop.f32.mrb[26].mxu1 }
 0x5fb   : > { %v7351_v56 = vmax.f32 %v7319_v27, 0.0  ;;  %v7257_v58 = vadd.f32 %v9761_v50, %v12163_v48  ;;  %v7162_v59 = vpop.f32.mrb[27].mxu1 }
 0x5fc   : > { %v7350_v62 = vmax.f32 %v7318_v30, 0.0  ;;  %v7256_v3 = vadd.f32 %v12163_v48, %v7162_v59 }
 0x5fd   : > { %7383 = vst.msk [vmem:[%s12173_s22 + $0xc8] sm:$0xff] %vm225_vm0, %v7351_v56  ;;  %v7321_v2 = vadd.f32 %v8266_v52, %v7257_v58 }
 0x5fe   : > { %7382 = vst.msk [vmem:[%s12173_s22 + $0xc0] sm:$0xff] %vm225_vm0, %v7350_v62  ;;  %v7320_v35 = vadd.f32 %v8265_v60, %v7256_v3  ;;  %v9764_v33 = vpop.f32.mrb[28].mxu1 }
 0x5ff   : > { %v7353_v4 = vmax.f32 %v7321_v2, 0.0  ;;  %v7259_v39 = vadd.f32 %v9764_v33, %v12163_v48  ;;  %v7172_v40 = vpop.f32.mrb[29].mxu1 }
 0x600   : > { %v7352_v12 = vmax.f32 %v7320_v35, 0.0  ;;  %v7258_v20 = vadd.f32 %v12163_v48, %v7172_v40 }
 0x601   : > { %7385 = vst.msk [vmem:[%s12173_s22 + $0xd8] sm:$0xff] %vm225_vm0, %v7353_v4  ;;  %v7323_v44 = vadd.f32 %v8268_v31, %v7259_v39 }
 0x602   : > { %7384 = vst.msk [vmem:[%s12173_s22 + $0xd0] sm:$0xff] %vm225_vm0, %v7352_v12  ;;  %v7322_v49 = vadd.f32 %v8267_v10, %v7258_v20  ;;  %v9767_v29 = vpop.f32.mrb[30].mxu1 }
 0x603   : > { %v7355_v57 = vmax.f32 %v7323_v44, 0.0  ;;  %v7261_v5 = vadd.f32 %v9767_v29, %v12163_v48  ;;  %v7182_v6 = vpop.f32.mrb[31].mxu1 }
 0x604   : > { %v7354_v26 = vmax.f32 %v7322_v49, 0.0  ;;  %v7260_v41 = vadd.f32 %v12163_v48, %v7182_v6 }
 0x605   : > { %7387 = vst.msk [vmem:[%s12173_s22 + $0xe8] sm:$0xff] %vm225_vm0, %v7355_v57  ;;  %v7325_v7 = vadd.f32 %v8270_v53, %v7261_v5 }
 0x606   : > { %7386 = vst.msk [vmem:[%s12173_s22 + $0xe0] sm:$0xff] %vm225_vm0, %v7354_v26  ;;  %v7324_v54 = vadd.f32 %v8269_v18, %v7260_v41 }
 0x607   : > { %v7357_v9 = vmax.f32 %v7325_v7, 0.0 }
 0x608   : > { %v7356_v11 = vmax.f32 %v7324_v54, 0.0 }
 0x609   : > { %7389 = vst.msk [vmem:[%s12173_s22 + $0xf8] sm:$0xff] %vm225_vm0, %v7357_v9 }
 0x60a   : > { %7388 = vst.msk [vmem:[%s12173_s22 + $0xf0] sm:$0xff] %vm225_vm0, %v7356_v11 }
 0x60b PF: > { %s15_s18 = sadd.s32 1, %s10296_s18  }
 0x60c   : > { %p12_p4 = scmp.ge.s32.totalorder %s15_s18, 4  }
 0x60e   :  { %14 = sbr.rel (!%p12_p4) target bundleno = 1 (0x1), region = 90 }

</bundles_post_ra>
